<compile_context>
chip_gen: v6e
topology: v6e:2x2x1
jax: 0.10.0
libtpu: 0.0.40
codegen_flags: <defaults>
</compile_context>

<pallas_src>
import jax
import jax.numpy as jnp
from jax.experimental import pallas as pl
from jax.experimental.pallas import tpu as pltpu

INPUT_DIM = 64
HIDDEN_DIM = 256
OUTPUT_DIM = 64 * 64  # 4096
BATCH = 8             # small demo batch, sublane-aligned


def dqn_mlp_kernel(x_ref, w1_ref, b1_ref, w2_ref, b2_ref, w3_ref, b3_ref, o_ref):
    """One grid step computes one (BATCH, TILE_N) tile of the final layer.

    The hidden layers are tiny and recomputed per step (grid is 1 or 2), which
    keeps the output-tile axis carry-free and safe for core-parallel execution.
    Grid-invariant inputs (x, w1, b1, w2, b2) are only DMA'd once since their
    block index never changes.
    """
    h1 = jnp.dot(x_ref[...], w1_ref[...],
                 preferred_element_type=jnp.float32) + b1_ref[...]
    h1 = jnp.maximum(h1, 0.0)
    h2 = jnp.dot(h1, w2_ref[...],
                 preferred_element_type=jnp.float32) + b2_ref[...]
    h2 = jnp.maximum(h2, 0.0)
    # Native MXU path: bf16 x bf16 with f32 accumulation.
    out = jnp.dot(h2.astype(jnp.bfloat16), w3_ref[...],
                  preferred_element_type=jnp.float32) + b3_ref[...]
    o_ref[...] = out.astype(o_ref.dtype)


def select_tiling():
    """Pick output tiling / grid semantics for the current TPU generation."""
    try:
        kind = jax.devices()[0].device_kind.lower()
    except Exception:
        kind = ""
    if "v7" in kind or "7x" in kind:
        # 2 TensorCores per chip: split the 4096-wide layer across cores.
        return 2048, (pltpu.CORE_PARALLEL,)
    # Single-TC chips (v5e / v6e): grid=1 removes per-step overhead.
    return OUTPUT_DIM, ("arbitrary",)


def prepare_params(params, tile_n):
    """One-time (init-time) weight repacking:
       * w3 -> bfloat16 (halves the dominant HBM stream, f32 accum in-kernel)
       * w3 -> (n_tiles, HIDDEN_DIM, tile_n) so each tile is one contiguous DMA
    """
    w1, b1, w2, b2, w3, b3 = params
    n_tiles = OUTPUT_DIM // tile_n
    w3t = (w3.astype(jnp.bfloat16)
             .reshape(HIDDEN_DIM, n_tiles, tile_n)
             .transpose(1, 0, 2))
    return (w1, b1, w2, b2, w3t, b3)


def dqn_forward(x, prepped_params, *, tile_n, dim_semantics):
    w1, b1, w2, b2, w3t, b3 = prepped_params
    B = x.shape[0]
    n_tiles = OUTPUT_DIM // tile_n

    grid_spec = pltpu.PrefetchScalarGridSpec(
        num_scalar_prefetch=0,
        grid=(n_tiles,),
        in_specs=[
            pl.BlockSpec((B, INPUT_DIM), lambda j: (0, 0)),            # x
            pl.BlockSpec((INPUT_DIM, HIDDEN_DIM), lambda j: (0, 0)),   # w1
            pl.BlockSpec((1, HIDDEN_DIM), lambda j: (0, 0)),           # b1
            pl.BlockSpec((HIDDEN_DIM, HIDDEN_DIM), lambda j: (0, 0)),  # w2
            pl.BlockSpec((1, HIDDEN_DIM), lambda j: (0, 0)),           # b2
            # Pre-tiled bf16 w3: leading dim squeezed, tile j is contiguous.
            pl.BlockSpec((None, HIDDEN_DIM, tile_n), lambda j: (j, 0, 0)),
            pl.BlockSpec((1, tile_n), lambda j: (0, j)),               # b3 tile
        ],
        out_specs=pl.BlockSpec((B, tile_n), lambda j: (0, j)),
    )

    return pl.pallas_call(
        dqn_mlp_kernel,
        out_shape=jax.ShapeDtypeStruct((B, OUTPUT_DIM), jnp.float32),
        grid_spec=grid_spec,
        compiler_params=pltpu.CompilerParams(dimension_semantics=dim_semantics),
    )(x, w1, b1, w2, b2, w3t, b3)


def init_params(key):
    """Deterministic init mimicking nn.Linear's U(-1/sqrt(fan_in), 1/sqrt(fan_in))."""
    ks = jax.random.split(key, 6)

    def linear(kw, kb, fan_in, fan_out):
        bound = 1.0 / jnp.sqrt(jnp.float32(fan_in))
        w = jax.random.uniform(kw, (fan_in, fan_out), jnp.float32, -bound, bound)
        b = jax.random.uniform(kb, (1, fan_out), jnp.float32, -bound, bound)
        return w, b

    w1, b1 = linear(ks[0], ks[1], INPUT_DIM, HIDDEN_DIM)
    w2, b2 = linear(ks[2], ks[3], HIDDEN_DIM, HIDDEN_DIM)
    w3, b3 = linear(ks[4], ks[5], HIDDEN_DIM, OUTPUT_DIM)
    return (w1, b1, w2, b2, w3, b3)


def reference_forward_f32(x, params):
    w1, b1, w2, b2, w3, b3 = params
    h = jnp.maximum(x @ w1 + b1, 0.0)
    h = jnp.maximum(h @ w2 + b2, 0.0)
    return h @ w3 + b3


def reference_forward_quant(x, params):
    """Same bf16-weight / bf16-activation last layer as the kernel (f32 accum)."""
    w1, b1, w2, b2, w3, b3 = params
    h = jnp.maximum(x @ w1 + b1, 0.0)
    h = jnp.maximum(h @ w2 + b2, 0.0)
    out = jnp.dot(h.astype(jnp.bfloat16), w3.astype(jnp.bfloat16),
                  preferred_element_type=jnp.float32)
    return out + b3


if __name__ == "__main__":
    key = jax.random.PRNGKey(0)
    k_params, k_x = jax.random.split(key)
    params = init_params(k_params)
    x = jax.random.normal(k_x, (BATCH, INPUT_DIM), jnp.float32)

    tile_n, dims = select_tiling()
    try:
        prepped = prepare_params(params, tile_n)
        out = jax.block_until_ready(
            dqn_forward(x, prepped, tile_n=tile_n, dim_semantics=dims))
    except Exception:
        # Conservative fallback that lowers on every generation.
        tile_n, dims = 2048, ("parallel",)
        prepped = prepare_params(params, tile_n)
        out = jax.block_until_ready(
            dqn_forward(x, prepped, tile_n=tile_n, dim_semantics=dims))

    assert out.shape == (BATCH, OUTPUT_DIM)

    # Tight check against a reference with identical bf16-last-layer numerics.
    ref_q = reference_forward_quant(x, params)
    assert jnp.allclose(out, ref_q, atol=2e-3, rtol=2e-3), \
        float(jnp.max(jnp.abs(out - ref_q)))
    # Loose check against the exact-fp32 PyTorch-equivalent forward.
    ref_f32 = reference_forward_f32(x, params)
    assert jnp.allclose(out, ref_f32, atol=2e-2, rtol=2e-2), \
        float(jnp.max(jnp.abs(out - ref_f32)))

    print("KERNEL_OK")
</pallas_src>

<mosaic_0001>
module attributes {stable_mosaic.version = 11 : i64} {
  func.func @dqn_mlp_kernel(%arg0: i32, %arg1: memref<8x64xf32, #tpu.memory_space<vmem>>, %arg2: memref<64x256xf32, #tpu.memory_space<vmem>>, %arg3: memref<1x256xf32, #tpu.memory_space<vmem>>, %arg4: memref<256x256xf32, #tpu.memory_space<vmem>>, %arg5: memref<1x256xf32, #tpu.memory_space<vmem>>, %arg6: memref<1x256x4096xbf16, #tpu.memory_space<vmem>>, %arg7: memref<1x4096xf32, #tpu.memory_space<vmem>>, %arg8: memref<8x4096xf32, #tpu.memory_space<vmem>>) attributes {dimension_semantics = [#tpu.dimension_semantics<arbitrary>], iteration_bounds = array<i64: 1>, scalar_prefetch = 0 : i64, scratch_operands = 0 : i64, tpu.core_type = #tpu.core_type<tc>, window_params = [{pipeline_mode = #tpu.pipeline_mode<synchronous>, transform_indices = @transform_0, window_bounds = array<i64: 8, 64>}, {pipeline_mode = #tpu.pipeline_mode<synchronous>, transform_indices = @transform_1, window_bounds = array<i64: 64, 256>}, {pipeline_mode = #tpu.pipeline_mode<synchronous>, transform_indices = @transform_2, window_bounds = array<i64: 1, 256>}, {pipeline_mode = #tpu.pipeline_mode<synchronous>, transform_indices = @transform_3, window_bounds = array<i64: 256, 256>}, {pipeline_mode = #tpu.pipeline_mode<synchronous>, transform_indices = @transform_4, window_bounds = array<i64: 1, 256>}, {transform_indices = @transform_5, window_bounds = array<i64: 1, 256, 4096>}, {transform_indices = @transform_6, window_bounds = array<i64: 1, 4096>}, {transform_indices = @transform_7, window_bounds = array<i64: 8, 4096>}]} {
    %c0 = arith.constant 0 : index
    %c0_0 = arith.constant 0 : index
    %0 = vector.load %arg1[%c0, %c0_0] : memref<8x64xf32, #tpu.memory_space<vmem>>, vector<8x64xf32>
    %c0_1 = arith.constant 0 : index
    %c0_2 = arith.constant 0 : index
    %1 = vector.load %arg2[%c0_1, %c0_2] : memref<64x256xf32, #tpu.memory_space<vmem>>, vector<64x256xf32>
    %cst = arith.constant dense<0.000000e+00> : vector<8x256xf32>
    %2 = tpu.matmul %0, %1, %cst {dimension_numbers = #tpu.dot_dimension_numbers<[1], [0], [0], [1], [0, 0, 1, 1], [], []>} : vector<8x64xf32>, vector<64x256xf32>, vector<8x256xf32> -> vector<8x256xf32>
    %c0_3 = arith.constant 0 : index
    %c0_4 = arith.constant 0 : index
    %3 = vector.load %arg3[%c0_3, %c0_4] : memref<1x256xf32, #tpu.memory_space<vmem>>, vector<1x256xf32>
    %4 = vector.broadcast %3 : vector<1x256xf32> to vector<8x256xf32>
    %5 = arith.addf %2, %4 : vector<8x256xf32>
    %cst_5 = arith.constant 0.000000e+00 : f32
    %6 = vector.broadcast %cst_5 : f32 to vector<8x256xf32>
    %7 = arith.maximumf %5, %6 : vector<8x256xf32>
    %c0_6 = arith.constant 0 : index
    %c0_7 = arith.constant 0 : index
    %8 = vector.load %arg4[%c0_6, %c0_7] : memref<256x256xf32, #tpu.memory_space<vmem>>, vector<256x256xf32>
    %cst_8 = arith.constant dense<0.000000e+00> : vector<8x256xf32>
    %9 = tpu.matmul %7, %8, %cst_8 {dimension_numbers = #tpu.dot_dimension_numbers<[1], [0], [0], [1], [0, 0, 1, 1], [], []>} : vector<8x256xf32>, vector<256x256xf32>, vector<8x256xf32> -> vector<8x256xf32>
    %c0_9 = arith.constant 0 : index
    %c0_10 = arith.constant 0 : index
    %10 = vector.load %arg5[%c0_9, %c0_10] : memref<1x256xf32, #tpu.memory_space<vmem>>, vector<1x256xf32>
    %11 = vector.broadcast %10 : vector<1x256xf32> to vector<8x256xf32>
    %12 = arith.addf %9, %11 : vector<8x256xf32>
    %cst_11 = arith.constant 0.000000e+00 : f32
    %13 = vector.broadcast %cst_11 : f32 to vector<8x256xf32>
    %14 = arith.maximumf %12, %13 : vector<8x256xf32>
    %15 = arith.truncf %14 : vector<8x256xf32> to vector<8x256xbf16>
    %c0_12 = arith.constant 0 : index
    %c0_13 = arith.constant 0 : index
    %c0_14 = arith.constant 0 : index
    %16 = vector.load %arg6[%c0_12, %c0_13, %c0_14] : memref<1x256x4096xbf16, #tpu.memory_space<vmem>>, vector<1x256x4096xbf16>
    %17 = vector.shape_cast %16 : vector<1x256x4096xbf16> to vector<256x4096xbf16>
    %cst_15 = arith.constant dense<0.000000e+00> : vector<8x4096xf32>
    %18 = tpu.matmul %15, %17, %cst_15 {dimension_numbers = #tpu.dot_dimension_numbers<[1], [0], [0], [1], [0, 0, 1, 1], [], []>} : vector<8x256xbf16>, vector<256x4096xbf16>, vector<8x4096xf32> -> vector<8x4096xf32>
    %c0_16 = arith.constant 0 : index
    %c0_17 = arith.constant 0 : index
    %19 = vector.load %arg7[%c0_16, %c0_17] : memref<1x4096xf32, #tpu.memory_space<vmem>>, vector<1x4096xf32>
    %20 = vector.broadcast %19 : vector<1x4096xf32> to vector<8x4096xf32>
    %21 = arith.addf %18, %20 : vector<8x4096xf32>
    %c0_18 = arith.constant 0 : index
    %c0_19 = arith.constant 0 : index
    %22 = vector.load %arg8[%c0_18, %c0_19] : memref<8x4096xf32, #tpu.memory_space<vmem>>, vector<8x4096xf32>
    tpu.vector_store %arg8[%c0_18, %c0_19], %21 {strides = array<i32>} : memref<8x4096xf32, #tpu.memory_space<vmem>>, vector<8x4096xf32>,
    return
  }
  func.func @transform_0(%arg0: i32) -> (i32, i32) {
    %c0_i32 = arith.constant 0 : i32
    %c0_i32_0 = arith.constant 0 : i32
    %c0_i32_1 = arith.constant 0 : i32
    return %c0_i32, %c0_i32_0 : i32, i32
  }
  func.func @transform_1(%arg0: i32) -> (i32, i32) {
    %c0_i32 = arith.constant 0 : i32
    %c0_i32_0 = arith.constant 0 : i32
    %c0_i32_1 = arith.constant 0 : i32
    return %c0_i32, %c0_i32_0 : i32, i32
  }
  func.func @transform_2(%arg0: i32) -> (i32, i32) {
    %c0_i32 = arith.constant 0 : i32
    %c0_i32_0 = arith.constant 0 : i32
    %c0_i32_1 = arith.constant 0 : i32
    return %c0_i32, %c0_i32_0 : i32, i32
  }
  func.func @transform_3(%arg0: i32) -> (i32, i32) {
    %c0_i32 = arith.constant 0 : i32
    %c0_i32_0 = arith.constant 0 : i32
    %c0_i32_1 = arith.constant 0 : i32
    return %c0_i32, %c0_i32_0 : i32, i32
  }
  func.func @transform_4(%arg0: i32) -> (i32, i32) {
    %c0_i32 = arith.constant 0 : i32
    %c0_i32_0 = arith.constant 0 : i32
    %c0_i32_1 = arith.constant 0 : i32
    return %c0_i32, %c0_i32_0 : i32, i32
  }
  func.func @transform_5(%arg0: i32) -> (i32, i32, i32) {
    %c0_i32 = arith.constant 0 : i32
    %c0_i32_0 = arith.constant 0 : i32
    %c0_i32_1 = arith.constant 0 : i32
    return %arg0, %c0_i32, %c0_i32_0 : i32, i32, i32
  }
  func.func @transform_6(%arg0: i32) -> (i32, i32) {
    %c0_i32 = arith.constant 0 : i32
    %c0_i32_0 = arith.constant 0 : i32
    return %c0_i32, %arg0 : i32, i32
  }
  func.func @transform_7(%arg0: i32) -> (i32, i32) {
    %c0_i32 = arith.constant 0 : i32
    %c0_i32_0 = arith.constant 0 : i32
    return %c0_i32, %arg0 : i32, i32
  }
}

module attributes {stable_mosaic.version = 11 : i64} {
  func.func @dqn_mlp_kernel(%arg0: i32, %arg1: memref<8x64xf32, #tpu.memory_space<vmem>>, %arg2: memref<64x256xf32, #tpu.memory_space<vmem>>, %arg3: memref<1x256xf32, #tpu.memory_space<vmem>>, %arg4: memref<256x256xf32, #tpu.memory_space<vmem>>, %arg5: memref<1x256xf32, #tpu.memory_space<vmem>>, %arg6: memref<1x256x2048xbf16, #tpu.memory_space<vmem>>, %arg7: memref<1x2048xf32, #tpu.memory_space<vmem>>, %arg8: memref<8x2048xf32, #tpu.memory_space<vmem>>) attributes {dimension_semantics = [#tpu.dimension_semantics<parallel>], iteration_bounds = array<i64: 2>, scalar_prefetch = 0 : i64, scratch_operands = 0 : i64, tpu.core_type = #tpu.core_type<tc>, window_params = [{pipeline_mode = #tpu.pipeline_mode<synchronous>, transform_indices = @transform_0, window_bounds = array<i64: 8, 64>}, {pipeline_mode = #tpu.pipeline_mode<synchronous>, transform_indices = @transform_1, window_bounds = array<i64: 64, 256>}, {pipeline_mode = #tpu.pipeline_mode<synchronous>, transform_indices = @transform_2, window_bounds = array<i64: 1, 256>}, {pipeline_mode = #tpu.pipeline_mode<synchronous>, transform_indices = @transform_3, window_bounds = array<i64: 256, 256>}, {pipeline_mode = #tpu.pipeline_mode<synchronous>, transform_indices = @transform_4, window_bounds = array<i64: 1, 256>}, {transform_indices = @transform_5, window_bounds = array<i64: 1, 256, 2048>}, {transform_indices = @transform_6, window_bounds = array<i64: 1, 2048>}, {transform_indices = @transform_7, window_bounds = array<i64: 8, 2048>}]} {
    %c0 = arith.constant 0 : index
    %c0_0 = arith.constant 0 : index
    %0 = vector.load %arg1[%c0, %c0_0] : memref<8x64xf32, #tpu.memory_space<vmem>>, vector<8x64xf32>
    %c0_1 = arith.constant 0 : index
    %c0_2 = arith.constant 0 : index
    %1 = vector.load %arg2[%c0_1, %c0_2] : memref<64x256xf32, #tpu.memory_space<vmem>>, vector<64x256xf32>
    %cst = arith.constant dense<0.000000e+00> : vector<8x256xf32>
    %2 = tpu.matmul %0, %1, %cst {dimension_numbers = #tpu.dot_dimension_numbers<[1], [0], [0], [1], [0, 0, 1, 1], [], []>} : vector<8x64xf32>, vector<64x256xf32>, vector<8x256xf32> -> vector<8x256xf32>
    %c0_3 = arith.constant 0 : index
    %c0_4 = arith.constant 0 : index
    %3 = vector.load %arg3[%c0_3, %c0_4] : memref<1x256xf32, #tpu.memory_space<vmem>>, vector<1x256xf32>
    %4 = vector.broadcast %3 : vector<1x256xf32> to vector<8x256xf32>
    %5 = arith.addf %2, %4 : vector<8x256xf32>
    %cst_5 = arith.constant 0.000000e+00 : f32
    %6 = vector.broadcast %cst_5 : f32 to vector<8x256xf32>
    %7 = arith.maximumf %5, %6 : vector<8x256xf32>
    %c0_6 = arith.constant 0 : index
    %c0_7 = arith.constant 0 : index
    %8 = vector.load %arg4[%c0_6, %c0_7] : memref<256x256xf32, #tpu.memory_space<vmem>>, vector<256x256xf32>
    %cst_8 = arith.constant dense<0.000000e+00> : vector<8x256xf32>
    %9 = tpu.matmul %7, %8, %cst_8 {dimension_numbers = #tpu.dot_dimension_numbers<[1], [0], [0], [1], [0, 0, 1, 1], [], []>} : vector<8x256xf32>, vector<256x256xf32>, vector<8x256xf32> -> vector<8x256xf32>
    %c0_9 = arith.constant 0 : index
    %c0_10 = arith.constant 0 : index
    %10 = vector.load %arg5[%c0_9, %c0_10] : memref<1x256xf32, #tpu.memory_space<vmem>>, vector<1x256xf32>
    %11 = vector.broadcast %10 : vector<1x256xf32> to vector<8x256xf32>
    %12 = arith.addf %9, %11 : vector<8x256xf32>
    %cst_11 = arith.constant 0.000000e+00 : f32
    %13 = vector.broadcast %cst_11 : f32 to vector<8x256xf32>
    %14 = arith.maximumf %12, %13 : vector<8x256xf32>
    %15 = arith.truncf %14 : vector<8x256xf32> to vector<8x256xbf16>
    %c0_12 = arith.constant 0 : index
    %c0_13 = arith.constant 0 : index
    %c0_14 = arith.constant 0 : index
    %16 = vector.load %arg6[%c0_12, %c0_13, %c0_14] : memref<1x256x2048xbf16, #tpu.memory_space<vmem>>, vector<1x256x2048xbf16>
    %17 = vector.shape_cast %16 : vector<1x256x2048xbf16> to vector<256x2048xbf16>
    %cst_15 = arith.constant dense<0.000000e+00> : vector<8x2048xf32>
    %18 = tpu.matmul %15, %17, %cst_15 {dimension_numbers = #tpu.dot_dimension_numbers<[1], [0], [0], [1], [0, 0, 1, 1], [], []>} : vector<8x256xbf16>, vector<256x2048xbf16>, vector<8x2048xf32> -> vector<8x2048xf32>
    %c0_16 = arith.constant 0 : index
    %c0_17 = arith.constant 0 : index
    %19 = vector.load %arg7[%c0_16, %c0_17] : memref<1x2048xf32, #tpu.memory_space<vmem>>, vector<1x2048xf32>
    %20 = vector.broadcast %19 : vector<1x2048xf32> to vector<8x2048xf32>
    %21 = arith.addf %18, %20 : vector<8x2048xf32>
    %c0_18 = arith.constant 0 : index
    %c0_19 = arith.constant 0 : index
    %22 = vector.load %arg8[%c0_18, %c0_19] : memref<8x2048xf32, #tpu.memory_space<vmem>>, vector<8x2048xf32>
    tpu.vector_store %arg8[%c0_18, %c0_19], %21 {strides = array<i32>} : memref<8x2048xf32, #tpu.memory_space<vmem>>, vector<8x2048xf32>,
    return
  }
  func.func @transform_0(%arg0: i32) -> (i32, i32) {
    %c0_i32 = arith.constant 0 : i32
    %c0_i32_0 = arith.constant 0 : i32
    %c0_i32_1 = arith.constant 0 : i32
    return %c0_i32, %c0_i32_0 : i32, i32
  }
  func.func @transform_1(%arg0: i32) -> (i32, i32) {
    %c0_i32 = arith.constant 0 : i32
    %c0_i32_0 = arith.constant 0 : i32
    %c0_i32_1 = arith.constant 0 : i32
    return %c0_i32, %c0_i32_0 : i32, i32
  }
  func.func @transform_2(%arg0: i32) -> (i32, i32) {
    %c0_i32 = arith.constant 0 : i32
    %c0_i32_0 = arith.constant 0 : i32
    %c0_i32_1 = arith.constant 0 : i32
    return %c0_i32, %c0_i32_0 : i32, i32
  }
  func.func @transform_3(%arg0: i32) -> (i32, i32) {
    %c0_i32 = arith.constant 0 : i32
    %c0_i32_0 = arith.constant 0 : i32
    %c0_i32_1 = arith.constant 0 : i32
    return %c0_i32, %c0_i32_0 : i32, i32
  }
  func.func @transform_4(%arg0: i32) -> (i32, i32) {
    %c0_i32 = arith.constant 0 : i32
    %c0_i32_0 = arith.constant 0 : i32
    %c0_i32_1 = arith.constant 0 : i32
    return %c0_i32, %c0_i32_0 : i32, i32
  }
  func.func @transform_5(%arg0: i32) -> (i32, i32, i32) {
    %c0_i32 = arith.constant 0 : i32
    %c0_i32_0 = arith.constant 0 : i32
    %c0_i32_1 = arith.constant 0 : i32
    return %arg0, %c0_i32, %c0_i32_0 : i32, i32, i32
  }
  func.func @transform_6(%arg0: i32) -> (i32, i32) {
    %c0_i32 = arith.constant 0 : i32
    %c0_i32_0 = arith.constant 0 : i32
    return %c0_i32, %arg0 : i32, i32
  }
  func.func @transform_7(%arg0: i32) -> (i32, i32) {
    %c0_i32 = arith.constant 0 : i32
    %c0_i32_0 = arith.constant 0 : i32
    return %c0_i32, %arg0 : i32, i32
  }
}

</mosaic_0001>

<bundles_post_ra>
// kernel: tpu_custom_call.1
= control target key start
LH: loop header
LB: loop body
LE: loop exit
PB: predicated region body
PF: predicated region fallthrough
CT: control target
= control target key end

     0   :  { %12 = vsyncpa [#allocation3], 0  ;;  %s5219_s0 = inlined_call_operand.hbm [shape: f32[8,64], index: 0, kind: input, shape index: {}]   ;;  %s5220_s1 = inlined_call_operand.hbm [shape: f32[64,256], index: 1, kind: input, shape index: {}]   ;;  %s5221_s2 = inlined_call_operand.hbm [shape: f32[1,256], index: 2, kind: input, shape index: {}]   ;;  %s5222_s3 = inlined_call_operand.hbm [shape: f32[256,256], index: 3, kind: input, shape index: {}]   ;;  %s5223_s4 = inlined_call_operand.hbm [shape: f32[1,256], index: 4, kind: input, shape index: {}]   ;;  %s5224_s5 = inlined_call_operand.hbm [shape: bf16[1,256,4096], index: 5, kind: input, shape index: {}]   ;;  %s5225_s6 = inlined_call_operand.hbm [shape: f32[1,4096], index: 6, kind: input, shape index: {}]   ;;  %s5226_s7 = inlined_call_operand.hbm [shape: f32[8,4096], index: 7, kind: output, shape index: {}]  }
   0x1   :  { %13 = vsyncpa [#allocation6], 0 }
   0x2   :  { %14 = vsyncpa [#allocation9], 0 }
   0x3   :  { %15 = vsyncpa [#allocation12], 0 }
   0x4   :  { %16 = vsyncpa [#allocation4], 0  ;;  %s5013_s24 = smov [#allocation5]  }
   0x5   :  { %s32_s25 = sshll.u32 %s5013_s24, 4  ;;  %s33_s25 = int_to_ptr.vmem [resolvable:$true] %s32_s25 }
   0x6   :  { %s4851_s26 = scalar_lea.vmem %s33_s25, 2048  ;;  %p4856_p1 = scmp.lt.s32.totalorder %s33_s25, %s33_s25 }
   0x7   :  { %p4852_p0 = scmp.ne.s32.totalorder %s33_s25, %s4851_s26  ;;  %p4857_p2 = scmp.lt.s32.totalorder %s4851_s26, %s4851_s26 }
   0x9   :  { %p4858_p3 = por %p4857_p2, %p4856_p1 }
   0xb   :  { %p4859_p4 = pnand %p4858_p3, %p4852_p0 }
   0xd   :  { %4862 = shalt.err (!%p4859_p4)
}
   0xe   :  { %s5014_s27 = smov 256   ;;  %s5015_s28 = smov 16  }
   0xf   :  { %38 = dma.hbm_to_vmem [thread:$0]  %s5220_s1, 2048, %s33_s25, [#allocation6], %s5014_s27, %s5014_s27, %s5015_s28  }
  0x10   :  { %s5016_s8 = smov [#allocation8]   ;;  %s5017_s10 = smov [#allocation11]  }
  0x11   :  { %s54_s9 = sshll.u32 %s5016_s8, 4  ;;  %s76_s11 = sshll.u32 %s5017_s10, 4  ;;  %s55_s9 = int_to_ptr.vmem [resolvable:$true] %s54_s9  ;;  %s77_s11 = int_to_ptr.vmem [resolvable:$true] %s76_s11 }
  0x12   :  { %s4871_s12 = scalar_lea.vmem %s55_s9, 8192  ;;  %p4876_p6 = scmp.lt.s32.totalorder %s55_s9, %s55_s9 }
  0x13   :  { %p4872_p5 = scmp.ne.s32.totalorder %s55_s9, %s4871_s12  ;;  %p4877_p7 = scmp.lt.s32.totalorder %s4871_s12, %s4871_s12 }
  0x15   :  { %p4878_p8 = por %p4877_p7, %p4876_p6 }
  0x17   :  { %p4879_p9 = pnand %p4878_p8, %p4872_p5 }
  0x19   :  { %4882 = shalt.err (!%p4879_p9)
}
  0x1a   :  { %60 = dma.hbm_to_vmem [thread:$0]  %s5222_s3, 8192, %s55_s9, [#allocation9], %s5014_s27, %s5014_s27, %s5015_s28  }
  0x1b   :  { %s4891_s15 = scalar_lea.vmem %s77_s11, 65536  ;;  %p4896_p11 = scmp.lt.s32.totalorder %s77_s11, %s77_s11 }
  0x1c   :  { %p4892_p10 = scmp.ne.s32.totalorder %s77_s11, %s4891_s15  ;;  %p4897_p12 = scmp.lt.s32.totalorder %s4891_s15, %s4891_s15 }
  0x1e   :  { %p4898_p13 = por %p4897_p12, %p4896_p11 }
  0x20   :  { %p4899_p0 = pnand %p4898_p13, %p4892_p10 }
  0x22   :  { %4902 = shalt.err (!%p4899_p0)
}
  0x23   :  { %s5018_s1 = smov 2048   ;;  %s5019_s16 = smov 128  }
  0x24   :  { %82 = dma.hbm_to_vmem [thread:$0]  %s5224_s5, 65536, %s77_s11, [#allocation12], %s5018_s1, %s5018_s1, %s5019_s16  }
  0x25   :  { %s5020_s19 = smov [#allocation2]   ;;  %s5021_s21 = smov [#allocation7]  }
  0x26   :  { %s23_s20 = sshll.u32 %s5020_s19, 4  ;;  %s45_s22 = sshll.u32 %s5021_s21, 4  ;;  %s24_s20 = int_to_ptr.vmem [resolvable:$true] %s23_s20  ;;  %s46_s22 = int_to_ptr.vmem [resolvable:$true] %s45_s22 }
  0x27   :  { %s4911_s3 = scalar_lea.vmem %s24_s20, 128  ;;  %p4916_p2 = scmp.lt.s32.totalorder %s24_s20, %s24_s20 }
  0x28   :  { %p4912_p1 = scmp.ne.s32.totalorder %s24_s20, %s4911_s3  ;;  %p4917_p3 = scmp.lt.s32.totalorder %s4911_s3, %s4911_s3 }
  0x2a   :  { %p4918_p4 = por %p4917_p3, %p4916_p2 }
  0x2c   :  { %p4919_p5 = pnand %p4918_p4, %p4912_p1 }
  0x2e   :  { %4922 = shalt.err (!%p4919_p5)
}
  0x2f   :  { %26 = dma.hbm_to_vmem [thread:$0]  %s5219_s0, 128, %s24_s20, [#allocation3]  }
  0x30   :  { %s4931_s25 = scalar_lea.vmem %s46_s22, 32  ;;  %p4936_p7 = scmp.lt.s32.totalorder %s46_s22, %s46_s22 }
  0x31   :  { %p4932_p6 = scmp.ne.s32.totalorder %s46_s22, %s4931_s25  ;;  %p4937_p8 = scmp.lt.s32.totalorder %s4931_s25, %s4931_s25 }
  0x33   :  { %p4938_p9 = por %p4937_p8, %p4936_p7 }
  0x35   :  { %p4939_p10 = pnand %p4938_p9, %p4932_p6 }
  0x37   :  { %4942 = shalt.err (!%p4939_p10)
}
  0x38   :  { %48 = dma.hbm_to_vmem [thread:$0]  %s5221_s2, 32, %s46_s22, [#allocation6]  }
  0x39   :  { %s5022_s27 = smov [#allocation10]   ;;  %s5023_s29 = smov [#allocation13]  }
  0x3a   :  { %s67_s28 = sshll.u32 %s5022_s27, 4  ;;  %s89_s30 = sshll.u32 %s5023_s29, 4  ;;  %s68_s28 = int_to_ptr.vmem [resolvable:$true] %s67_s28  ;;  %s90_s30 = int_to_ptr.vmem [resolvable:$true] %s89_s30 }
  0x3b   :  { %s4951_s8 = scalar_lea.vmem %s68_s28, 32  ;;  %p4956_p12 = scmp.lt.s32.totalorder %s68_s28, %s68_s28 }
  0x3c   :  { %p4952_p11 = scmp.ne.s32.totalorder %s68_s28, %s4951_s8  ;;  %p4957_p13 = scmp.lt.s32.totalorder %s4951_s8, %s4951_s8 }
  0x3e   :  { %p4958_p0 = por %p4957_p13, %p4956_p12 }
  0x40   :  { %p4959_p1 = pnand %p4958_p0, %p4952_p11 }
  0x42   :  { %4962 = shalt.err (!%p4959_p1)
}
  0x43   :  { %70 = dma.hbm_to_vmem [thread:$0]  %s5223_s4, 32, %s68_s28, [#allocation9]  }
  0x44   :  { %s4971_s10 = scalar_lea.vmem %s90_s30, 512  ;;  %p4976_p3 = scmp.lt.s32.totalorder %s90_s30, %s90_s30 }
  0x45   :  { %p4972_p2 = scmp.ne.s32.totalorder %s90_s30, %s4971_s10  ;;  %p4977_p4 = scmp.lt.s32.totalorder %s4971_s10, %s4971_s10 }
  0x47   :  { %p4978_p5 = por %p4977_p4, %p4976_p3 }
  0x49   :  { %p4979_p6 = pnand %p4978_p5, %p4972_p2 }
  0x4b   :  { %4982 = shalt.err (!%p4979_p6)
}
  0x4c   :  { %92 = dma.hbm_to_vmem [thread:$0]  %s5225_s6, 512, %s90_s30, [#allocation12]  }
  0x4d   :  { %5003 = dma.done.wait [#allocation3], 128  }
  0x4e   :  { %5004 = vsyncadd [#allocation3], 4294967168 }
  0x4f   :  { %5005 = dma.done.wait [#allocation6], 2080  }
  0x50   :  { %5006 = vsyncadd [#allocation6], 4294965216 }
  0x51   :  { %5007 = dma.done.wait [#allocation9], 8224  }
  0x52   :  { %5008 = vsyncadd [#allocation9], 4294959072 }
  0x53   :  { %5009 = dma.done.wait [#allocation12], 66048  }
  0x54   :  { %5010 = vsyncadd [#allocation12], 4294901248  ;;  %v5024_v0 = vmov 0.0   ;;  %v130_v1 = vld [vmem:[#allocation5 + $0x78] sm:$0xff]  ;;  %v129_v2 = vld [vmem:[#allocation5 + $0x70] sm:$0xff]  ;;  %vm143_vm0 = vcmask 523264  }
  0x55   :  { %211 = vmatprep.mubr.f32.mxu0 %v5024_v0  ;;  %v128_v3 = vld [vmem:[#allocation5 + $0x68] sm:$0xff]  ;;  %163 = vmatprep.subr.mxu0 %v130_v1  ;;  %v127_v4 = vld [vmem:[#allocation5 + $0x60] sm:$0xff]  ;;  %v126_v5 = vld [vmem:[#allocation5 + $0x58] sm:$0xff]  ;;  %s5025_s4 = smov [#allocation14]  }
  0x56   :  { %164 = vmatpush1.msra.mxu0 %v129_v2  ;;  %v125_v6 = vld [vmem:[#allocation5 + $0x50] sm:$0xff]  ;;  %v124_v7 = vld [vmem:[#allocation5 + $0x48] sm:$0xff]  ;;  %v123_v8 = vld [vmem:[#allocation5 + $0x40] sm:$0xff]  ;;  %s4305_s6 = sshll.u32 %s5025_s4, 4  ;;  %s4306_s6 = int_to_ptr.vmem [resolvable:$true] %s4305_s6 }
  0x57   :  { %165 = vmatprep.subr.mxu0 %v128_v3  ;;  %v122_v9 = vld [vmem:[#allocation5 + $0x38] sm:$0xff]  ;;  %v249_v12 = vld [vmem:[#allocation8 + $0xe8] sm:$0xff]  ;;  %v248_v13 = vld [vmem:[#allocation8 + $0xe0] sm:$0xff]  ;;  %s4983_s12 = scalar_lea.vmem %s4306_s6, 4096  ;;  %p4988_p8 = scmp.lt.s32.totalorder %s4306_s6, %s4306_s6 }
  0x58   :  { %166 = vmatpush1.msra.mxu0 %v127_v4  ;;  %v251_v10 = vld [vmem:[#allocation8 + $0xf8] sm:$0xff]  ;;  %v250_v11 = vld [vmem:[#allocation8 + $0xf0] sm:$0xff]  ;;  %v120_v16 = vld [vmem:[#allocation5 + $0x28] sm:$0xff]  ;;  %p4984_p7 = scmp.ne.s32.totalorder %s4306_s6, %s4983_s12  ;;  %p4989_p9 = scmp.lt.s32.totalorder %s4983_s12, %s4983_s12 }
  0x59   :  { %167 = vmatprep.subr.mxu0 %v126_v5  ;;  %296 = vmatprep.subr.mxu1 %v251_v10  ;;  %v121_v14 = vld [vmem:[#allocation5 + $0x30] sm:$0xff]  ;;  %v247_v15 = vld [vmem:[#allocation8 + $0xd8] sm:$0xff]  ;;  %v244_v21 = vld [vmem:[#allocation8 + $0xc0] sm:$0xff] }
  0x5a   :  { %168 = vmatpush1.msra.mxu0 %v125_v6  ;;  %297 = vmatpush1.msra.mxu1 %v250_v11  ;;  %v246_v17 = vld [vmem:[#allocation8 + $0xd0] sm:$0xff]  ;;  %v119_v18 = vld [vmem:[#allocation5 + $0x20] sm:$0xff]  ;;  %v245_v19 = vld [vmem:[#allocation8 + $0xc8] sm:$0xff]  ;;  %p4990_p10 = por %p4989_p9, %p4988_p8 }
  0x5b   :  { %169 = vmatprep.subr.mxu0 %v124_v7  ;;  %298 = vmatprep.subr.mxu1 %v249_v12  ;;  %v118_v20 = vld [vmem:[#allocation5 + $0x18] sm:$0xff]  ;;  %v117_v22 = vld [vmem:[#allocation5 + $0x10] sm:$0xff]  ;;  %v116_v24 = vld [vmem:[#allocation5 + $0x8] sm:$0xff] }
  0x5c   :  { %170 = vmatpush1.msra.mxu0 %v123_v8  ;;  %299 = vmatpush1.msra.mxu1 %v248_v13  ;;  %v243_v23 = vld [vmem:[#allocation8 + $0xb8] sm:$0xff]  ;;  %v242_v25 = vld [vmem:[#allocation8 + $0xb0] sm:$0xff]  ;;  %v241_v27 = vld [vmem:[#allocation8 + $0xa8] sm:$0xff]  ;;  %p4991_p11 = pnand %p4990_p10, %p4984_p7 }
  0x5d   :  { %171 = vmatprep.subr.mxu0 %v122_v9  ;;  %300 = vmatprep.subr.mxu1 %v247_v15  ;;  %v115_v26 = vld [vmem:[#allocation5] sm:$0xff]  ;;  %v114_v28 = vld [vmem:[#allocation2] sm:$0xff]  ;;  %v237_v32 = vld [vmem:[#allocation8 + $0x88] sm:$0xff] }
  0x5e   :  { %172 = vmatpush1.msra.mxu0 %v121_v14  ;;  %301 = vmatpush1.msra.mxu1 %v246_v17  ;;  %v240_v29 = vld [vmem:[#allocation8 + $0xa0] sm:$0xff]  ;;  %v239_v30 = vld [vmem:[#allocation8 + $0x98] sm:$0xff]  ;;  %v238_v31 = vld [vmem:[#allocation8 + $0x90] sm:$0xff] }
  0x5f   :  { %173 = vmatprep.subr.mxu0 %v120_v16  ;;  %302 = vmatprep.subr.mxu1 %v245_v19  ;;  %v236_v33 = vld [vmem:[#allocation8 + $0x80] sm:$0xff]  ;;  %v235_v34 = vld [vmem:[#allocation8 + $0x78] sm:$0xff]  ;;  %v234_v35 = vld [vmem:[#allocation8 + $0x70] sm:$0xff] }
  0x60   :  { %174 = vmatpush1.msra.mxu0 %v119_v18  ;;  %303 = vmatpush1.msra.mxu1 %v244_v21  ;;  %v233_v36 = vld [vmem:[#allocation8 + $0x68] sm:$0xff]  ;;  %v232_v37 = vld [vmem:[#allocation8 + $0x60] sm:$0xff]  ;;  %v231_v38 = vld [vmem:[#allocation8 + $0x58] sm:$0xff] }
  0x61   :  { %175 = vmatprep.subr.mxu0 %v118_v20  ;;  %304 = vmatprep.subr.mxu1 %v243_v23  ;;  %v230_v39 = vld [vmem:[#allocation8 + $0x50] sm:$0xff]  ;;  %v229_v40 = vld [vmem:[#allocation8 + $0x48] sm:$0xff]  ;;  %v228_v41 = vld [vmem:[#allocation8 + $0x40] sm:$0xff] }
  0x62   :  { %176 = vmatpush1.msra.mxu0 %v117_v22  ;;  %305 = vmatpush1.msra.mxu1 %v242_v25  ;;  %v227_v42 = vld [vmem:[#allocation8 + $0x38] sm:$0xff]  ;;  %v226_v43 = vld [vmem:[#allocation8 + $0x30] sm:$0xff]  ;;  %v225_v44 = vld [vmem:[#allocation8 + $0x28] sm:$0xff] }
  0x63   :  { %177 = vmatprep.subr.mxu0 %v116_v24  ;;  %306 = vmatprep.subr.mxu1 %v241_v27  ;;  %v224_v45 = vld [vmem:[#allocation8 + $0x20] sm:$0xff]  ;;  %v223_v46 = vld [vmem:[#allocation8 + $0x18] sm:$0xff]  ;;  %v222_v47 = vld [vmem:[#allocation8 + $0x10] sm:$0xff] }
  0x64   :  { %178 = vmatpush1.msra.mxu0 %v115_v26  ;;  %307 = vmatpush1.msra.mxu1 %v240_v29  ;;  %v221_v48 = vld [vmem:[#allocation8 + $0x8] sm:$0xff]  ;;  %v220_v49 = vld [vmem:[#allocation8] sm:$0xff]  ;;  %v283_v50 = vld [vmem:[#allocation8 + $0x1f8] sm:$0xff] }
  0x65   :  { %4317 = vmatmul.mubr.msk.f32.vlgmr.msra.gmra.mxu0 %vm143_vm0, %v114_v28  ;;  %308 = vmatprep.subr.mxu1 %v239_v30  ;;  %v282_v51 = vld [vmem:[#allocation8 + $0x1f0] sm:$0xff]  ;;  %v281_v52 = vld [vmem:[#allocation8 + $0x1e8] sm:$0xff]  ;;  %v280_v53 = vld [vmem:[#allocation8 + $0x1e0] sm:$0xff] }
  0x66   :  { %309 = vmatpush1.msra.mxu1 %v238_v31  ;;  %v279_v54 = vld [vmem:[#allocation8 + $0x1d8] sm:$0xff]  ;;  %v278_v55 = vld [vmem:[#allocation8 + $0x1d0] sm:$0xff]  ;;  %v277_v56 = vld [vmem:[#allocation8 + $0x1c8] sm:$0xff] }
  0x67   :  { %310 = vmatprep.subr.mxu1 %v237_v32  ;;  %v276_v57 = vld [vmem:[#allocation8 + $0x1c0] sm:$0xff]  ;;  %v275_v58 = vld [vmem:[#allocation8 + $0x1b8] sm:$0xff]  ;;  %v274_v59 = vld [vmem:[#allocation8 + $0x1b0] sm:$0xff] }
  0x68   :  { %311 = vmatpush1.msra.mxu1 %v236_v33  ;;  %v273_v60 = vld [vmem:[#allocation8 + $0x1a8] sm:$0xff]  ;;  %v272_v61 = vld [vmem:[#allocation8 + $0x1a0] sm:$0xff]  ;;  %v271_v62 = vld [vmem:[#allocation8 + $0x198] sm:$0xff] }
  0x69   :  { %312 = vmatprep.subr.mxu1 %v235_v34  ;;  %v270_v63 = vld [vmem:[#allocation8 + $0x190] sm:$0xff]  ;;  %v269_v0 = vld [vmem:[#allocation8 + $0x188] sm:$0xff]  ;;  %v268_v1 = vld [vmem:[#allocation8 + $0x180] sm:$0xff] }
  0x6a   :  { %313 = vmatpush1.msra.mxu1 %v234_v35  ;;  %v267_v2 = vld [vmem:[#allocation8 + $0x178] sm:$0xff]  ;;  %v266_v3 = vld [vmem:[#allocation8 + $0x170] sm:$0xff]  ;;  %v265_v4 = vld [vmem:[#allocation8 + $0x168] sm:$0xff] }
  0x6b   :  { %314 = vmatprep.subr.mxu1 %v233_v36  ;;  %v264_v5 = vld [vmem:[#allocation8 + $0x160] sm:$0xff]  ;;  %v263_v6 = vld [vmem:[#allocation8 + $0x158] sm:$0xff]  ;;  %v262_v7 = vld [vmem:[#allocation8 + $0x150] sm:$0xff] }
  0x6c   :  { %315 = vmatpush1.msra.mxu1 %v232_v37  ;;  %v261_v8 = vld [vmem:[#allocation8 + $0x148] sm:$0xff]  ;;  %v260_v9 = vld [vmem:[#allocation8 + $0x140] sm:$0xff]  ;;  %v259_v10 = vld [vmem:[#allocation8 + $0x138] sm:$0xff] }
  0x6d   :  { %316 = vmatprep.subr.mxu1 %v231_v38  ;;  %v258_v11 = vld [vmem:[#allocation8 + $0x130] sm:$0xff]  ;;  %v257_v12 = vld [vmem:[#allocation8 + $0x128] sm:$0xff]  ;;  %v256_v13 = vld [vmem:[#allocation8 + $0x120] sm:$0xff] }
  0x6e   :  { %317 = vmatpush1.msra.mxu1 %v230_v39  ;;  %v255_v14 = vld [vmem:[#allocation8 + $0x118] sm:$0xff]  ;;  %v254_v15 = vld [vmem:[#allocation8 + $0x110] sm:$0xff]  ;;  %v253_v16 = vld [vmem:[#allocation8 + $0x108] sm:$0xff] }
  0x6f   :  { %318 = vmatprep.subr.mxu1 %v229_v40  ;;  %v252_v17 = vld [vmem:[#allocation8 + $0x100] sm:$0xff]  ;;  %v5087_v20 = vld [vmem:[#allocation11 + $0x708] sm:$0xff] }
  0x70   :  { %319 = vmatpush1.msra.mxu1 %v228_v41  ;;  %v595_v18 = vld [vmem:[#allocation11 + $0x700] sm:$0xff]  ;;  %v5089_v23 = vld [vmem:[#allocation11 + $0x788] sm:$0xff] }
  0x71   :  { %320 = vmatprep.subr.mxu1 %v227_v42  ;;  %v611_v19 = vld [vmem:[#allocation11 + $0x780] sm:$0xff]  ;;  %v4544_v26 = vcombine.low %v5087_v20, %v5089_v23  ;;  %v4545_v27 = vcombine.high %v5087_v20, %v5089_v23 }
  0x72   :  { %321 = vmatpush1.msra.mxu1 %v226_v43  ;;  %v4542_v21 = vcombine.low %v595_v18, %v611_v19  ;;  %v4543_v22 = vcombine.high %v595_v18, %v611_v19  ;;  %v563_v24 = vld [vmem:[#allocation11 + $0x600] sm:$0xff] }
  0x73   :  { %322 = vmatprep.subr.mxu1 %v225_v44  ;;  %v579_v25 = vld [vmem:[#allocation11 + $0x680] sm:$0xff] }
  0x74   :  { %323 = vmatpush1.msra.mxu1 %v224_v45  ;;  %v4511_v28 = vcombine.high %v563_v24, %v579_v25  ;;  %3611 = vmatprep.subr.bf16.mxu0 %v4543_v22  ;;  %v4510_v29 = vcombine.low %v563_v24, %v579_v25  ;;  %v531_v30 = vld [vmem:[#allocation11 + $0x500] sm:$0xff] }
  0x75   :  { %324 = vmatprep.subr.mxu1 %v223_v46  ;;  %3612 = vmatpush1.bf16.msra.mxu0 %v4542_v21  ;;  %v547_v31 = vld [vmem:[#allocation11 + $0x580] sm:$0xff] }
  0x76   :  { %325 = vmatpush1.msra.mxu1 %v222_v47  ;;  %3613 = vmatprep.subr.bf16.mxu0 %v4511_v28  ;;  %v4479_v32 = vcombine.high %v531_v30, %v547_v31  ;;  %v4478_v33 = vcombine.low %v531_v30, %v547_v31  ;;  %v499_v34 = vld [vmem:[#allocation11 + $0x400] sm:$0xff]  ;;  %v564_v28 = vld [vmem:[#allocation11 + $0x608] sm:$0xff] }
  0x77   :  { %326 = vmatprep.subr.mxu1 %v221_v48  ;;  %v515_v35 = vld [vmem:[#allocation11 + $0x480] sm:$0xff] }
  0x78   :  { %327 = vmatpush1.msra.mxu1 %v220_v49  ;;  %v4447_v36 = vcombine.high %v499_v34, %v515_v35  ;;  %v4446_v37 = vcombine.low %v499_v34, %v515_v35  ;;  %v467_v38 = vld [vmem:[#allocation11 + $0x300] sm:$0xff]  ;;  %v548_v34 = vld [vmem:[#allocation11 + $0x588] sm:$0xff] }
  0x79   :  { %328 = vmatprep.subr.mxu1 %v283_v50  ;;  %3614 = vmatpush1.bf16.msra.mxu0 %v4510_v29  ;;  %v483_v39 = vld [vmem:[#allocation11 + $0x380] sm:$0xff]  ;;  %v580_v29 = vld [vmem:[#allocation11 + $0x688] sm:$0xff] }
  0x7a   :  { %329 = vmatpush2.msra.mxu1 %v282_v51  ;;  %3615 = vmatprep.subr.bf16.mxu0 %v4479_v32  ;;  %v4415_v40 = vcombine.high %v467_v38, %v483_v39  ;;  %v4414_v41 = vcombine.low %v467_v38, %v483_v39  ;;  %v435_v42 = vld [vmem:[#allocation11 + $0x200] sm:$0xff]  ;;  %v4513_v32 = vcombine.high %v564_v28, %v580_v29  ;;  %v516_v38 = vld [vmem:[#allocation11 + $0x488] sm:$0xff] }
  0x7b   :  { %330 = vmatprep.subr.mxu1 %v281_v52  ;;  %v451_v43 = vld [vmem:[#allocation11 + $0x280] sm:$0xff]  ;;  %v4512_v35 = vcombine.low %v564_v28, %v580_v29 }
  0x7c   :  { %331 = vmatpush2.msra.mxu1 %v280_v53  ;;  %v4383_v44 = vcombine.high %v435_v42, %v451_v43  ;;  %v4382_v45 = vcombine.low %v435_v42, %v451_v43  ;;  %v403_v46 = vld [vmem:[#allocation11 + $0x100] sm:$0xff]  ;;  %v484_v42 = vld [vmem:[#allocation11 + $0x388] sm:$0xff] }
  0x7d   :  { %332 = vmatprep.subr.mxu1 %v279_v54  ;;  %3616 = vmatpush1.bf16.msra.mxu0 %v4478_v33  ;;  %v419_v47 = vld [vmem:[#allocation11 + $0x180] sm:$0xff]  ;;  %v532_v33 = vld [vmem:[#allocation11 + $0x508] sm:$0xff] }
  0x7e   :  { %333 = vmatpush2.msra.mxu1 %v278_v55  ;;  %3617 = vmatprep.subr.bf16.mxu0 %v4447_v36  ;;  %v4351_v48 = vcombine.high %v403_v46, %v419_v47  ;;  %v4350_v49 = vcombine.low %v403_v46, %v419_v47  ;;  %v371_v50 = vld [vmem:[#allocation11] sm:$0xff]  ;;  %v4481_v36 = vcombine.high %v532_v33, %v548_v34  ;;  %v452_v46 = vld [vmem:[#allocation11 + $0x288] sm:$0xff] }
  0x7f   :  { %334 = vmatprep.subr.mxu1 %v277_v56  ;;  %v387_v51 = vld [vmem:[#allocation11 + $0x80] sm:$0xff]  ;;  %v4480_v39 = vcombine.low %v532_v33, %v548_v34  ;;  %v420_v47 = vld [vmem:[#allocation11 + $0x188] sm:$0xff] }
  0x80   :  { %335 = vmatpush2.msra.mxu1 %v276_v57  ;;  %v4319_v52 = vcombine.high %v371_v50, %v387_v51  ;;  %v4318_v53 = vcombine.low %v371_v50, %v387_v51  ;;  %v851_v54 = vld [vmem:[#allocation11 + $0xf00] sm:$0xff]  ;;  %v372_v50 = vld [vmem:[#allocation11 + $0x8] sm:$0xff] }
  0x81   :  { %336 = vmatprep.subr.mxu1 %v275_v58  ;;  %3618 = vmatpush1.bf16.msra.mxu0 %v4446_v37  ;;  %v867_v55 = vld [vmem:[#allocation11 + $0xf80] sm:$0xff]  ;;  %v500_v37 = vld [vmem:[#allocation11 + $0x408] sm:$0xff] }
  0x82   :  { %337 = vmatpush2.msra.mxu1 %v274_v59  ;;  %3619 = vmatprep.subr.bf16.mxu0 %v4415_v40  ;;  %v4799_v56 = vcombine.high %v851_v54, %v867_v55  ;;  %v4798_v57 = vcombine.low %v851_v54, %v867_v55  ;;  %v819_v58 = vld [vmem:[#allocation11 + $0xe00] sm:$0xff]  ;;  %v4449_v40 = vcombine.high %v500_v37, %v516_v38  ;;  %v388_v51 = vld [vmem:[#allocation11 + $0x88] sm:$0xff] }
  0x83   :  { %338 = vmatprep.subr.mxu1 %v273_v60  ;;  %v835_v59 = vld [vmem:[#allocation11 + $0xe80] sm:$0xff]  ;;  %v4448_v43 = vcombine.low %v500_v37, %v516_v38  ;;  %v852_v54 = vld [vmem:[#allocation11 + $0xf08] sm:$0xff]  ;;  %v597_v37 = vld [vmem:[#allocation11 + $0x710] sm:$0xff] }
  0x84   :  { %339 = vmatpush2.msra.mxu1 %v272_v61  ;;  %v4767_v60 = vcombine.high %v819_v58, %v835_v59  ;;  %v4766_v61 = vcombine.low %v819_v58, %v835_v59  ;;  %v868_v55 = vld [vmem:[#allocation11 + $0xf88] sm:$0xff]  ;;  %v627_v29 = vld [vmem:[#allocation11 + $0x800] sm:$0xff]  ;;  %v613_v38 = vld [vmem:[#allocation11 + $0x790] sm:$0xff] }
  0x85   :  { %340 = vmatprep.subr.mxu1 %v271_v62  ;;  %3620 = vmatpush1.bf16.msra.mxu0 %v4414_v41  ;;  %v787_v62 = vld [vmem:[#allocation11 + $0xd00] sm:$0xff]  ;;  %v468_v41 = vld [vmem:[#allocation11 + $0x308] sm:$0xff] }
  0x86   :  { %341 = vmatpush2.msra.mxu1 %v270_v63  ;;  %3621 = vmatprep.subr.bf16.mxu0 %v4383_v44  ;;  %v803_v63 = vld [vmem:[#allocation11 + $0xd80] sm:$0xff]  ;;  %v4417_v44 = vcombine.high %v468_v41, %v484_v42  ;;  %v4416_v20 = vcombine.low %v468_v41, %v484_v42  ;;  %v820_v58 = vld [vmem:[#allocation11 + $0xe08] sm:$0xff]  ;;  %v614_v41 = vld [vmem:[#allocation11 + $0x798] sm:$0xff]  ;;  %v4546_v42 = vcombine.low %v597_v37, %v613_v38 }
  0x87   :  { %342 = vmatprep.subr.mxu1 %v269_v0  ;;  %v4735_v0 = vcombine.high %v787_v62, %v803_v63  ;;  %v836_v59 = vld [vmem:[#allocation11 + $0xe88] sm:$0xff] }
  0x88   :  { %343 = vmatpush2.msra.mxu1 %v268_v1  ;;  %v4734_v1 = vcombine.low %v787_v62, %v803_v63  ;;  %v788_v62 = vld [vmem:[#allocation11 + $0xd08] sm:$0xff] }
  0x89   :  { %344 = vmatprep.subr.mxu1 %v267_v2  ;;  %3622 = vmatpush1.bf16.msra.mxu0 %v4382_v45  ;;  %v755_v2 = vld [vmem:[#allocation11 + $0xc00] sm:$0xff]  ;;  %v436_v45 = vld [vmem:[#allocation11 + $0x208] sm:$0xff] }
  0x8a   :  { %345 = vmatpush2.msra.mxu1 %v266_v3  ;;  %3623 = vmatprep.subr.bf16.mxu0 %v4351_v48  ;;  %v771_v3 = vld [vmem:[#allocation11 + $0xc80] sm:$0xff]  ;;  %v4385_v23 = vcombine.high %v436_v45, %v452_v46  ;;  %v4384_v48 = vcombine.low %v436_v45, %v452_v46  ;;  %v804_v63 = vld [vmem:[#allocation11 + $0xd88] sm:$0xff]  ;;  %v284_v45 = vld [vmem:[#allocation10] sm:$0x3] }
  0x8b   :  { %346 = vmatprep.subr.mxu1 %v265_v4  ;;  %v4703_v4 = vcombine.high %v755_v2, %v771_v3  ;;  %v644_v33 = vld [vmem:[#allocation11 + $0x888] sm:$0xff] }
  0x8c   :  { %347 = vmatpush2.msra.mxu1 %v264_v5  ;;  %v4702_v5 = vcombine.low %v755_v2, %v771_v3  ;;  %v756_v2 = vld [vmem:[#allocation11 + $0xc08] sm:$0xff] }
  0x8d   :  { %348 = vmatprep.subr.mxu1 %v263_v6  ;;  %3624 = vmatpush1.bf16.msra.mxu0 %v4350_v49  ;;  %v723_v6 = vld [vmem:[#allocation11 + $0xb00] sm:$0xff]  ;;  %v772_v3 = vld [vmem:[#allocation11 + $0xc88] sm:$0xff] }
  0x8e   :  { %349 = vmatpush2.msra.mxu1 %v262_v7  ;;  %3625 = vmatprep.subr.bf16.mxu0 %v4319_v52  ;;  %v739_v7 = vld [vmem:[#allocation11 + $0xb80] sm:$0xff] }
  0x8f   :  { %350 = vmatprep.subr.mxu1 %v261_v8  ;;  %v4671_v8 = vcombine.high %v723_v6, %v739_v7 }
  0x90   :  { %351 = vmatpush2.msra.mxu1 %v260_v9  ;;  %v4670_v9 = vcombine.low %v723_v6, %v739_v7  ;;  %v724_v6 = vld [vmem:[#allocation11 + $0xb08] sm:$0xff] }
  0x91   :  { %352 = vmatprep.subr.mxu1 %v259_v10  ;;  %3626 = vmatpush1.bf16.msra.mxu0 %v4318_v53  ;;  %v691_v10 = vld [vmem:[#allocation11 + $0xa00] sm:$0xff]  ;;  %v4321_v53 = vcombine.high %v372_v50, %v388_v51  ;;  %v740_v7 = vld [vmem:[#allocation11 + $0xb88] sm:$0xff] }
  0x92   :  { %353 = vmatpush2.msra.mxu1 %v258_v11  ;;  %3627 = vmatprep.subr.bf16.mxu0 %v4799_v56  ;;  %v707_v11 = vld [vmem:[#allocation11 + $0xa80] sm:$0xff]  ;;  %v4320_v56 = vcombine.low %v372_v50, %v388_v51  ;;  %v565_v51 = vld [vmem:[#allocation11 + $0x610] sm:$0xff] }
  0x93   :  { %354 = vmatprep.subr.mxu1 %v257_v12  ;;  %v4639_v12 = vcombine.high %v691_v10, %v707_v11 }
  0x94   :  { %355 = vmatpush2.msra.mxu1 %v256_v13  ;;  %v4638_v13 = vcombine.low %v691_v10, %v707_v11  ;;  %v692_v10 = vld [vmem:[#allocation11 + $0xa08] sm:$0xff] }
  0x95   :  { %356 = vmatprep.subr.mxu1 %v255_v14  ;;  %3628 = vmatpush2.bf16.msra.mxu0 %v4798_v57  ;;  %v133_v14 = vlaneseq  ;;  %v4801_v57 = vcombine.high %v852_v54, %v868_v55  ;;  %v708_v11 = vld [vmem:[#allocation11 + $0xa88] sm:$0xff] }
  0x96   :  { %357 = vmatpush2.msra.mxu1 %v254_v15  ;;  %3629 = vmatprep.subr.bf16.mxu0 %v4767_v60  ;;  %v4800_v60 = vcombine.low %v852_v54, %v868_v55  ;;  %v582_v54 = vld [vmem:[#allocation11 + $0x698] sm:$0xff] }
  0x97   :  { %358 = vmatprep.subr.mxu1 %v253_v16  ;;  %v5095_v15 = vshrl.u32 %v133_v14, 7  ;;  %v4640_v14 = vcombine.low %v692_v10, %v708_v11 }
  0x98   :  { %359 = vmatpush2.msra.mxu1 %v252_v17  ;;  %v131_v17 = vld [vmem:[#allocation7] sm:$0x3] }
  0x99   :  { %3652 = vmatprep.subr.bf16.mxu1 %v4545_v27  ;;  %3630 = vmatpush2.bf16.msra.mxu0 %v4766_v61  ;;  %v5098_v16 = vsub.s32 0, %v5095_v15  ;;  %v5101_v18 = vsub.s32 1, %v5095_v15  ;;  %v4769_v61 = vcombine.high %v820_v58, %v836_v59 }
  0x9a   :  { %3631 = vmatprep.subr.bf16.mxu0 %v4735_v0  ;;  %v4768_v0 = vcombine.low %v820_v58, %v836_v59 }
  0x9b   :  { %v136_v19 = vrot.slane %v131_v17, %v5098_v16  ;;  %v140_v21 = vrot.slane %v131_v17, %v5101_v18  ;;  %v659_v17 = vld [vmem:[#allocation11 + $0x900] sm:$0xff]  ;;  %v289_v46 = vrot.slane %v284_v45, %v5098_v16 }
  0x9d   :  { %3632 = vmatpush2.bf16.msra.mxu0 %v4734_v1  ;;  %v4737_v1 = vcombine.high %v788_v62, %v804_v63 }
  0x9e   :  { %3633 = vmatprep.subr.bf16.mxu0 %v4703_v4  ;;  %v4736_v4 = vcombine.low %v788_v62, %v804_v63  ;;  %v550_v62 = vld [vmem:[#allocation11 + $0x598] sm:$0xff] }
  0xa1   :  { %3634 = vmatpush2.bf16.msra.mxu0 %v4702_v5  ;;  %v4705_v5 = vcombine.high %v756_v2, %v772_v3 }
  0xa2   :  { %3635 = vmatprep.subr.bf16.mxu0 %v4671_v8  ;;  %v4704_v8 = vcombine.low %v756_v2, %v772_v3  ;;  %v501_v3 = vld [vmem:[#allocation11 + $0x410] sm:$0xff] }
  0xa5   :  { %3636 = vmatpush2.bf16.msra.mxu0 %v4670_v9  ;;  %v4673_v9 = vcombine.high %v724_v6, %v740_v7 }
  0xa6   :  { %3637 = vmatprep.subr.bf16.mxu0 %v4639_v12  ;;  %v4672_v12 = vcombine.low %v724_v6, %v740_v7  ;;  %v518_v6 = vld [vmem:[#allocation11 + $0x498] sm:$0xff] }
  0xa9   :  { %3638 = vmatpush2.bf16.msra.mxu0 %v4638_v13  ;;  %v4641_v13 = vcombine.high %v692_v10, %v708_v11  ;;  %v469_v11 = vld [vmem:[#allocation11 + $0x310] sm:$0xff] }
 0x125   :  { %v213_v22 = vpop.f32.mrf.mxu0 }
 0x126   :  { %v214_v24 = vadd.f32 %v213_v22, %v136_v19  ;;  %v675_v19 = vld [vmem:[#allocation11 + $0x980] sm:$0xff] }
 0x127   :  { %v215_v25 = vpop.f32.mrf.mxu0  ;;  %v4607_v22 = vcombine.high %v659_v17, %v675_v19 }
 0x128   :  { %v216_v27 = vadd.f32 %v215_v25, %v140_v21  ;;  %v218_v31 = vmax.f32 %v214_v24, 0.0  ;;  %v660_v21 = vld [vmem:[#allocation11 + $0x908] sm:$0xff]  ;;  %v4606_v25 = vcombine.low %v659_v17, %v675_v19 }
 0x129   :  { %v676_v24 = vld [vmem:[#allocation11 + $0x988] sm:$0xff]  ;;  %3639 = vmatprep.subr.bf16.mxu0 %v4607_v22 }
 0x12a   :  { %v219_v30 = vmax.f32 %v216_v27, 0.0  ;;  %v4608_v27 = vcombine.low %v660_v21, %v676_v24  ;;  %v4609_v28 = vcombine.high %v660_v21, %v676_v24  ;;  %3640 = vmatpush2.bf16.msra.mxu0 %v4606_v25  ;;  %v437_v24 = vld [vmem:[#allocation11 + $0x210] sm:$0xff] }
 0x12b   :  { %v453_v25 = vld [vmem:[#allocation11 + $0x290] sm:$0xff] }
 0x12c   :  { %360 = vmatprep.mubr.f32.mxu1 %v219_v30  ;;  %v643_v30 = vld [vmem:[#allocation11 + $0x880] sm:$0xff] }
 0x12d   :  { %361 = vmatmul.mubr.f32.vlgmr.msra.gmra.mxu1 %v218_v31  ;;  %v628_v31 = vld [vmem:[#allocation11 + $0x808] sm:$0xff]  ;;  %v4574_v34 = vcombine.low %v627_v29, %v643_v30 }
 0x12e   :  { %3653 = vmatpush1.bf16.msra.mxu1 %v4544_v26  ;;  %v404_v26 = vld [vmem:[#allocation11 + $0x108] sm:$0xff] }
 0x12f   :  { %3654 = vmatprep.subr.bf16.mxu1 %v4513_v32  ;;  %v4353_v49 = vcombine.high %v404_v26, %v420_v47  ;;  %v4352_v52 = vcombine.low %v404_v26, %v420_v47  ;;  %v4575_v32 = vcombine.high %v627_v29, %v643_v30 }
 0x131   :  { %3641 = vmatprep.subr.bf16.mxu0 %v4575_v32 }
 0x132   :  { %3655 = vmatpush1.bf16.msra.mxu1 %v4512_v35  ;;  %v4576_v35 = vcombine.low %v628_v31, %v644_v33  ;;  %3642 = vmatpush2.bf16.msra.mxu0 %v4574_v34  ;;  %v421_v34 = vld [vmem:[#allocation11 + $0x190] sm:$0xff] }
 0x133   :  { %3656 = vmatprep.subr.bf16.mxu1 %v4481_v36  ;;  %v4577_v36 = vcombine.high %v628_v31, %v644_v33  ;;  %v4387_v31 = vcombine.high %v437_v24, %v453_v25  ;;  %v405_v33 = vld [vmem:[#allocation11 + $0x110] sm:$0xff] }
 0x136   :  { %3657 = vmatpush1.bf16.msra.mxu1 %v4480_v39  ;;  %v598_v39 = vld [vmem:[#allocation11 + $0x718] sm:$0xff] }
 0x137   :  { %3658 = vmatprep.subr.bf16.mxu1 %v4449_v40  ;;  %v4547_v40 = vcombine.high %v597_v37, %v613_v38  ;;  %v4386_v37 = vcombine.low %v437_v24, %v453_v25  ;;  %v742_v24 = vld [vmem:[#allocation11 + $0xb98] sm:$0xff] }
 0x139   :  { %3693 = vmatprep.subr.bf16.mxu0 %v4547_v40 }
 0x13a   :  { %3659 = vmatpush1.bf16.msra.mxu1 %v4448_v43  ;;  %v4548_v43 = vcombine.low %v598_v39, %v614_v41 }
 0x13b   :  { %3660 = vmatprep.subr.bf16.mxu1 %v4417_v44  ;;  %v4549_v44 = vcombine.high %v598_v39, %v614_v41  ;;  %v4355_v39 = vcombine.high %v405_v33, %v421_v34  ;;  %v373_v41 = vld [vmem:[#allocation11 + $0x10] sm:$0xff] }
 0x13e   :  { %3661 = vmatpush1.bf16.msra.mxu1 %v4416_v20  ;;  %v293_v20 = vrot.slane %v284_v45, %v5101_v18  ;;  %v4354_v45 = vcombine.low %v405_v33, %v421_v34  ;;  %v710_v33 = vld [vmem:[#allocation11 + $0xa98] sm:$0xff] }
 0x13f   :  { %3662 = vmatprep.subr.bf16.mxu1 %v4385_v23 }
 0x142   :  { %3663 = vmatpush1.bf16.msra.mxu1 %v4384_v48 }
 0x143   :  { %3664 = vmatprep.subr.bf16.mxu1 %v4353_v49 }
 0x146   :  { %3665 = vmatpush1.bf16.msra.mxu1 %v4352_v52  ;;  %v581_v52 = vld [vmem:[#allocation11 + $0x690] sm:$0xff] }
 0x147   :  { %3666 = vmatprep.subr.bf16.mxu1 %v4321_v53  ;;  %v566_v53 = vld [vmem:[#allocation11 + $0x618] sm:$0xff]  ;;  %v4515_v58 = vcombine.high %v565_v51, %v581_v52  ;;  %v4514_v63 = vcombine.low %v565_v51, %v581_v52 }
 0x148   :  { %v4517_v59 = vcombine.high %v566_v53, %v582_v54 }
 0x14a   :  { %3667 = vmatpush1.bf16.msra.mxu1 %v4320_v56 }
 0x14b   :  { %3668 = vmatprep.subr.bf16.mxu1 %v4801_v57  ;;  %v533_v57 = vld [vmem:[#allocation11 + $0x510] sm:$0xff] }
 0x14e   :  { %3669 = vmatpush2.bf16.msra.mxu1 %v4800_v60  ;;  %v549_v60 = vld [vmem:[#allocation11 + $0x590] sm:$0xff] }
 0x14f   :  { %3670 = vmatprep.subr.bf16.mxu1 %v4769_v61  ;;  %v534_v61 = vld [vmem:[#allocation11 + $0x518] sm:$0xff]  ;;  %v4482_v7 = vcombine.low %v533_v57, %v549_v60 }
 0x150   :  { %v4485_v2 = vcombine.high %v534_v61, %v550_v62 }
 0x152   :  { %3671 = vmatpush2.bf16.msra.mxu1 %v4768_v0  ;;  %v4516_v0 = vcombine.low %v566_v53, %v582_v54  ;;  %v821_v54 = vld [vmem:[#allocation11 + $0xe10] sm:$0xff] }
 0x153   :  { %3672 = vmatprep.subr.bf16.mxu1 %v4737_v1  ;;  %v4483_v1 = vcombine.high %v533_v57, %v549_v60  ;;  %v837_v57 = vld [vmem:[#allocation11 + $0xe90] sm:$0xff] }
 0x156   :  { %3673 = vmatpush2.bf16.msra.mxu1 %v4736_v4  ;;  %v517_v4 = vld [vmem:[#allocation11 + $0x490] sm:$0xff] }
 0x157   :  { %3674 = vmatprep.subr.bf16.mxu1 %v4705_v5  ;;  %v502_v5 = vld [vmem:[#allocation11 + $0x418] sm:$0xff]  ;;  %v4450_v17 = vcombine.low %v501_v3, %v517_v4 }
 0x158   :  { %v4453_v10 = vcombine.high %v502_v5, %v518_v6  ;;  %v4452_v19 = vcombine.low %v502_v5, %v518_v6 }
 0x15a   :  { %3675 = vmatpush2.bf16.msra.mxu1 %v4704_v8  ;;  %v4484_v8 = vcombine.low %v534_v61, %v550_v62  ;;  %v4771_v62 = vcombine.high %v821_v54, %v837_v57 }
 0x15b   :  { %3676 = vmatprep.subr.bf16.mxu1 %v4673_v9  ;;  %v4451_v9 = vcombine.high %v501_v3, %v517_v4  ;;  %v806_v3 = vld [vmem:[#allocation11 + $0xd98] sm:$0xff]  ;;  %v4770_v4 = vcombine.low %v821_v54, %v837_v57  ;;  %v616_v54 = vld [vmem:[#allocation11 + $0x7a8] sm:$0xff] }
 0x15e   :  { %3677 = vmatpush2.bf16.msra.mxu1 %v4672_v12  ;;  %v485_v12 = vld [vmem:[#allocation11 + $0x390] sm:$0xff] }
 0x15f   :  { %3678 = vmatprep.subr.bf16.mxu1 %v4641_v13  ;;  %v470_v13 = vld [vmem:[#allocation11 + $0x318] sm:$0xff]  ;;  %v4419_v21 = vcombine.high %v469_v11, %v485_v12  ;;  %v4418_v29 = vcombine.low %v469_v11, %v485_v12 }
 0x160   :  { %v774_v11 = vld [vmem:[#allocation11 + $0xc98] sm:$0xff] }
 0x162   :  { %3679 = vmatpush2.bf16.msra.mxu1 %v4640_v14  ;;  %v486_v14 = vld [vmem:[#allocation11 + $0x398] sm:$0xff] }
 0x163   :  { %3680 = vmatprep.subr.bf16.mxu1 %v4609_v28  ;;  %v4421_v22 = vcombine.high %v470_v13, %v486_v14  ;;  %v454_v28 = vld [vmem:[#allocation11 + $0x298] sm:$0xff]  ;;  %v4420_v30 = vcombine.low %v470_v13, %v486_v14 }
 0x166   :  { %3681 = vmatpush2.bf16.msra.mxu1 %v4608_v27  ;;  %v438_v27 = vld [vmem:[#allocation11 + $0x218] sm:$0xff] }
 0x167   :  { %3682 = vmatprep.subr.bf16.mxu1 %v4577_v36  ;;  %v4389_v32 = vcombine.high %v438_v27, %v454_v28  ;;  %v422_v36 = vld [vmem:[#allocation11 + $0x198] sm:$0xff]  ;;  %v4388_v38 = vcombine.low %v438_v27, %v454_v28 }
 0x16a   :  { %3683 = vmatpush2.bf16.msra.mxu1 %v4576_v35  ;;  %v406_v35 = vld [vmem:[#allocation11 + $0x118] sm:$0xff] }
 0x16b   :  { %3734 = vmatprep.subr.bf16.mxu1 %v4549_v44  ;;  %v4357_v40 = vcombine.high %v406_v35, %v422_v36  ;;  %v390_v44 = vld [vmem:[#allocation11 + $0x98] sm:$0xff] }
 0x1ed   :  { %v362_v23 = vpop.f32.mrf.mxu1 }
 0x1ee   :  { %v363_v26 = vadd.f32 %v362_v23, %v289_v46  ;;  %v4356_v46 = vcombine.low %v406_v35, %v422_v36 }
 0x1ef   :  { %v364_v47 = vpop.f32.mrf.mxu1 }
 0x1f0   :  { %v365_v48 = vadd.f32 %v364_v47, %v293_v20  ;;  %v367_v49 = vmax.f32 %v363_v26, 0.0  ;;  %v853_v26 = vld [vmem:[#allocation11 + $0xf10] sm:$0xff] }
 0x1f1   :  { %v869_v47 = vld [vmem:[#allocation11 + $0xf90] sm:$0xff] }
 0x1f2   :  { %v368_v50 = vmax.f32 %v365_v48, 0.0  ;;  %v5112_v56 = vpack.c.bf16 %v367_v49, %v367_v49  ;;  %v854_v48 = vld [vmem:[#allocation11 + $0xf18] sm:$0xff]  ;;  %v4803_v52 = vcombine.high %v853_v26, %v869_v47  ;;  %v4802_v60 = vcombine.low %v853_v26, %v869_v47 }
 0x1f3   :  { %v870_v49 = vld [vmem:[#allocation11 + $0xf98] sm:$0xff] }
 0x1f4   :  { %v5110_v55 = vpack.c.bf16 %v368_v50, %v368_v50  ;;  %v4805_v53 = vcombine.high %v854_v48, %v870_v49  ;;  %v4804_v61 = vcombine.low %v854_v48, %v870_v49  ;;  %v646_v26 = vld [vmem:[#allocation11 + $0x898] sm:$0xff] }
 0x1f6   :  { %3643 = vmatprep.mubr.bf16.mxu0 %v5110_v55  ;;  %3684 = vmatprep.mubr.bf16.mxu1 %v5110_v55 }
 0x1f7   :  { %3644 = vmatmul.mubr.bf16.vlgmr.msra.gmra.mxu0 %v5112_v56  ;;  %3685 = vmatmul.mubr.bf16.vlgmr.msra.gmra.mxu1 %v5112_v56 }
 0x1f8   :  { %3694 = vmatpush1.bf16.msra.mxu0 %v4546_v42  ;;  %3735 = vmatpush1.bf16.msra.mxu1 %v4548_v43  ;;  %v389_v42 = vld [vmem:[#allocation11 + $0x90] sm:$0xff]  ;;  %v374_v43 = vld [vmem:[#allocation11 + $0x18] sm:$0xff] }
 0x1f9   :  { %3725 = vmatprep.mubr.bf16.mxu0 %v5110_v55  ;;  %3766 = vmatprep.mubr.bf16.mxu1 %v5110_v55  ;;  %v4323_v20 = vcombine.high %v373_v41, %v389_v42  ;;  %v4325_v23 = vcombine.high %v374_v43, %v390_v44  ;;  %v4322_v50 = vcombine.low %v373_v41, %v389_v42  ;;  %v678_v41 = vld [vmem:[#allocation11 + $0x998] sm:$0xff] }
 0x1fa   :  { %3695 = vmatprep.subr.bf16.mxu0 %v4515_v58  ;;  %3736 = vmatprep.subr.bf16.mxu1 %v4517_v59  ;;  %v4324_v51 = vcombine.low %v374_v43, %v390_v44  ;;  %v822_v58 = vld [vmem:[#allocation11 + $0xe18] sm:$0xff] }
 0x1fb   :  { %v838_v59 = vld [vmem:[#allocation11 + $0xe98] sm:$0xff] }
 0x1fc   :  { %3696 = vmatpush1.bf16.msra.mxu0 %v4514_v63  ;;  %3737 = vmatpush1.bf16.msra.mxu1 %v4516_v0  ;;  %v4773_v63 = vcombine.high %v822_v58, %v838_v59  ;;  %v789_v0 = vld [vmem:[#allocation11 + $0xd10] sm:$0xff]  ;;  %v4772_v5 = vcombine.low %v822_v58, %v838_v59 }
 0x1fd   :  { %3697 = vmatprep.subr.bf16.mxu0 %v4483_v1  ;;  %3738 = vmatprep.subr.bf16.mxu1 %v4485_v2  ;;  %v805_v1 = vld [vmem:[#allocation11 + $0xd90] sm:$0xff]  ;;  %v790_v2 = vld [vmem:[#allocation11 + $0xd18] sm:$0xff] }
 0x1fe   :  { %v4739_v6 = vcombine.high %v789_v0, %v805_v1  ;;  %v4738_v12 = vcombine.low %v789_v0, %v805_v1  ;;  %v4740_v13 = vcombine.low %v790_v2, %v806_v3  ;;  %v584_v0 = vld [vmem:[#allocation11 + $0x6a8] sm:$0xff] }
 0x200   :  { %3698 = vmatpush1.bf16.msra.mxu0 %v4482_v7  ;;  %3739 = vmatpush1.bf16.msra.mxu1 %v4484_v8  ;;  %v4741_v7 = vcombine.high %v790_v2, %v806_v3  ;;  %v757_v8 = vld [vmem:[#allocation11 + $0xc10] sm:$0xff] }
 0x201   :  { %3699 = vmatprep.subr.bf16.mxu0 %v4451_v9  ;;  %3740 = vmatprep.subr.bf16.mxu1 %v4453_v10  ;;  %v773_v9 = vld [vmem:[#allocation11 + $0xc90] sm:$0xff]  ;;  %v758_v10 = vld [vmem:[#allocation11 + $0xc18] sm:$0xff] }
 0x202   :  { %v4707_v14 = vcombine.high %v757_v8, %v773_v9  ;;  %v4706_v25 = vcombine.low %v757_v8, %v773_v9  ;;  %v4708_v27 = vcombine.low %v758_v10, %v774_v11  ;;  %v552_v8 = vld [vmem:[#allocation11 + $0x5a8] sm:$0xff] }
 0x204   :  { %3700 = vmatpush1.bf16.msra.mxu0 %v4450_v17  ;;  %3741 = vmatpush1.bf16.msra.mxu1 %v4452_v19  ;;  %v4709_v17 = vcombine.high %v758_v10, %v774_v11  ;;  %v725_v19 = vld [vmem:[#allocation11 + $0xb10] sm:$0xff] }
 0x205   :  { %3701 = vmatprep.subr.bf16.mxu0 %v4419_v21  ;;  %3742 = vmatprep.subr.bf16.mxu1 %v4421_v22  ;;  %v741_v21 = vld [vmem:[#allocation11 + $0xb90] sm:$0xff]  ;;  %v726_v22 = vld [vmem:[#allocation11 + $0xb18] sm:$0xff] }
 0x206   :  { %v4675_v28 = vcombine.high %v725_v19, %v741_v21  ;;  %v4674_v34 = vcombine.low %v725_v19, %v741_v21  ;;  %v4676_v35 = vcombine.low %v726_v22, %v742_v24  ;;  %v520_v19 = vld [vmem:[#allocation11 + $0x4a8] sm:$0xff] }
 0x208   :  { %3702 = vmatpush1.bf16.msra.mxu0 %v4418_v29  ;;  %3743 = vmatpush1.bf16.msra.mxu1 %v4420_v30  ;;  %v4677_v29 = vcombine.high %v726_v22, %v742_v24  ;;  %v693_v30 = vld [vmem:[#allocation11 + $0xa10] sm:$0xff] }
 0x209   :  { %3703 = vmatprep.subr.bf16.mxu0 %v4387_v31  ;;  %3744 = vmatprep.subr.bf16.mxu1 %v4389_v32  ;;  %v709_v31 = vld [vmem:[#allocation11 + $0xa90] sm:$0xff]  ;;  %v694_v32 = vld [vmem:[#allocation11 + $0xa18] sm:$0xff] }
 0x20a   :  { %v4643_v36 = vcombine.high %v693_v30, %v709_v31  ;;  %v4642_v42 = vcombine.low %v693_v30, %v709_v31  ;;  %v4644_v43 = vcombine.low %v694_v32, %v710_v33  ;;  %v488_v30 = vld [vmem:[#allocation11 + $0x3a8] sm:$0xff] }
 0x20c   :  { %3704 = vmatpush1.bf16.msra.mxu0 %v4386_v37  ;;  %3745 = vmatpush1.bf16.msra.mxu1 %v4388_v38  ;;  %v4645_v37 = vcombine.high %v694_v32, %v710_v33  ;;  %v661_v38 = vld [vmem:[#allocation11 + $0x910] sm:$0xff] }
 0x20d   :  { %3705 = vmatprep.subr.bf16.mxu0 %v4355_v39  ;;  %3746 = vmatprep.subr.bf16.mxu1 %v4357_v40  ;;  %v677_v39 = vld [vmem:[#allocation11 + $0x990] sm:$0xff]  ;;  %v662_v40 = vld [vmem:[#allocation11 + $0x918] sm:$0xff] }
 0x20e   :  { %v4611_v44 = vcombine.high %v661_v38, %v677_v39  ;;  %v4610_v47 = vcombine.low %v661_v38, %v677_v39  ;;  %v4612_v48 = vcombine.low %v662_v40, %v678_v41  ;;  %v456_v38 = vld [vmem:[#allocation11 + $0x2a8] sm:$0xff] }
 0x210   :  { %3706 = vmatpush1.bf16.msra.mxu0 %v4354_v45  ;;  %3747 = vmatpush1.bf16.msra.mxu1 %v4356_v46  ;;  %v4613_v45 = vcombine.high %v662_v40, %v678_v41  ;;  %v629_v46 = vld [vmem:[#allocation11 + $0x810] sm:$0xff] }
 0x211   :  { %3707 = vmatprep.subr.bf16.mxu0 %v4323_v20  ;;  %3748 = vmatprep.subr.bf16.mxu1 %v4325_v23  ;;  %v645_v20 = vld [vmem:[#allocation11 + $0x890] sm:$0xff]  ;;  %v630_v23 = vld [vmem:[#allocation11 + $0x818] sm:$0xff] }
 0x212   :  { %v4579_v49 = vcombine.high %v629_v46, %v645_v20  ;;  %v4578_v57 = vcombine.low %v629_v46, %v645_v20  ;;  %v4580_v58 = vcombine.low %v630_v23, %v646_v26  ;;  %v424_v46 = vld [vmem:[#allocation11 + $0x1a8] sm:$0xff] }
 0x214   :  { %3708 = vmatpush1.bf16.msra.mxu0 %v4322_v50  ;;  %3749 = vmatpush1.bf16.msra.mxu1 %v4324_v51  ;;  %v4581_v50 = vcombine.high %v630_v23, %v646_v26  ;;  %v599_v51 = vld [vmem:[#allocation11 + $0x720] sm:$0xff] }
 0x215   :  { %3709 = vmatprep.subr.bf16.mxu0 %v4803_v52  ;;  %3750 = vmatprep.subr.bf16.mxu1 %v4805_v53  ;;  %v615_v52 = vld [vmem:[#allocation11 + $0x7a0] sm:$0xff]  ;;  %v600_v53 = vld [vmem:[#allocation11 + $0x728] sm:$0xff] }
 0x216   :  { %v4551_v59 = vcombine.high %v599_v51, %v615_v52  ;;  %v4550_v1 = vcombine.low %v599_v51, %v615_v52  ;;  %v4552_v2 = vcombine.low %v600_v53, %v616_v54  ;;  %v392_v51 = vld [vmem:[#allocation11 + $0xa8] sm:$0xff] }
 0x218   :  { %3710 = vmatpush2.bf16.msra.mxu0 %v4802_v60  ;;  %3751 = vmatpush2.bf16.msra.mxu1 %v4804_v61  ;;  %v4553_v60 = vcombine.high %v600_v53, %v616_v54  ;;  %v567_v61 = vld [vmem:[#allocation11 + $0x620] sm:$0xff] }
 0x219   :  { %3711 = vmatprep.subr.bf16.mxu0 %v4771_v62  ;;  %3752 = vmatprep.subr.bf16.mxu1 %v4773_v63  ;;  %v583_v62 = vld [vmem:[#allocation11 + $0x6a0] sm:$0xff]  ;;  %v568_v63 = vld [vmem:[#allocation11 + $0x628] sm:$0xff] }
 0x21a   :  { %v4519_v3 = vcombine.high %v567_v61, %v583_v62  ;;  %v4518_v9 = vcombine.low %v567_v61, %v583_v62  ;;  %v4520_v10 = vcombine.low %v568_v63, %v584_v0  ;;  %v872_v61 = vld [vmem:[#allocation11 + $0xfa8] sm:$0xff] }
 0x21c   :  { %3712 = vmatpush2.bf16.msra.mxu0 %v4770_v4  ;;  %3753 = vmatpush2.bf16.msra.mxu1 %v4772_v5  ;;  %v4521_v4 = vcombine.high %v568_v63, %v584_v0  ;;  %v535_v5 = vld [vmem:[#allocation11 + $0x520] sm:$0xff] }
 0x21d   :  { %3713 = vmatprep.subr.bf16.mxu0 %v4739_v6  ;;  %3754 = vmatprep.subr.bf16.mxu1 %v4741_v7  ;;  %v551_v6 = vld [vmem:[#allocation11 + $0x5a0] sm:$0xff]  ;;  %v536_v7 = vld [vmem:[#allocation11 + $0x528] sm:$0xff] }
 0x21e   :  { %v4487_v11 = vcombine.high %v535_v5, %v551_v6  ;;  %v4486_v21 = vcombine.low %v535_v5, %v551_v6  ;;  %v4488_v22 = vcombine.low %v536_v7, %v552_v8  ;;  %v840_v5 = vld [vmem:[#allocation11 + $0xea8] sm:$0xff] }
 0x220   :  { %3714 = vmatpush2.bf16.msra.mxu0 %v4738_v12  ;;  %3755 = vmatpush2.bf16.msra.mxu1 %v4740_v13  ;;  %v4489_v12 = vcombine.high %v536_v7, %v552_v8  ;;  %v503_v13 = vld [vmem:[#allocation11 + $0x420] sm:$0xff] }
 0x221   :  { %3715 = vmatprep.subr.bf16.mxu0 %v4707_v14  ;;  %3756 = vmatprep.subr.bf16.mxu1 %v4709_v17  ;;  %v519_v14 = vld [vmem:[#allocation11 + $0x4a0] sm:$0xff]  ;;  %v504_v17 = vld [vmem:[#allocation11 + $0x428] sm:$0xff] }
 0x222   :  { %v4455_v24 = vcombine.high %v503_v13, %v519_v14  ;;  %v4454_v31 = vcombine.low %v503_v13, %v519_v14  ;;  %v4456_v32 = vcombine.low %v504_v17, %v520_v19  ;;  %v808_v13 = vld [vmem:[#allocation11 + $0xda8] sm:$0xff] }
 0x224   :  { %3716 = vmatpush2.bf16.msra.mxu0 %v4706_v25  ;;  %3757 = vmatpush2.bf16.msra.mxu1 %v4708_v27  ;;  %v4457_v25 = vcombine.high %v504_v17, %v520_v19  ;;  %v471_v27 = vld [vmem:[#allocation11 + $0x320] sm:$0xff] }
 0x225   :  { %3717 = vmatprep.subr.bf16.mxu0 %v4675_v28  ;;  %3758 = vmatprep.subr.bf16.mxu1 %v4677_v29  ;;  %v487_v28 = vld [vmem:[#allocation11 + $0x3a0] sm:$0xff]  ;;  %v472_v29 = vld [vmem:[#allocation11 + $0x328] sm:$0xff] }
 0x226   :  { %v4423_v33 = vcombine.high %v471_v27, %v487_v28  ;;  %v4422_v39 = vcombine.low %v471_v27, %v487_v28  ;;  %v4424_v40 = vcombine.low %v472_v29, %v488_v30  ;;  %v776_v27 = vld [vmem:[#allocation11 + $0xca8] sm:$0xff] }
 0x228   :  { %3718 = vmatpush2.bf16.msra.mxu0 %v4674_v34  ;;  %3759 = vmatpush2.bf16.msra.mxu1 %v4676_v35  ;;  %v4425_v34 = vcombine.high %v472_v29, %v488_v30  ;;  %v439_v35 = vld [vmem:[#allocation11 + $0x220] sm:$0xff] }
 0x229   :  { %3719 = vmatprep.subr.bf16.mxu0 %v4643_v36  ;;  %3760 = vmatprep.subr.bf16.mxu1 %v4645_v37  ;;  %v455_v36 = vld [vmem:[#allocation11 + $0x2a0] sm:$0xff]  ;;  %v440_v37 = vld [vmem:[#allocation11 + $0x228] sm:$0xff] }
 0x22a   :  { %v4391_v41 = vcombine.high %v439_v35, %v455_v36  ;;  %v4390_v20 = vcombine.low %v439_v35, %v455_v36  ;;  %v4392_v23 = vcombine.low %v440_v37, %v456_v38  ;;  %v744_v35 = vld [vmem:[#allocation11 + $0xba8] sm:$0xff] }
 0x22c   :  { %3720 = vmatpush2.bf16.msra.mxu0 %v4642_v42  ;;  %3761 = vmatpush2.bf16.msra.mxu1 %v4644_v43  ;;  %v4393_v42 = vcombine.high %v440_v37, %v456_v38  ;;  %v407_v43 = vld [vmem:[#allocation11 + $0x120] sm:$0xff] }
 0x22d   :  { %3721 = vmatprep.subr.bf16.mxu0 %v4611_v44  ;;  %3762 = vmatprep.subr.bf16.mxu1 %v4613_v45  ;;  %v423_v44 = vld [vmem:[#allocation11 + $0x1a0] sm:$0xff]  ;;  %v408_v45 = vld [vmem:[#allocation11 + $0x128] sm:$0xff] }
 0x22e   :  { %v4359_v26 = vcombine.high %v407_v43, %v423_v44  ;;  %v4358_v52 = vcombine.low %v407_v43, %v423_v44  ;;  %v4360_v53 = vcombine.low %v408_v45, %v424_v46  ;;  %v712_v43 = vld [vmem:[#allocation11 + $0xaa8] sm:$0xff] }
 0x230   :  { %3722 = vmatpush2.bf16.msra.mxu0 %v4610_v47  ;;  %3763 = vmatpush2.bf16.msra.mxu1 %v4612_v48  ;;  %v4361_v47 = vcombine.high %v408_v45, %v424_v46  ;;  %v375_v48 = vld [vmem:[#allocation11 + $0x20] sm:$0xff] }
 0x231   :  { %3723 = vmatprep.subr.bf16.mxu0 %v4579_v49  ;;  %3764 = vmatprep.subr.bf16.mxu1 %v4581_v50  ;;  %v391_v49 = vld [vmem:[#allocation11 + $0xa0] sm:$0xff]  ;;  %v376_v50 = vld [vmem:[#allocation11 + $0x28] sm:$0xff] }
 0x232   :  { %v4327_v54 = vcombine.high %v375_v48, %v391_v49  ;;  %v4326_v62 = vcombine.low %v375_v48, %v391_v49  ;;  %v4328_v63 = vcombine.low %v376_v50, %v392_v51  ;;  %v680_v48 = vld [vmem:[#allocation11 + $0x9a8] sm:$0xff] }
 0x234   :  { %3724 = vmatpush2.bf16.msra.mxu0 %v4578_v57  ;;  %3765 = vmatpush2.bf16.msra.mxu1 %v4580_v58  ;;  %v4329_v57 = vcombine.high %v376_v50, %v392_v51  ;;  %v855_v58 = vld [vmem:[#allocation11 + $0xf20] sm:$0xff] }
 0x235   :  { %3775 = vmatprep.subr.bf16.mxu0 %v4551_v59  ;;  %3816 = vmatprep.subr.bf16.mxu1 %v4553_v60  ;;  %v871_v59 = vld [vmem:[#allocation11 + $0xfa0] sm:$0xff]  ;;  %v856_v60 = vld [vmem:[#allocation11 + $0xf28] sm:$0xff] }
 0x236   :  { %v4807_v0 = vcombine.high %v855_v58, %v871_v59  ;;  %v4806_v6 = vcombine.low %v855_v58, %v871_v59  ;;  %v4808_v7 = vcombine.low %v856_v60, %v872_v61  ;;  %v648_v58 = vld [vmem:[#allocation11 + $0x8a8] sm:$0xff] }
 0x237   :  { %3726 = vmatmul.mubr.bf16.vlgmr.msra.gmra.mxu0 %v5112_v56  ;;  %3767 = vmatmul.mubr.bf16.vlgmr.msra.gmra.mxu1 %v5112_v56 }
 0x238   :  { %3776 = vmatpush1.bf16.msra.mxu0 %v4550_v1  ;;  %3807 = vmatprep.mubr.bf16.mxu0 %v5110_v55  ;;  %v4809_v1 = vcombine.high %v856_v60, %v872_v61 }
 0x239   :  { %3817 = vmatpush1.bf16.msra.mxu1 %v4552_v2  ;;  %3848 = vmatprep.mubr.bf16.mxu1 %v5110_v55  ;;  %v823_v2 = vld [vmem:[#allocation11 + $0xe20] sm:$0xff] }
 0x23a   :  { %3777 = vmatprep.subr.bf16.mxu0 %v4519_v3  ;;  %3818 = vmatprep.subr.bf16.mxu1 %v4521_v4  ;;  %v839_v3 = vld [vmem:[#allocation11 + $0xea0] sm:$0xff]  ;;  %v824_v4 = vld [vmem:[#allocation11 + $0xe28] sm:$0xff] }
 0x23b   :  { %v4775_v8 = vcombine.high %v823_v2, %v839_v3  ;;  %v4774_v14 = vcombine.low %v823_v2, %v839_v3  ;;  %v4776_v17 = vcombine.low %v824_v4, %v840_v5  ;;  %v618_v2 = vld [vmem:[#allocation11 + $0x7b8] sm:$0xff] }
 0x23c   :  { %3778 = vmatpush1.bf16.msra.mxu0 %v4518_v9  ;;  %v4777_v9 = vcombine.high %v824_v4, %v840_v5 }
 0x23d   :  { %3819 = vmatpush1.bf16.msra.mxu1 %v4520_v10  ;;  %3779 = vmatprep.subr.bf16.mxu0 %v4487_v11  ;;  %v791_v10 = vld [vmem:[#allocation11 + $0xd20] sm:$0xff] }
 0x23e   :  { %3820 = vmatprep.subr.bf16.mxu1 %v4489_v12  ;;  %v807_v11 = vld [vmem:[#allocation11 + $0xda0] sm:$0xff]  ;;  %v792_v12 = vld [vmem:[#allocation11 + $0xd28] sm:$0xff] }
 0x23f   :  { %v4743_v19 = vcombine.high %v791_v10, %v807_v11  ;;  %v4742_v28 = vcombine.low %v791_v10, %v807_v11  ;;  %v4744_v29 = vcombine.low %v792_v12, %v808_v13  ;;  %v570_v10 = vld [vmem:[#allocation11 + $0x638] sm:$0xff] }
 0x240   :  { %3780 = vmatpush1.bf16.msra.mxu0 %v4486_v21  ;;  %v4745_v21 = vcombine.high %v792_v12, %v808_v13  ;;  %v586_v11 = vld [vmem:[#allocation11 + $0x6b8] sm:$0xff] }
 0x241   :  { %3821 = vmatpush1.bf16.msra.mxu1 %v4488_v22  ;;  %3781 = vmatprep.subr.bf16.mxu0 %v4455_v24  ;;  %v759_v22 = vld [vmem:[#allocation11 + $0xc20] sm:$0xff] }
 0x242   :  { %3822 = vmatprep.subr.bf16.mxu1 %v4457_v25  ;;  %v775_v24 = vld [vmem:[#allocation11 + $0xca0] sm:$0xff]  ;;  %v760_v25 = vld [vmem:[#allocation11 + $0xc28] sm:$0xff] }
 0x243   :  { %v4711_v30 = vcombine.high %v759_v22, %v775_v24  ;;  %v4710_v36 = vcombine.low %v759_v22, %v775_v24  ;;  %v4712_v37 = vcombine.low %v760_v25, %v776_v27  ;;  %v554_v22 = vld [vmem:[#allocation11 + $0x5b8] sm:$0xff] }
 0x244   :  { %3782 = vmatpush1.bf16.msra.mxu0 %v4454_v31  ;;  %v4713_v31 = vcombine.high %v760_v25, %v776_v27  ;;  %v4524_v25 = vcombine.low %v570_v10, %v586_v11 }
 0x245   :  { %3823 = vmatpush1.bf16.msra.mxu1 %v4456_v32  ;;  %3783 = vmatprep.subr.bf16.mxu0 %v4423_v33  ;;  %v727_v32 = vld [vmem:[#allocation11 + $0xb20] sm:$0xff] }
 0x246   :  { %3824 = vmatprep.subr.bf16.mxu1 %v4425_v34  ;;  %v743_v33 = vld [vmem:[#allocation11 + $0xba0] sm:$0xff]  ;;  %v728_v34 = vld [vmem:[#allocation11 + $0xb28] sm:$0xff] }
 0x247   :  { %v4679_v38 = vcombine.high %v727_v32, %v743_v33  ;;  %v4678_v44 = vcombine.low %v727_v32, %v743_v33  ;;  %v4680_v45 = vcombine.low %v728_v34, %v744_v35  ;;  %v522_v32 = vld [vmem:[#allocation11 + $0x4b8] sm:$0xff] }
 0x248   :  { %3784 = vmatpush1.bf16.msra.mxu0 %v4422_v39  ;;  %v4681_v39 = vcombine.high %v728_v34, %v744_v35 }
 0x249   :  { %3825 = vmatpush1.bf16.msra.mxu1 %v4424_v40  ;;  %3785 = vmatprep.subr.bf16.mxu0 %v4391_v41  ;;  %v695_v40 = vld [vmem:[#allocation11 + $0xa20] sm:$0xff] }
 0x24a   :  { %3826 = vmatprep.subr.bf16.mxu1 %v4393_v42  ;;  %v711_v41 = vld [vmem:[#allocation11 + $0xaa0] sm:$0xff]  ;;  %v696_v42 = vld [vmem:[#allocation11 + $0xa28] sm:$0xff] }
 0x24b   :  { %v4647_v46 = vcombine.high %v695_v40, %v711_v41  ;;  %v4646_v49 = vcombine.low %v695_v40, %v711_v41  ;;  %v4648_v50 = vcombine.low %v696_v42, %v712_v43  ;;  %v490_v40 = vld [vmem:[#allocation11 + $0x3b8] sm:$0xff] }
 0x24c   :  { %3786 = vmatpush1.bf16.msra.mxu0 %v4390_v20  ;;  %v4649_v20 = vcombine.high %v696_v42, %v712_v43 }
 0x24d   :  { %3827 = vmatpush1.bf16.msra.mxu1 %v4392_v23  ;;  %3787 = vmatprep.subr.bf16.mxu0 %v4359_v26  ;;  %v663_v23 = vld [vmem:[#allocation11 + $0x920] sm:$0xff] }
 0x24e   :  { %3828 = vmatprep.subr.bf16.mxu1 %v4361_v47  ;;  %v679_v26 = vld [vmem:[#allocation11 + $0x9a0] sm:$0xff]  ;;  %v664_v47 = vld [vmem:[#allocation11 + $0x928] sm:$0xff] }
 0x24f   :  { %v4615_v51 = vcombine.high %v663_v23, %v679_v26  ;;  %v4614_v59 = vcombine.low %v663_v23, %v679_v26  ;;  %v4616_v60 = vcombine.low %v664_v47, %v680_v48  ;;  %v458_v23 = vld [vmem:[#allocation11 + $0x2b8] sm:$0xff] }
 0x250   :  { %3788 = vmatpush1.bf16.msra.mxu0 %v4358_v52  ;;  %v4617_v52 = vcombine.high %v664_v47, %v680_v48 }
 0x251   :  { %3829 = vmatpush1.bf16.msra.mxu1 %v4360_v53  ;;  %3789 = vmatprep.subr.bf16.mxu0 %v4327_v54  ;;  %v631_v53 = vld [vmem:[#allocation11 + $0x820] sm:$0xff] }
 0x252   :  { %3830 = vmatprep.subr.bf16.mxu1 %v4329_v57  ;;  %v647_v54 = vld [vmem:[#allocation11 + $0x8a0] sm:$0xff]  ;;  %v632_v57 = vld [vmem:[#allocation11 + $0x828] sm:$0xff] }
 0x253   :  { %v4583_v61 = vcombine.high %v631_v53, %v647_v54  ;;  %v4582_v3 = vcombine.low %v631_v53, %v647_v54  ;;  %v4584_v4 = vcombine.low %v632_v57, %v648_v58  ;;  %v426_v53 = vld [vmem:[#allocation11 + $0x1b8] sm:$0xff] }
 0x254   :  { %3790 = vmatpush1.bf16.msra.mxu0 %v4326_v62  ;;  %v4585_v62 = vcombine.high %v632_v57, %v648_v58 }
 0x255   :  { %3831 = vmatpush1.bf16.msra.mxu1 %v4328_v63  ;;  %3791 = vmatprep.subr.bf16.mxu0 %v4807_v0  ;;  %v601_v63 = vld [vmem:[#allocation11 + $0x730] sm:$0xff] }
 0x256   :  { %3832 = vmatprep.subr.bf16.mxu1 %v4809_v1  ;;  %v617_v0 = vld [vmem:[#allocation11 + $0x7b0] sm:$0xff]  ;;  %v602_v1 = vld [vmem:[#allocation11 + $0x738] sm:$0xff] }
 0x257   :  { %v4555_v5 = vcombine.high %v601_v63, %v617_v0  ;;  %v4556_v12 = vcombine.low %v602_v1, %v618_v2 }
 0x258   :  { %3792 = vmatpush2.bf16.msra.mxu0 %v4806_v6  ;;  %v4557_v6 = vcombine.high %v602_v1, %v618_v2 }
 0x259   :  { %3833 = vmatpush2.bf16.msra.mxu1 %v4808_v7  ;;  %3793 = vmatprep.subr.bf16.mxu0 %v4775_v8  ;;  %v569_v7 = vld [vmem:[#allocation11 + $0x630] sm:$0xff] }
 0x25a   :  { %3834 = vmatprep.subr.bf16.mxu1 %v4777_v9  ;;  %v585_v8 = vld [vmem:[#allocation11 + $0x6b0] sm:$0xff]  ;;  %v4554_v9 = vcombine.low %v601_v63, %v617_v0  ;;  %v394_v63 = vld [vmem:[#allocation11 + $0xb8] sm:$0xff] }
 0x25b   :  { %v4523_v13 = vcombine.high %v569_v7, %v585_v8  ;;  %v4522_v24 = vcombine.low %v569_v7, %v585_v8  ;;  %v874_v7 = vld [vmem:[#allocation11 + $0xfb8] sm:$0xff] }
 0x25c   :  { %3794 = vmatpush2.bf16.msra.mxu0 %v4774_v14  ;;  %v537_v14 = vld [vmem:[#allocation11 + $0x530] sm:$0xff] }
 0x25d   :  { %3835 = vmatpush2.bf16.msra.mxu1 %v4776_v17  ;;  %3795 = vmatprep.subr.bf16.mxu0 %v4743_v19  ;;  %v553_v17 = vld [vmem:[#allocation11 + $0x5b0] sm:$0xff]  ;;  %v4525_v19 = vcombine.high %v570_v10, %v586_v11 }
 0x25e   :  { %3836 = vmatprep.subr.bf16.mxu1 %v4745_v21  ;;  %v538_v21 = vld [vmem:[#allocation11 + $0x538] sm:$0xff]  ;;  %v4491_v27 = vcombine.high %v537_v14, %v553_v17  ;;  %v4490_v33 = vcombine.low %v537_v14, %v553_v17 }
 0x25f   :  { %v4492_v34 = vcombine.low %v538_v21, %v554_v22  ;;  %v826_v14 = vld [vmem:[#allocation11 + $0xe38] sm:$0xff] }
 0x260   :  { %3796 = vmatpush2.bf16.msra.mxu0 %v4742_v28  ;;  %v4493_v28 = vcombine.high %v538_v21, %v554_v22  ;;  %v842_v17 = vld [vmem:[#allocation11 + $0xeb8] sm:$0xff] }
 0x261   :  { %3837 = vmatpush2.bf16.msra.mxu1 %v4744_v29  ;;  %3797 = vmatprep.subr.bf16.mxu0 %v4711_v30  ;;  %v505_v29 = vld [vmem:[#allocation11 + $0x430] sm:$0xff] }
 0x262   :  { %3838 = vmatprep.subr.bf16.mxu1 %v4713_v31  ;;  %v521_v30 = vld [vmem:[#allocation11 + $0x4b0] sm:$0xff]  ;;  %v506_v31 = vld [vmem:[#allocation11 + $0x438] sm:$0xff] }
 0x263   :  { %v4459_v35 = vcombine.high %v505_v29, %v521_v30  ;;  %v4458_v41 = vcombine.low %v505_v29, %v521_v30  ;;  %v4460_v42 = vcombine.low %v506_v31, %v522_v32  ;;  %v810_v29 = vld [vmem:[#allocation11 + $0xdb8] sm:$0xff] }
 0x264   :  { %3798 = vmatpush2.bf16.msra.mxu0 %v4710_v36  ;;  %v4461_v36 = vcombine.high %v506_v31, %v522_v32  ;;  %v4780_v31 = vcombine.low %v826_v14, %v842_v17 }
 0x265   :  { %3839 = vmatpush2.bf16.msra.mxu1 %v4712_v37  ;;  %3799 = vmatprep.subr.bf16.mxu0 %v4679_v38  ;;  %v473_v37 = vld [vmem:[#allocation11 + $0x330] sm:$0xff] }
 0x266   :  { %3840 = vmatprep.subr.bf16.mxu1 %v4681_v39  ;;  %v489_v38 = vld [vmem:[#allocation11 + $0x3b0] sm:$0xff]  ;;  %v474_v39 = vld [vmem:[#allocation11 + $0x338] sm:$0xff] }
 0x267   :  { %v4427_v43 = vcombine.high %v473_v37, %v489_v38  ;;  %v4426_v26 = vcombine.low %v473_v37, %v489_v38  ;;  %v4428_v47 = vcombine.low %v474_v39, %v490_v40  ;;  %v778_v37 = vld [vmem:[#allocation11 + $0xcb8] sm:$0xff] }
 0x268   :  { %3800 = vmatpush2.bf16.msra.mxu0 %v4678_v44  ;;  %v4429_v44 = vcombine.high %v474_v39, %v490_v40 }
 0x269   :  { %3841 = vmatpush2.bf16.msra.mxu1 %v4680_v45  ;;  %3801 = vmatprep.subr.bf16.mxu0 %v4647_v46  ;;  %v441_v45 = vld [vmem:[#allocation11 + $0x230] sm:$0xff] }
 0x26a   :  { %3842 = vmatprep.subr.bf16.mxu1 %v4649_v20  ;;  %v457_v46 = vld [vmem:[#allocation11 + $0x2b0] sm:$0xff]  ;;  %v442_v20 = vld [vmem:[#allocation11 + $0x238] sm:$0xff] }
 0x26b   :  { %v4395_v48 = vcombine.high %v441_v45, %v457_v46  ;;  %v4394_v54 = vcombine.low %v441_v45, %v457_v46  ;;  %v4396_v57 = vcombine.low %v442_v20, %v458_v23  ;;  %v746_v45 = vld [vmem:[#allocation11 + $0xbb8] sm:$0xff] }
 0x26c   :  { %3802 = vmatpush2.bf16.msra.mxu0 %v4646_v49  ;;  %v4397_v49 = vcombine.high %v442_v20, %v458_v23 }
 0x26d   :  { %3843 = vmatpush2.bf16.msra.mxu1 %v4648_v50  ;;  %3803 = vmatprep.subr.bf16.mxu0 %v4615_v51  ;;  %v409_v50 = vld [vmem:[#allocation11 + $0x130] sm:$0xff] }
 0x26e   :  { %3844 = vmatprep.subr.bf16.mxu1 %v4617_v52  ;;  %v425_v51 = vld [vmem:[#allocation11 + $0x1b0] sm:$0xff]  ;;  %v410_v52 = vld [vmem:[#allocation11 + $0x138] sm:$0xff] }
 0x26f   :  { %v4363_v58 = vcombine.high %v409_v50, %v425_v51  ;;  %v4362_v0 = vcombine.low %v409_v50, %v425_v51  ;;  %v4364_v1 = vcombine.low %v410_v52, %v426_v53  ;;  %v714_v50 = vld [vmem:[#allocation11 + $0xab8] sm:$0xff] }
 0x270   :  { %3804 = vmatpush2.bf16.msra.mxu0 %v4614_v59  ;;  %v4365_v59 = vcombine.high %v410_v52, %v426_v53 }
 0x271   :  { %3845 = vmatpush2.bf16.msra.mxu1 %v4616_v60  ;;  %3805 = vmatprep.subr.bf16.mxu0 %v4583_v61  ;;  %v377_v60 = vld [vmem:[#allocation11 + $0x30] sm:$0xff] }
 0x272   :  { %3846 = vmatprep.subr.bf16.mxu1 %v4585_v62  ;;  %v393_v61 = vld [vmem:[#allocation11 + $0xb0] sm:$0xff]  ;;  %v378_v62 = vld [vmem:[#allocation11 + $0x38] sm:$0xff] }
 0x273   :  { %v4331_v2 = vcombine.high %v377_v60, %v393_v61  ;;  %v4330_v8 = vcombine.low %v377_v60, %v393_v61  ;;  %v682_v60 = vld [vmem:[#allocation11 + $0x9b8] sm:$0xff] }
 0x274   :  { %3806 = vmatpush2.bf16.msra.mxu0 %v4582_v3  ;;  %v4333_v3 = vcombine.high %v378_v62, %v394_v63 }
 0x275   :  { %3847 = vmatpush2.bf16.msra.mxu1 %v4584_v4  ;;  %3857 = vmatprep.subr.bf16.mxu0 %v4555_v5  ;;  %v857_v4 = vld [vmem:[#allocation11 + $0xf30] sm:$0xff] }
 0x276   :  { %3898 = vmatprep.subr.bf16.mxu1 %v4557_v6  ;;  %v873_v5 = vld [vmem:[#allocation11 + $0xfb0] sm:$0xff]  ;;  %v858_v6 = vld [vmem:[#allocation11 + $0xf38] sm:$0xff] }
 0x277   :  { %3808 = vmatmul.mubr.bf16.vlgmr.msra.gmra.mxu0 %v5112_v56  ;;  %v4811_v10 = vcombine.high %v857_v4, %v873_v5  ;;  %v4813_v11 = vcombine.high %v858_v6, %v874_v7  ;;  %v4812_v21 = vcombine.low %v858_v6, %v874_v7 }
 0x278   :  { %3849 = vmatmul.mubr.bf16.vlgmr.msra.gmra.mxu1 %v5112_v56  ;;  %3858 = vmatpush1.bf16.msra.mxu0 %v4554_v9  ;;  %v4332_v9 = vcombine.low %v378_v62, %v394_v63 }
 0x279   :  { %3889 = vmatprep.mubr.bf16.mxu0 %v5110_v55  ;;  %3899 = vmatpush1.bf16.msra.mxu1 %v4556_v12  ;;  %v825_v12 = vld [vmem:[#allocation11 + $0xe30] sm:$0xff] }
 0x27a   :  { %3930 = vmatprep.mubr.bf16.mxu1 %v5110_v55  ;;  %3859 = vmatprep.subr.bf16.mxu0 %v4523_v13  ;;  %v841_v13 = vld [vmem:[#allocation11 + $0xeb0] sm:$0xff] }
 0x27b   :  { %3900 = vmatprep.subr.bf16.mxu1 %v4525_v19  ;;  %v4810_v19 = vcombine.low %v857_v4, %v873_v5  ;;  %v4779_v22 = vcombine.high %v825_v12, %v841_v13  ;;  %v4778_v30 = vcombine.low %v825_v12, %v841_v13  ;;  %v650_v4 = vld [vmem:[#allocation11 + $0x8b8] sm:$0xff]  ;;  %v620_v12 = vld [vmem:[#allocation11 + $0x7c8] sm:$0xff] }
 0x27c   :  { %3860 = vmatpush1.bf16.msra.mxu0 %v4522_v24  ;;  %v4781_v24 = vcombine.high %v826_v14, %v842_v17  ;;  %v5129_v14 = vsub.s32 2, %v5095_v15 }
 0x27d   :  { %3901 = vmatpush1.bf16.msra.mxu1 %v4524_v25  ;;  %3861 = vmatprep.subr.bf16.mxu0 %v4491_v27  ;;  %v793_v25 = vld [vmem:[#allocation11 + $0xd30] sm:$0xff] }
 0x27e   :  { %3902 = vmatprep.subr.bf16.mxu1 %v4493_v28  ;;  %v809_v27 = vld [vmem:[#allocation11 + $0xdb0] sm:$0xff]  ;;  %v794_v28 = vld [vmem:[#allocation11 + $0xd38] sm:$0xff] }
 0x27f   :  { %v4747_v32 = vcombine.high %v793_v25, %v809_v27  ;;  %v4746_v38 = vcombine.low %v793_v25, %v809_v27  ;;  %v4748_v39 = vcombine.low %v794_v28, %v810_v29  ;;  %v571_v25 = vld [vmem:[#allocation11 + $0x640] sm:$0xff] }
 0x280   :  { %3862 = vmatpush1.bf16.msra.mxu0 %v4490_v33  ;;  %v4749_v33 = vcombine.high %v794_v28, %v810_v29  ;;  %v587_v27 = vld [vmem:[#allocation11 + $0x6c0] sm:$0xff] }
 0x281   :  { %3903 = vmatpush1.bf16.msra.mxu1 %v4492_v34  ;;  %3863 = vmatprep.subr.bf16.mxu0 %v4459_v35  ;;  %v761_v34 = vld [vmem:[#allocation11 + $0xc30] sm:$0xff] }
 0x282   :  { %3904 = vmatprep.subr.bf16.mxu1 %v4461_v36  ;;  %v777_v35 = vld [vmem:[#allocation11 + $0xcb0] sm:$0xff]  ;;  %v762_v36 = vld [vmem:[#allocation11 + $0xc38] sm:$0xff] }
 0x283   :  { %v4715_v40 = vcombine.high %v761_v34, %v777_v35  ;;  %v4714_v46 = vcombine.low %v761_v34, %v777_v35  ;;  %v4716_v20 = vcombine.low %v762_v36, %v778_v37 }
 0x284   :  { %3864 = vmatpush1.bf16.msra.mxu0 %v4458_v41  ;;  %v4717_v41 = vcombine.high %v762_v36, %v778_v37  ;;  %v4527_v36 = vcombine.high %v571_v25, %v587_v27  ;;  %v539_v37 = vld [vmem:[#allocation11 + $0x540] sm:$0xff] }
 0x285   :  { %3905 = vmatpush1.bf16.msra.mxu1 %v4460_v42  ;;  %3865 = vmatprep.subr.bf16.mxu0 %v4427_v43  ;;  %v729_v42 = vld [vmem:[#allocation11 + $0xb30] sm:$0xff] }
 0x286   :  { %3906 = vmatprep.subr.bf16.mxu1 %v4429_v44  ;;  %v745_v43 = vld [vmem:[#allocation11 + $0xbb0] sm:$0xff]  ;;  %v730_v44 = vld [vmem:[#allocation11 + $0xb38] sm:$0xff] }
 0x287   :  { %v4683_v23 = vcombine.high %v729_v42, %v745_v43  ;;  %v4682_v51 = vcombine.low %v729_v42, %v745_v43  ;;  %v4684_v52 = vcombine.low %v730_v44, %v746_v45  ;;  %v540_v42 = vld [vmem:[#allocation11 + $0x548] sm:$0xff] }
 0x288   :  { %3866 = vmatpush1.bf16.msra.mxu0 %v4426_v26  ;;  %v4685_v26 = vcombine.high %v730_v44, %v746_v45  ;;  %v556_v43 = vld [vmem:[#allocation11 + $0x5c8] sm:$0xff] }
 0x289   :  { %3907 = vmatpush1.bf16.msra.mxu1 %v4428_v47  ;;  %3867 = vmatprep.subr.bf16.mxu0 %v4395_v48  ;;  %v697_v47 = vld [vmem:[#allocation11 + $0xa30] sm:$0xff] }
 0x28a   :  { %3908 = vmatprep.subr.bf16.mxu1 %v4397_v49  ;;  %v713_v48 = vld [vmem:[#allocation11 + $0xab0] sm:$0xff]  ;;  %v698_v49 = vld [vmem:[#allocation11 + $0xa38] sm:$0xff] }
 0x28b   :  { %v4651_v53 = vcombine.high %v697_v47, %v713_v48  ;;  %v4650_v61 = vcombine.low %v697_v47, %v713_v48  ;;  %v4652_v62 = vcombine.low %v698_v49, %v714_v50 }
 0x28c   :  { %3868 = vmatpush1.bf16.msra.mxu0 %v4394_v54  ;;  %v4653_v54 = vcombine.high %v698_v49, %v714_v50  ;;  %v4497_v50 = vcombine.high %v540_v42, %v556_v43 }
 0x28d   :  { %3909 = vmatpush1.bf16.msra.mxu1 %v4396_v57  ;;  %3869 = vmatprep.subr.bf16.mxu0 %v4363_v58  ;;  %v665_v57 = vld [vmem:[#allocation11 + $0x930] sm:$0xff] }
 0x28e   :  { %3910 = vmatprep.subr.bf16.mxu1 %v4365_v59  ;;  %v681_v58 = vld [vmem:[#allocation11 + $0x9b0] sm:$0xff]  ;;  %v666_v59 = vld [vmem:[#allocation11 + $0x938] sm:$0xff] }
 0x28f   :  { %v4619_v63 = vcombine.high %v665_v57, %v681_v58  ;;  %v4618_v5 = vcombine.low %v665_v57, %v681_v58  ;;  %v4620_v6 = vcombine.low %v666_v59, %v682_v60  ;;  %v508_v57 = vld [vmem:[#allocation11 + $0x448] sm:$0xff] }
 0x290   :  { %3870 = vmatpush1.bf16.msra.mxu0 %v4362_v0  ;;  %v4621_v0 = vcombine.high %v666_v59, %v682_v60  ;;  %v524_v58 = vld [vmem:[#allocation11 + $0x4c8] sm:$0xff] }
 0x291   :  { %3911 = vmatpush1.bf16.msra.mxu1 %v4364_v1  ;;  %3871 = vmatprep.subr.bf16.mxu0 %v4331_v2  ;;  %v633_v1 = vld [vmem:[#allocation11 + $0x830] sm:$0xff] }
 0x292   :  { %3912 = vmatprep.subr.bf16.mxu1 %v4333_v3  ;;  %v649_v2 = vld [vmem:[#allocation11 + $0x8b0] sm:$0xff]  ;;  %v634_v3 = vld [vmem:[#allocation11 + $0x838] sm:$0xff] }
 0x293   :  { %v4587_v7 = vcombine.high %v633_v1, %v649_v2  ;;  %v4586_v13 = vcombine.low %v633_v1, %v649_v2  ;;  %v4588_v17 = vcombine.low %v634_v3, %v650_v4  ;;  %v475_v1 = vld [vmem:[#allocation11 + $0x340] sm:$0xff] }
 0x294   :  { %3872 = vmatpush1.bf16.msra.mxu0 %v4330_v8  ;;  %v4589_v8 = vcombine.high %v634_v3, %v650_v4  ;;  %v491_v2 = vld [vmem:[#allocation11 + $0x3c0] sm:$0xff]  ;;  %v476_v3 = vld [vmem:[#allocation11 + $0x348] sm:$0xff] }
 0x295   :  { %3913 = vmatpush1.bf16.msra.mxu1 %v4332_v9  ;;  %3873 = vmatprep.subr.bf16.mxu0 %v4811_v10  ;;  %v603_v9 = vld [vmem:[#allocation11 + $0x740] sm:$0xff]  ;;  %v492_v4 = vld [vmem:[#allocation11 + $0x3c8] sm:$0xff] }
 0x296   :  { %3914 = vmatprep.subr.bf16.mxu1 %v4813_v11  ;;  %v619_v10 = vld [vmem:[#allocation11 + $0x7c0] sm:$0xff]  ;;  %v604_v11 = vld [vmem:[#allocation11 + $0x748] sm:$0xff] }
 0x297   :  { %v4558_v28 = vcombine.low %v603_v9, %v619_v10 }
 0x298   :  { %3874 = vmatpush2.bf16.msra.mxu0 %v4810_v19  ;;  %v4559_v19 = vcombine.high %v603_v9, %v619_v10  ;;  %v443_v9 = vld [vmem:[#allocation11 + $0x240] sm:$0xff] }
 0x299   :  { %3915 = vmatpush2.bf16.msra.mxu1 %v4812_v21  ;;  %3875 = vmatprep.subr.bf16.mxu0 %v4779_v22  ;;  %v5131_v21 = vld [vmem:[#allocation13] sm:$0xff]  ;;  %v4561_v22 = vcombine.high %v604_v11, %v620_v12 }
 0x29a   :  { %3916 = vmatprep.subr.bf16.mxu1 %v4781_v24  ;;  %v5134_v24 = vsub.s32 3, %v5095_v15  ;;  %v894_v29 = vrot.slane %v5131_v21, %v5098_v16  ;;  %v898_v34 = vrot.slane %v5131_v21, %v5101_v18  ;;  %v459_v10 = vld [vmem:[#allocation11 + $0x2c0] sm:$0xff] }
 0x29c   :  { %3876 = vmatpush2.bf16.msra.mxu0 %v4778_v30  ;;  %v902_v30 = vrot.slane %v5131_v21, %v5129_v14  ;;  %v906_v35 = vrot.slane %v5131_v21, %v5134_v24 }
 0x29d   :  { %3917 = vmatpush2.bf16.msra.mxu1 %v4780_v31  ;;  %3877 = vmatprep.subr.bf16.mxu0 %v4747_v32  ;;  %v572_v31 = vld [vmem:[#allocation11 + $0x648] sm:$0xff] }
 0x29e   :  { %3918 = vmatprep.subr.bf16.mxu1 %v4749_v33  ;;  %v588_v32 = vld [vmem:[#allocation11 + $0x6c8] sm:$0xff]  ;;  %v4560_v33 = vcombine.low %v604_v11, %v620_v12 }
 0x29f   :  { %v444_v11 = vld [vmem:[#allocation11 + $0x248] sm:$0xff] }
 0x2a0   :  { %3878 = vmatpush2.bf16.msra.mxu0 %v4746_v38  ;;  %v555_v38 = vld [vmem:[#allocation11 + $0x5c0] sm:$0xff]  ;;  %v460_v12 = vld [vmem:[#allocation11 + $0x2c8] sm:$0xff] }
 0x2a1   :  { %3919 = vmatpush2.bf16.msra.mxu1 %v4748_v39  ;;  %3879 = vmatprep.subr.bf16.mxu0 %v4715_v40  ;;  %v4495_v47 = vcombine.high %v539_v37, %v555_v38  ;;  %v4494_v59 = vcombine.low %v539_v37, %v555_v38  ;;  %v396_v37 = vld [vmem:[#allocation11 + $0xc8] sm:$0xff] }
 0x2a2   :  { %3920 = vmatprep.subr.bf16.mxu1 %v4717_v41  ;;  %v4529_v41 = vcombine.high %v572_v31, %v588_v32 }
 0x2a4   :  { %3880 = vmatpush2.bf16.msra.mxu0 %v4714_v46  ;;  %v4526_v46 = vcombine.low %v571_v25, %v587_v27  ;;  %v411_v25 = vld [vmem:[#allocation11 + $0x140] sm:$0xff] }
 0x2a5   :  { %3921 = vmatpush2.bf16.msra.mxu1 %v4716_v20  ;;  %3881 = vmatprep.subr.bf16.mxu0 %v4683_v23  ;;  %v427_v27 = vld [vmem:[#allocation11 + $0x1c0] sm:$0xff] }
 0x2a6   :  { %3922 = vmatprep.subr.bf16.mxu1 %v4685_v26  ;;  %v4528_v26 = vcombine.low %v572_v31, %v588_v32  ;;  %v4400_v31 = vcombine.low %v444_v11, %v460_v12  ;;  %v4367_v32 = vcombine.high %v411_v25, %v427_v27  ;;  %v4366_v38 = vcombine.low %v411_v25, %v427_v27  ;;  %v699_v25 = vld [vmem:[#allocation11 + $0xa40] sm:$0xff] }
 0x2a7   :  { %v715_v27 = vld [vmem:[#allocation11 + $0xac0] sm:$0xff] }
 0x2a8   :  { %3882 = vmatpush2.bf16.msra.mxu0 %v4682_v51  ;;  %v507_v51 = vld [vmem:[#allocation11 + $0x440] sm:$0xff] }
 0x2a9   :  { %3923 = vmatpush2.bf16.msra.mxu1 %v4684_v52  ;;  %3883 = vmatprep.subr.bf16.mxu0 %v4651_v53  ;;  %v523_v52 = vld [vmem:[#allocation11 + $0x4c0] sm:$0xff] }
 0x2aa   :  { %3924 = vmatprep.subr.bf16.mxu1 %v4653_v54 }
 0x2ac   :  { %3884 = vmatpush2.bf16.msra.mxu0 %v4650_v61 }
 0x2ad   :  { %3925 = vmatpush2.bf16.msra.mxu1 %v4652_v62  ;;  %3885 = vmatprep.subr.bf16.mxu0 %v4619_v63  ;;  %v4496_v62 = vcombine.low %v540_v42, %v556_v43  ;;  %v4463_v63 = vcombine.high %v507_v51, %v523_v52  ;;  %v859_v42 = vld [vmem:[#allocation11 + $0xf40] sm:$0xff] }
 0x2ae   :  { %3926 = vmatprep.subr.bf16.mxu1 %v4621_v0  ;;  %v4465_v0 = vcombine.high %v508_v57, %v524_v58  ;;  %v875_v43 = vld [vmem:[#allocation11 + $0xfc0] sm:$0xff] }
 0x2b0   :  { %3886 = vmatpush2.bf16.msra.mxu0 %v4618_v5  ;;  %v4462_v5 = vcombine.low %v507_v51, %v523_v52  ;;  %v4814_v51 = vcombine.low %v859_v42, %v875_v43 }
 0x2b1   :  { %3927 = vmatpush2.bf16.msra.mxu1 %v4620_v6  ;;  %3887 = vmatprep.subr.bf16.mxu0 %v4587_v7  ;;  %v4464_v6 = vcombine.low %v508_v57, %v524_v58  ;;  %v4431_v7 = vcombine.high %v475_v1, %v491_v2  ;;  %v795_v57 = vld [vmem:[#allocation11 + $0xd40] sm:$0xff] }
 0x2b2   :  { %3928 = vmatprep.subr.bf16.mxu1 %v4589_v8  ;;  %v4433_v8 = vcombine.high %v476_v3, %v492_v4  ;;  %v811_v58 = vld [vmem:[#allocation11 + $0xdc0] sm:$0xff] }
 0x2b4   :  { %3888 = vmatpush2.bf16.msra.mxu0 %v4586_v13  ;;  %v4430_v13 = vcombine.low %v475_v1, %v491_v2  ;;  %v763_v1 = vld [vmem:[#allocation11 + $0xc40] sm:$0xff] }
 0x2b5   :  { %3929 = vmatpush2.bf16.msra.mxu1 %v4588_v17  ;;  %3939 = vmatprep.subr.bf16.mxu0 %v4559_v19  ;;  %v4432_v17 = vcombine.low %v476_v3, %v492_v4  ;;  %v4399_v19 = vcombine.high %v443_v9, %v459_v10  ;;  %v779_v2 = vld [vmem:[#allocation11 + $0xcc0] sm:$0xff]  ;;  %v764_v3 = vld [vmem:[#allocation11 + $0xc48] sm:$0xff] }
 0x2b6   :  { %3980 = vmatprep.subr.bf16.mxu1 %v4561_v22  ;;  %v4401_v22 = vcombine.high %v444_v11, %v460_v12  ;;  %v780_v4 = vld [vmem:[#allocation11 + $0xcc8] sm:$0xff] }
 0x2b7   :  { %3890 = vmatmul.mubr.bf16.vlgmr.msra.gmra.mxu0 %v5112_v56  ;;  %v3645_v39 = vpop.f32.mrf.mxu0  ;;  %v3686_v40 = vpop.f32.mrf.mxu1  ;;  %v732_v11 = vld [vmem:[#allocation11 + $0xb48] sm:$0xff] }
 0x2b8   :  { %3931 = vmatmul.mubr.bf16.vlgmr.msra.gmra.mxu1 %v5112_v56  ;;  %v3646_v44 = vadd.f32 %v3645_v39, %v894_v29  ;;  %v3687_v45 = vadd.f32 %v3686_v40, %v902_v30  ;;  %3940 = vmatpush1.bf16.msra.mxu0 %v4558_v28  ;;  %v412_v28 = vld [vmem:[#allocation11 + $0x148] sm:$0xff]  ;;  %v4398_v30 = vcombine.low %v443_v9, %v459_v10  ;;  %v731_v9 = vld [vmem:[#allocation11 + $0xb40] sm:$0xff] }
 0x2b9   :  { %3971 = vmatprep.mubr.bf16.mxu0 %v5110_v55  ;;  %3981 = vmatpush1.bf16.msra.mxu1 %v4560_v33  ;;  %v3647_v20 = vpop.f32.mrf.mxu0  ;;  %v3688_v23 = vpop.f32.mrf.mxu1  ;;  %v428_v29 = vld [vmem:[#allocation11 + $0x1c8] sm:$0xff]  ;;  %v747_v10 = vld [vmem:[#allocation11 + $0xbc0] sm:$0xff] }
 0x2ba   :  { %4267 = vst [vmem:[#allocation14] sm:$0xff] %v3646_v44  ;;  %4269 = vst [vmem:[#allocation14 + $0x10] sm:$0xff] %v3687_v45  ;;  %4012 = vmatprep.mubr.bf16.mxu1 %v5110_v55  ;;  %v3648_v48 = vadd.f32 %v3647_v20, %v898_v34  ;;  %v3689_v49 = vadd.f32 %v3688_v23, %v906_v35  ;;  %3941 = vmatprep.subr.bf16.mxu0 %v4527_v36  ;;  %v379_v34 = vld [vmem:[#allocation11 + $0x40] sm:$0xff]  ;;  %v380_v36 = vld [vmem:[#allocation11 + $0x48] sm:$0xff] }
 0x2bb   :  { %3982 = vmatprep.subr.bf16.mxu1 %v4529_v41  ;;  %v3649_v53 = vpop.f32.mrf.mxu0  ;;  %v3690_v54 = vpop.f32.mrf.mxu1  ;;  %v4369_v33 = vcombine.high %v412_v28, %v428_v29  ;;  %v395_v35 = vld [vmem:[#allocation11 + $0xc0] sm:$0xff]  ;;  %v4368_v39 = vcombine.low %v412_v28, %v428_v29  ;;  %v4337_v41 = vcombine.high %v380_v36, %v396_v37  ;;  %v860_v44 = vld [vmem:[#allocation11 + $0xf48] sm:$0xff]  ;;  %v4336_v20 = vcombine.low %v380_v36, %v396_v37 }
 0x2bc   :  { %4268 = vst [vmem:[#allocation14 + $0x8] sm:$0xff] %v3648_v48  ;;  %4270 = vst [vmem:[#allocation14 + $0x18] sm:$0xff] %v3689_v49  ;;  %3942 = vmatpush1.bf16.msra.mxu0 %v4526_v46  ;;  %v4335_v40 = vcombine.high %v379_v34, %v395_v35  ;;  %v876_v45 = vld [vmem:[#allocation11 + $0xfc8] sm:$0xff]  ;;  %v4334_v46 = vcombine.low %v379_v34, %v395_v35  ;;  %v4815_v23 = vcombine.high %v859_v42, %v875_v43  ;;  %v843_v48 = vld [vmem:[#allocation11 + $0xec0] sm:$0xff] }
 0x2bd   :  { %3983 = vmatpush1.bf16.msra.mxu1 %v4528_v26  ;;  %v3650_v60 = vpop.f32.mrf.mxu0  ;;  %v3691_v61 = vpop.f32.mrf.mxu1  ;;  %3943 = vmatprep.subr.bf16.mxu0 %v4495_v47  ;;  %v4817_v26 = vcombine.high %v860_v44, %v876_v45  ;;  %v827_v47 = vld [vmem:[#allocation11 + $0xe40] sm:$0xff]  ;;  %v828_v49 = vld [vmem:[#allocation11 + $0xe48] sm:$0xff]  ;;  %v4816_v52 = vcombine.low %v860_v44, %v876_v45 }
 0x2be   :  { %3984 = vmatprep.subr.bf16.mxu1 %v4497_v50  ;;  %v844_v50 = vld [vmem:[#allocation11 + $0xec8] sm:$0xff]  ;;  %v4783_v53 = vcombine.high %v827_v47, %v843_v48  ;;  %v4782_v61 = vcombine.low %v827_v47, %v843_v48  ;;  %v667_v34 = vld [vmem:[#allocation11 + $0x940] sm:$0xff]  ;;  %v605_v47 = vld [vmem:[#allocation11 + $0x750] sm:$0xff] }
 0x2bf   :  { %v4785_v54 = vcombine.high %v828_v49, %v844_v50  ;;  %v812_v60 = vld [vmem:[#allocation11 + $0xdc8] sm:$0xff]  ;;  %v683_v35 = vld [vmem:[#allocation11 + $0x9c0] sm:$0xff]  ;;  %v621_v48 = vld [vmem:[#allocation11 + $0x7d0] sm:$0xff] }
 0x2c0   :  { %3944 = vmatpush1.bf16.msra.mxu0 %v4494_v59  ;;  %v796_v59 = vld [vmem:[#allocation11 + $0xd48] sm:$0xff]  ;;  %v635_v42 = vld [vmem:[#allocation11 + $0x840] sm:$0xff] }
 0x2c1   :  { %3985 = vmatpush1.bf16.msra.mxu1 %v4496_v62  ;;  %3945 = vmatprep.subr.bf16.mxu0 %v4463_v63  ;;  %v4784_v62 = vcombine.low %v828_v49, %v844_v50  ;;  %v4751_v63 = vcombine.high %v795_v57, %v811_v58  ;;  %v748_v12 = vld [vmem:[#allocation11 + $0xbc8] sm:$0xff]  ;;  %v651_v43 = vld [vmem:[#allocation11 + $0x8c0] sm:$0xff]  ;;  %v606_v49 = vld [vmem:[#allocation11 + $0x758] sm:$0xff] }
 0x2c2   :  { %3986 = vmatprep.subr.bf16.mxu1 %v4465_v0  ;;  %v4753_v0 = vcombine.high %v796_v59, %v812_v60  ;;  %v700_v28 = vld [vmem:[#allocation11 + $0xa48] sm:$0xff]  ;;  %v622_v50 = vld [vmem:[#allocation11 + $0x7d8] sm:$0xff] }
 0x2c3   :  { %v716_v29 = vld [vmem:[#allocation11 + $0xac8] sm:$0xff] }
 0x2c4   :  { %3946 = vmatpush1.bf16.msra.mxu0 %v4462_v5  ;;  %v4750_v5 = vcombine.low %v795_v57, %v811_v58  ;;  %v668_v36 = vld [vmem:[#allocation11 + $0x948] sm:$0xff]  ;;  %v4563_v57 = vcombine.high %v605_v47, %v621_v48  ;;  %v4565_v58 = vcombine.high %v606_v49, %v622_v50 }
 0x2c5   :  { %3987 = vmatpush1.bf16.msra.mxu1 %v4464_v6  ;;  %3947 = vmatprep.subr.bf16.mxu0 %v4431_v7  ;;  %v4752_v6 = vcombine.low %v796_v59, %v812_v60  ;;  %v4719_v7 = vcombine.high %v763_v1, %v779_v2  ;;  %v684_v37 = vld [vmem:[#allocation11 + $0x9c8] sm:$0xff]  ;;  %v5155_v59 = vsub.s32 5, %v5095_v15  ;;  %v5158_v60 = vsub.s32 7, %v5095_v15 }
 0x2c6   :  { %3988 = vmatprep.subr.bf16.mxu1 %v4433_v8  ;;  %v4721_v8 = vcombine.high %v764_v3, %v780_v4  ;;  %v636_v44 = vld [vmem:[#allocation11 + $0x848] sm:$0xff] }
 0x2c7   :  { %v652_v45 = vld [vmem:[#allocation11 + $0x8c8] sm:$0xff] }
 0x2c8   :  { %3948 = vmatpush1.bf16.msra.mxu0 %v4430_v13  ;;  %v4718_v13 = vcombine.low %v763_v1, %v779_v2  ;;  %v4562_v1 = vcombine.low %v605_v47, %v621_v48  ;;  %v574_v2 = vld [vmem:[#allocation11 + $0x658] sm:$0xff] }
 0x2c9   :  { %3989 = vmatpush1.bf16.msra.mxu1 %v4432_v17  ;;  %3949 = vmatprep.subr.bf16.mxu0 %v4399_v19  ;;  %v4720_v17 = vcombine.low %v764_v3, %v780_v4  ;;  %v4687_v19 = vcombine.high %v731_v9, %v747_v10  ;;  %v590_v3 = vld [vmem:[#allocation11 + $0x6d8] sm:$0xff]  ;;  %v4564_v4 = vcombine.low %v606_v49, %v622_v50  ;;  %v445_v49 = vld [vmem:[#allocation11 + $0x250] sm:$0xff] }
 0x2ca   :  { %3990 = vmatprep.subr.bf16.mxu1 %v4401_v22  ;;  %v4689_v22 = vcombine.high %v732_v11, %v748_v12  ;;  %v461_v50 = vld [vmem:[#allocation11 + $0x2d0] sm:$0xff] }
 0x2cc   :  { %3950 = vmatpush1.bf16.msra.mxu0 %v4398_v30  ;;  %v4686_v30 = vcombine.low %v731_v9, %v747_v10 }
 0x2cd   :  { %3991 = vmatpush1.bf16.msra.mxu1 %v4400_v31  ;;  %3951 = vmatprep.subr.bf16.mxu0 %v4367_v32  ;;  %v4688_v31 = vcombine.low %v732_v11, %v748_v12  ;;  %v4655_v32 = vcombine.high %v699_v25, %v715_v27  ;;  %v4533_v11 = vcombine.high %v574_v2, %v590_v3  ;;  %v542_v12 = vld [vmem:[#allocation11 + $0x558] sm:$0xff] }
 0x2ce   :  { %3992 = vmatprep.subr.bf16.mxu1 %v4369_v33  ;;  %v4657_v33 = vcombine.high %v700_v28, %v716_v29 }
 0x2d0   :  { %3952 = vmatpush1.bf16.msra.mxu0 %v4366_v38  ;;  %v4654_v38 = vcombine.low %v699_v25, %v715_v27  ;;  %v4532_v27 = vcombine.low %v574_v2, %v590_v3  ;;  %v430_v2 = vld [vmem:[#allocation11 + $0x1d8] sm:$0xff]  ;;  %v4402_v3 = vcombine.low %v445_v49, %v461_v50 }
 0x2d1   :  { %3993 = vmatpush1.bf16.msra.mxu1 %v4368_v39  ;;  %3953 = vmatprep.subr.bf16.mxu0 %v4335_v40  ;;  %v4656_v39 = vcombine.low %v700_v28, %v716_v29  ;;  %v4623_v40 = vcombine.high %v667_v34, %v683_v35 }
 0x2d2   :  { %3994 = vmatprep.subr.bf16.mxu1 %v4337_v41  ;;  %v4625_v41 = vcombine.high %v668_v36, %v684_v37 }
 0x2d4   :  { %3954 = vmatpush1.bf16.msra.mxu0 %v4334_v46  ;;  %v4622_v46 = vcombine.low %v667_v34, %v683_v35 }
 0x2d5   :  { %3995 = vmatpush1.bf16.msra.mxu1 %v4336_v20  ;;  %3955 = vmatprep.subr.bf16.mxu0 %v4815_v23  ;;  %v4624_v20 = vcombine.low %v668_v36, %v684_v37  ;;  %v4591_v23 = vcombine.high %v635_v42, %v651_v43  ;;  %v510_v36 = vld [vmem:[#allocation11 + $0x458] sm:$0xff] }
 0x2d6   :  { %3996 = vmatprep.subr.bf16.mxu1 %v4817_v26  ;;  %v4593_v26 = vcombine.high %v636_v44, %v652_v45  ;;  %v526_v37 = vld [vmem:[#allocation11 + $0x4d8] sm:$0xff] }
 0x2d8   :  { %3956 = vmatpush2.bf16.msra.mxu0 %v4814_v51  ;;  %v4590_v51 = vcombine.low %v635_v42, %v651_v43  ;;  %v4469_v43 = vcombine.high %v510_v36, %v526_v37 }
 0x2d9   :  { %3997 = vmatpush2.bf16.msra.mxu1 %v4816_v52  ;;  %3957 = vmatprep.subr.bf16.mxu0 %v4783_v53  ;;  %v5149_v52 = vsub.s32 4, %v5095_v15  ;;  %v5152_v53 = vsub.s32 6, %v5095_v15  ;;  %v914_v15 = vrot.slane %v5131_v21, %v5155_v59 }
 0x2da   :  { %3998 = vmatprep.subr.bf16.mxu1 %v4785_v54  ;;  %v4592_v54 = vcombine.low %v636_v44, %v652_v45  ;;  %v477_v44 = vld [vmem:[#allocation11 + $0x350] sm:$0xff] }
 0x2db   :  { %v493_v45 = vld [vmem:[#allocation11 + $0x3d0] sm:$0xff] }
 0x2dc   :  { %3958 = vmatpush2.bf16.msra.mxu0 %v4782_v61  ;;  %v573_v61 = vld [vmem:[#allocation11 + $0x650] sm:$0xff]  ;;  %v4435_v47 = vcombine.high %v477_v44, %v493_v45 }
 0x2dd   :  { %3999 = vmatpush2.bf16.msra.mxu1 %v4784_v62  ;;  %3959 = vmatprep.subr.bf16.mxu0 %v4751_v63  ;;  %v589_v62 = vld [vmem:[#allocation11 + $0x6d0] sm:$0xff]  ;;  %v910_v63 = vrot.slane %v5131_v21, %v5149_v52 }
 0x2de   :  { %4000 = vmatprep.subr.bf16.mxu1 %v4753_v0  ;;  %v918_v0 = vrot.slane %v5131_v21, %v5152_v53 }
 0x2e0   :  { %3960 = vmatpush2.bf16.msra.mxu0 %v4750_v5  ;;  %v922_v5 = vrot.slane %v5131_v21, %v5158_v60 }
 0x2e1   :  { %4001 = vmatpush2.bf16.msra.mxu1 %v4752_v6  ;;  %3961 = vmatprep.subr.bf16.mxu0 %v4719_v7  ;;  %v4531_v6 = vcombine.high %v573_v61, %v589_v62  ;;  %v541_v7 = vld [vmem:[#allocation11 + $0x550] sm:$0xff] }
 0x2e2   :  { %4002 = vmatprep.subr.bf16.mxu1 %v4721_v8  ;;  %v557_v8 = vld [vmem:[#allocation11 + $0x5d0] sm:$0xff] }
 0x2e3   :  { %v4499_v28 = vcombine.high %v541_v7, %v557_v8 }
 0x2e4   :  { %3962 = vmatpush2.bf16.msra.mxu0 %v4718_v13  ;;  %v558_v13 = vld [vmem:[#allocation11 + $0x5d8] sm:$0xff] }
 0x2e5   :  { %4003 = vmatpush2.bf16.msra.mxu1 %v4720_v17  ;;  %3963 = vmatprep.subr.bf16.mxu0 %v4687_v19 }
 0x2e6   :  { %4004 = vmatprep.subr.bf16.mxu1 %v4689_v22  ;;  %v4530_v22 = vcombine.low %v573_v61, %v589_v62  ;;  %v4403_v61 = vcombine.high %v445_v49, %v461_v50 }
 0x2e8   :  { %3964 = vmatpush2.bf16.msra.mxu0 %v4686_v30 }
 0x2e9   :  { %4005 = vmatpush2.bf16.msra.mxu1 %v4688_v31  ;;  %3965 = vmatprep.subr.bf16.mxu0 %v4655_v32  ;;  %v4501_v31 = vcombine.high %v542_v12, %v558_v13  ;;  %v509_v32 = vld [vmem:[#allocation11 + $0x450] sm:$0xff] }
 0x2ea   :  { %4006 = vmatprep.subr.bf16.mxu1 %v4657_v33  ;;  %v525_v33 = vld [vmem:[#allocation11 + $0x4d0] sm:$0xff] }
 0x2eb   :  { %v4467_v42 = vcombine.high %v509_v32, %v525_v33 }
 0x2ec   :  { %3966 = vmatpush2.bf16.msra.mxu0 %v4654_v38  ;;  %v4498_v38 = vcombine.low %v541_v7, %v557_v8  ;;  %v397_v7 = vld [vmem:[#allocation11 + $0xd0] sm:$0xff]  ;;  %v382_v8 = vld [vmem:[#allocation11 + $0x58] sm:$0xff] }
 0x2ed   :  { %4007 = vmatpush2.bf16.msra.mxu1 %v4656_v39  ;;  %3967 = vmatprep.subr.bf16.mxu0 %v4623_v40 }
 0x2ee   :  { %4008 = vmatprep.subr.bf16.mxu1 %v4625_v41  ;;  %v4500_v41 = vcombine.low %v542_v12, %v558_v13 }
 0x2f0   :  { %3968 = vmatpush2.bf16.msra.mxu0 %v4622_v46  ;;  %v478_v46 = vld [vmem:[#allocation11 + $0x358] sm:$0xff] }
 0x2f1   :  { %4009 = vmatpush2.bf16.msra.mxu1 %v4624_v20  ;;  %3969 = vmatprep.subr.bf16.mxu0 %v4591_v23  ;;  %v494_v20 = vld [vmem:[#allocation11 + $0x3d8] sm:$0xff]  ;;  %v4466_v23 = vcombine.low %v509_v32, %v525_v33 }
 0x2f2   :  { %4010 = vmatprep.subr.bf16.mxu1 %v4593_v26  ;;  %v4468_v26 = vcombine.low %v510_v36, %v526_v37  ;;  %v4437_v48 = vcombine.high %v478_v46, %v494_v20  ;;  %v830_v32 = vld [vmem:[#allocation11 + $0xe58] sm:$0xff] }
 0x2f3   :  { %v846_v33 = vld [vmem:[#allocation11 + $0xed8] sm:$0xff] }
 0x2f4   :  { %3970 = vmatpush2.bf16.msra.mxu0 %v4590_v51  ;;  %v446_v51 = vld [vmem:[#allocation11 + $0x258] sm:$0xff]  ;;  %v4789_v37 = vcombine.high %v830_v32, %v846_v33 }
 0x2f5   :  { %4011 = vmatpush2.bf16.msra.mxu1 %v4592_v54  ;;  %4021 = vmatprep.subr.bf16.mxu0 %v4563_v57  ;;  %v462_v54 = vld [vmem:[#allocation11 + $0x2d8] sm:$0xff]  ;;  %v4434_v57 = vcombine.low %v477_v44, %v493_v45 }
 0x2f6   :  { %4062 = vmatprep.subr.bf16.mxu1 %v4565_v58  ;;  %v4436_v58 = vcombine.low %v478_v46, %v494_v20  ;;  %v4405_v62 = vcombine.high %v446_v51, %v462_v54  ;;  %v765_v46 = vld [vmem:[#allocation11 + $0xc50] sm:$0xff] }
 0x2f7   :  { %v3727_v9 = vpop.f32.mrf.mxu0  ;;  %v3768_v10 = vpop.f32.mrf.mxu1  ;;  %3972 = vmatmul.mubr.bf16.vlgmr.msra.gmra.mxu0 %v5112_v56  ;;  %v781_v20 = vld [vmem:[#allocation11 + $0xcd0] sm:$0xff] }
 0x2f8   :  { %v3728_v17 = vadd.f32 %v3727_v9, %v910_v63  ;;  %v3769_v19 = vadd.f32 %v3768_v10, %v918_v0  ;;  %4013 = vmatmul.mubr.bf16.vlgmr.msra.gmra.mxu1 %v5112_v56  ;;  %4022 = vmatpush1.bf16.msra.mxu0 %v4562_v1  ;;  %v413_v63 = vld [vmem:[#allocation11 + $0x150] sm:$0xff]  ;;  %v414_v1 = vld [vmem:[#allocation11 + $0x158] sm:$0xff]  ;;  %v4723_v49 = vcombine.high %v765_v46, %v781_v20 }
 0x2f9   :  { %4053 = vmatprep.mubr.bf16.mxu0 %v5110_v55  ;;  %4063 = vmatpush1.bf16.msra.mxu1 %v4564_v4  ;;  %v3729_v21 = vpop.f32.mrf.mxu0  ;;  %v3770_v25 = vpop.f32.mrf.mxu1  ;;  %v429_v0 = vld [vmem:[#allocation11 + $0x1d0] sm:$0xff]  ;;  %v4404_v4 = vcombine.low %v446_v51, %v462_v54  ;;  %v398_v9 = vld [vmem:[#allocation11 + $0xd8] sm:$0xff] }
 0x2fa   :  { %4271 = vst [vmem:[#allocation14 + $0x20] sm:$0xff] %v3728_v17  ;;  %4273 = vst [vmem:[#allocation14 + $0x30] sm:$0xff] %v3769_v19  ;;  %4094 = vmatprep.mubr.bf16.mxu1 %v5110_v55  ;;  %v3730_v29 = vadd.f32 %v3729_v21, %v914_v15  ;;  %v3771_v30 = vadd.f32 %v3770_v25, %v922_v5  ;;  %4023 = vmatprep.subr.bf16.mxu0 %v4531_v6  ;;  %v381_v6 = vld [vmem:[#allocation11 + $0x50] sm:$0xff]  ;;  %v878_v21 = vld [vmem:[#allocation11 + $0xfd8] sm:$0xff] }
 0x2fb   :  { %v3731_v34 = vpop.f32.mrf.mxu0  ;;  %v3772_v35 = vpop.f32.mrf.mxu1  ;;  %4064 = vmatprep.subr.bf16.mxu1 %v4533_v11  ;;  %v4371_v15 = vcombine.high %v413_v63, %v429_v0  ;;  %v4373_v5 = vcombine.high %v414_v1, %v430_v2  ;;  %v4370_v10 = vcombine.low %v413_v63, %v429_v0  ;;  %v4372_v11 = vcombine.low %v414_v1, %v430_v2  ;;  %v861_v17 = vld [vmem:[#allocation11 + $0xf50] sm:$0xff] }
 0x2fc   :  { %4272 = vst [vmem:[#allocation14 + $0x28] sm:$0xff] %v3730_v29  ;;  %4274 = vst [vmem:[#allocation14 + $0x38] sm:$0xff] %v3771_v30  ;;  %4024 = vmatpush1.bf16.msra.mxu0 %v4530_v22  ;;  %v4339_v12 = vcombine.high %v381_v6, %v397_v7  ;;  %v4341_v13 = vcombine.high %v382_v8, %v398_v9  ;;  %v877_v19 = vld [vmem:[#allocation11 + $0xfd0] sm:$0xff]  ;;  %v862_v22 = vld [vmem:[#allocation11 + $0xf58] sm:$0xff]  ;;  %v4338_v25 = vcombine.low %v381_v6, %v397_v7 }
 0x2fd   :  { %4065 = vmatpush1.bf16.msra.mxu1 %v4532_v27  ;;  %v3732_v39 = vpop.f32.mrf.mxu0  ;;  %v3773_v40 = vpop.f32.mrf.mxu1  ;;  %4025 = vmatprep.subr.bf16.mxu0 %v4499_v28  ;;  %v4340_v27 = vcombine.low %v382_v8, %v398_v9  ;;  %v4819_v28 = vcombine.high %v861_v17, %v877_v19  ;;  %v4821_v29 = vcombine.high %v862_v22, %v878_v21  ;;  %v829_v30 = vld [vmem:[#allocation11 + $0xe50] sm:$0xff] }
 0x2fe   :  { %4066 = vmatprep.subr.bf16.mxu1 %v4501_v31  ;;  %v845_v31 = vld [vmem:[#allocation11 + $0xed0] sm:$0xff]  ;;  %v4818_v34 = vcombine.low %v861_v17, %v877_v19  ;;  %v4820_v35 = vcombine.low %v862_v22, %v878_v21  ;;  %v798_v40 = vld [vmem:[#allocation11 + $0xd58] sm:$0xff] }
 0x2ff   :  { %v4787_v36 = vcombine.high %v829_v30, %v845_v31  ;;  %v813_v39 = vld [vmem:[#allocation11 + $0xdd0] sm:$0xff] }
 0x300   :  { %4026 = vmatpush1.bf16.msra.mxu0 %v4498_v38  ;;  %v797_v38 = vld [vmem:[#allocation11 + $0xd50] sm:$0xff] }
 0x301   :  { %4067 = vmatpush1.bf16.msra.mxu1 %v4500_v41  ;;  %4027 = vmatprep.subr.bf16.mxu0 %v4467_v42  ;;  %v814_v41 = vld [vmem:[#allocation11 + $0xdd8] sm:$0xff]  ;;  %v4786_v42 = vcombine.low %v829_v30, %v845_v31  ;;  %v4755_v44 = vcombine.high %v797_v38, %v813_v39  ;;  %v733_v51 = vld [vmem:[#allocation11 + $0xb50] sm:$0xff] }
 0x302   :  { %4068 = vmatprep.subr.bf16.mxu1 %v4469_v43  ;;  %v4788_v43 = vcombine.low %v830_v32, %v846_v33  ;;  %v4757_v45 = vcombine.high %v798_v40, %v814_v41  ;;  %v749_v54 = vld [vmem:[#allocation11 + $0xbd0] sm:$0xff]  ;;  %v607_v32 = vld [vmem:[#allocation11 + $0x760] sm:$0xff] }
 0x303   :  { %v4691_v63 = vcombine.high %v733_v51, %v749_v54  ;;  %v701_v1 = vld [vmem:[#allocation11 + $0xa50] sm:$0xff]  ;;  %v623_v33 = vld [vmem:[#allocation11 + $0x7e0] sm:$0xff] }
 0x304   :  { %4028 = vmatpush1.bf16.msra.mxu0 %v4466_v23  ;;  %v766_v23 = vld [vmem:[#allocation11 + $0xc58] sm:$0xff]  ;;  %v717_v2 = vld [vmem:[#allocation11 + $0xad0] sm:$0xff] }
 0x305   :  { %4069 = vmatpush1.bf16.msra.mxu1 %v4468_v26  ;;  %4029 = vmatprep.subr.bf16.mxu0 %v4435_v47  ;;  %v782_v26 = vld [vmem:[#allocation11 + $0xcd8] sm:$0xff]  ;;  %v4754_v47 = vcombine.low %v797_v38, %v813_v39  ;;  %v4659_v6 = vcombine.high %v701_v1, %v717_v2  ;;  %v669_v8 = vld [vmem:[#allocation11 + $0x950] sm:$0xff]  ;;  %v5172_v38 = vld [vmem:[#allocation13 + $0x8] sm:$0xff]  ;;  %v4567_v39 = vcombine.high %v607_v32, %v623_v33 }
 0x306   :  { %4070 = vmatprep.subr.bf16.mxu1 %v4437_v48  ;;  %v4756_v48 = vcombine.low %v798_v40, %v814_v41  ;;  %v4725_v50 = vcombine.high %v766_v23, %v782_v26  ;;  %v685_v9 = vld [vmem:[#allocation11 + $0x9d0] sm:$0xff]  ;;  %v575_v41 = vld [vmem:[#allocation11 + $0x660] sm:$0xff] }
 0x307   :  { %v4627_v17 = vcombine.high %v669_v8, %v685_v9  ;;  %v637_v22 = vld [vmem:[#allocation11 + $0x850] sm:$0xff] }
 0x308   :  { %4030 = vmatpush1.bf16.msra.mxu0 %v4434_v57  ;;  %v734_v57 = vld [vmem:[#allocation11 + $0xb58] sm:$0xff]  ;;  %v653_v21 = vld [vmem:[#allocation11 + $0x8d0] sm:$0xff] }
 0x309   :  { %4071 = vmatpush1.bf16.msra.mxu1 %v4436_v58  ;;  %4031 = vmatprep.subr.bf16.mxu0 %v4403_v61  ;;  %v750_v58 = vld [vmem:[#allocation11 + $0xbd8] sm:$0xff]  ;;  %v4722_v61 = vcombine.low %v765_v46, %v781_v20  ;;  %v4595_v30 = vcombine.high %v637_v22, %v653_v21  ;;  %v592_v46 = vld [vmem:[#allocation11 + $0x6e8] sm:$0xff]  ;;  %v934_v20 = vrot.slane %v5172_v38, %v5129_v14 }
 0x30a   :  { %4072 = vmatprep.subr.bf16.mxu1 %v4405_v62  ;;  %v4724_v62 = vcombine.low %v766_v23, %v782_v26  ;;  %v4693_v0 = vcombine.high %v734_v57, %v750_v58  ;;  %v930_v26 = vrot.slane %v5172_v38, %v5101_v18 }
 0x30c   :  { %4032 = vmatpush1.bf16.msra.mxu0 %v4402_v3  ;;  %v702_v3 = vld [vmem:[#allocation11 + $0xa58] sm:$0xff] }
 0x30d   :  { %4073 = vmatpush1.bf16.msra.mxu1 %v4404_v4  ;;  %4033 = vmatprep.subr.bf16.mxu0 %v4371_v15  ;;  %v718_v4 = vld [vmem:[#allocation11 + $0xad8] sm:$0xff]  ;;  %v4690_v15 = vcombine.low %v733_v51, %v749_v54  ;;  %v938_v51 = vrot.slane %v5172_v38, %v5134_v24 }
 0x30e   :  { %4074 = vmatprep.subr.bf16.mxu1 %v4373_v5  ;;  %v4692_v5 = vcombine.low %v734_v57, %v750_v58  ;;  %v4661_v7 = vcombine.high %v702_v3, %v718_v4  ;;  %v544_v57 = vld [vmem:[#allocation11 + $0x568] sm:$0xff] }
 0x30f   :  { %v560_v58 = vld [vmem:[#allocation11 + $0x5e8] sm:$0xff] }
 0x310   :  { %4034 = vmatpush1.bf16.msra.mxu0 %v4370_v10  ;;  %v670_v10 = vld [vmem:[#allocation11 + $0x958] sm:$0xff] }
 0x311   :  { %4075 = vmatpush1.bf16.msra.mxu1 %v4372_v11  ;;  %4035 = vmatprep.subr.bf16.mxu0 %v4339_v12  ;;  %v686_v11 = vld [vmem:[#allocation11 + $0x9d8] sm:$0xff]  ;;  %v4658_v12 = vcombine.low %v701_v1, %v717_v2 }
 0x312   :  { %4076 = vmatprep.subr.bf16.mxu1 %v4341_v13  ;;  %v4660_v13 = vcombine.low %v702_v3, %v718_v4  ;;  %v4629_v19 = vcombine.high %v670_v10, %v686_v11 }
 0x314   :  { %4036 = vmatpush1.bf16.msra.mxu0 %v4338_v25  ;;  %v638_v25 = vld [vmem:[#allocation11 + $0x858] sm:$0xff] }
 0x315   :  { %4077 = vmatpush1.bf16.msra.mxu1 %v4340_v27  ;;  %4037 = vmatprep.subr.bf16.mxu0 %v4819_v28  ;;  %v654_v27 = vld [vmem:[#allocation11 + $0x8d8] sm:$0xff]  ;;  %v4626_v28 = vcombine.low %v669_v8, %v685_v9 }
 0x316   :  { %4078 = vmatprep.subr.bf16.mxu1 %v4821_v29  ;;  %v4628_v29 = vcombine.low %v670_v10, %v686_v11  ;;  %v4597_v31 = vcombine.high %v638_v25, %v654_v27  ;;  %v512_v10 = vld [vmem:[#allocation11 + $0x468] sm:$0xff] }
 0x317   :  { %v528_v11 = vld [vmem:[#allocation11 + $0x4e8] sm:$0xff] }
 0x318   :  { %4038 = vmatpush2.bf16.msra.mxu0 %v4818_v34  ;;  %v608_v34 = vld [vmem:[#allocation11 + $0x768] sm:$0xff] }
 0x319   :  { %4079 = vmatpush2.bf16.msra.mxu1 %v4820_v35  ;;  %4039 = vmatprep.subr.bf16.mxu0 %v4787_v36  ;;  %v624_v35 = vld [vmem:[#allocation11 + $0x7e8] sm:$0xff]  ;;  %v4594_v36 = vcombine.low %v637_v22, %v653_v21 }
 0x31a   :  { %4080 = vmatprep.subr.bf16.mxu1 %v4789_v37  ;;  %v4596_v37 = vcombine.low %v638_v25, %v654_v27  ;;  %v4569_v40 = vcombine.high %v608_v34, %v624_v35  ;;  %v4568_v23 = vcombine.low %v608_v34, %v624_v35  ;;  %v4473_v25 = vcombine.high %v512_v10, %v528_v11  ;;  %v479_v27 = vld [vmem:[#allocation11 + $0x360] sm:$0xff] }
 0x31b   :  { %v447_v35 = vld [vmem:[#allocation11 + $0x260] sm:$0xff] }
 0x31c   :  { %4040 = vmatpush2.bf16.msra.mxu0 %v4786_v42  ;;  %v591_v42 = vld [vmem:[#allocation11 + $0x6e0] sm:$0xff] }
 0x31d   :  { %4081 = vmatpush2.bf16.msra.mxu1 %v4788_v43  ;;  %4041 = vmatprep.subr.bf16.mxu0 %v4755_v44  ;;  %v926_v43 = vrot.slane %v5172_v38, %v5098_v16  ;;  %v4566_v44 = vcombine.low %v607_v32, %v623_v33  ;;  %v4472_v32 = vcombine.low %v512_v10, %v528_v11 }
 0x31e   :  { %4082 = vmatprep.subr.bf16.mxu1 %v4757_v45  ;;  %v576_v45 = vld [vmem:[#allocation11 + $0x668] sm:$0xff] }
 0x31f   :  { %v4537_v54 = vcombine.high %v576_v45, %v592_v46  ;;  %v4536_v2 = vcombine.low %v576_v45, %v592_v46  ;;  %v431_v45 = vld [vmem:[#allocation11 + $0x1e0] sm:$0xff]  ;;  %v416_v46 = vld [vmem:[#allocation11 + $0x168] sm:$0xff] }
 0x320   :  { %4042 = vmatpush2.bf16.msra.mxu0 %v4754_v47  ;;  %v4535_v47 = vcombine.high %v575_v41, %v591_v42 }
 0x321   :  { %4083 = vmatpush2.bf16.msra.mxu1 %v4756_v48  ;;  %4043 = vmatprep.subr.bf16.mxu0 %v4723_v49  ;;  %v543_v48 = vld [vmem:[#allocation11 + $0x560] sm:$0xff] }
 0x322   :  { %4084 = vmatprep.subr.bf16.mxu1 %v4725_v50  ;;  %v559_v49 = vld [vmem:[#allocation11 + $0x5e0] sm:$0xff] }
 0x323   :  { %v4503_v3 = vcombine.high %v543_v48, %v559_v49 }
 0x324   :  { %4044 = vmatpush2.bf16.msra.mxu0 %v4722_v61 }
 0x325   :  { %4085 = vmatpush2.bf16.msra.mxu1 %v4724_v62  ;;  %4045 = vmatprep.subr.bf16.mxu0 %v4691_v63  ;;  %v4534_v63 = vcombine.low %v575_v41, %v591_v42 }
 0x326   :  { %4086 = vmatprep.subr.bf16.mxu1 %v4693_v0 }
 0x328   :  { %4046 = vmatpush2.bf16.msra.mxu0 %v4690_v15 }
 0x329   :  { %4087 = vmatpush2.bf16.msra.mxu1 %v4692_v5  ;;  %4047 = vmatprep.subr.bf16.mxu0 %v4659_v6  ;;  %v4505_v5 = vcombine.high %v544_v57, %v560_v58  ;;  %v511_v6 = vld [vmem:[#allocation11 + $0x460] sm:$0xff] }
 0x32a   :  { %4088 = vmatprep.subr.bf16.mxu1 %v4661_v7  ;;  %v527_v7 = vld [vmem:[#allocation11 + $0x4e0] sm:$0xff] }
 0x32b   :  { %v4471_v22 = vcombine.high %v511_v6, %v527_v7 }
 0x32c   :  { %4048 = vmatpush2.bf16.msra.mxu0 %v4658_v12 }
 0x32d   :  { %4089 = vmatpush2.bf16.msra.mxu1 %v4660_v13  ;;  %4049 = vmatprep.subr.bf16.mxu0 %v4627_v17  ;;  %v4502_v13 = vcombine.low %v543_v48, %v559_v49  ;;  %v383_v49 = vld [vmem:[#allocation11 + $0x60] sm:$0xff] }
 0x32e   :  { %4090 = vmatprep.subr.bf16.mxu1 %v4629_v19  ;;  %v4504_v19 = vcombine.low %v544_v57, %v560_v58 }
 0x330   :  { %4050 = vmatpush2.bf16.msra.mxu0 %v4626_v28  ;;  %v495_v28 = vld [vmem:[#allocation11 + $0x3e0] sm:$0xff] }
 0x331   :  { %4091 = vmatpush2.bf16.msra.mxu1 %v4628_v29  ;;  %4051 = vmatprep.subr.bf16.mxu0 %v4595_v30  ;;  %v480_v29 = vld [vmem:[#allocation11 + $0x368] sm:$0xff]  ;;  %v4439_v33 = vcombine.high %v479_v27, %v495_v28 }
 0x332   :  { %4092 = vmatprep.subr.bf16.mxu1 %v4597_v31  ;;  %v496_v30 = vld [vmem:[#allocation11 + $0x3e8] sm:$0xff]  ;;  %v4470_v31 = vcombine.low %v511_v6, %v527_v7  ;;  %v831_v6 = vld [vmem:[#allocation11 + $0xe60] sm:$0xff] }
 0x333   :  { %v4441_v34 = vcombine.high %v480_v29, %v496_v30  ;;  %v4440_v41 = vcombine.low %v480_v29, %v496_v30  ;;  %v847_v7 = vld [vmem:[#allocation11 + $0xee0] sm:$0xff] }
 0x334   :  { %4052 = vmatpush2.bf16.msra.mxu0 %v4594_v36  ;;  %v463_v36 = vld [vmem:[#allocation11 + $0x2e0] sm:$0xff] }
 0x335   :  { %4093 = vmatpush2.bf16.msra.mxu1 %v4596_v37  ;;  %4103 = vmatprep.subr.bf16.mxu0 %v4567_v39  ;;  %v448_v37 = vld [vmem:[#allocation11 + $0x268] sm:$0xff]  ;;  %v4407_v42 = vcombine.high %v447_v35, %v463_v36  ;;  %v767_v30 = vld [vmem:[#allocation11 + $0xc60] sm:$0xff] }
 0x336   :  { %4144 = vmatprep.subr.bf16.mxu1 %v4569_v40  ;;  %v464_v39 = vld [vmem:[#allocation11 + $0x2e8] sm:$0xff]  ;;  %v4438_v40 = vcombine.low %v479_v27, %v495_v28 }
 0x337   :  { %v3809_v50 = vpop.f32.mrf.mxu0  ;;  %4054 = vmatmul.mubr.bf16.vlgmr.msra.gmra.mxu0 %v5112_v56 }
 0x338   :  { %v3810_v61 = vadd.f32 %v3809_v50, %v926_v43  ;;  %v3850_v62 = vpop.f32.mrf.mxu1  ;;  %4095 = vmatmul.mubr.bf16.vlgmr.msra.gmra.mxu1 %v5112_v56  ;;  %4104 = vmatpush1.bf16.msra.mxu0 %v4566_v44  ;;  %v4409_v43 = vcombine.high %v448_v37, %v464_v39  ;;  %v415_v44 = vld [vmem:[#allocation11 + $0x160] sm:$0xff] }
 0x339   :  { %v3851_v0 = vadd.f32 %v3850_v62, %v934_v20  ;;  %4135 = vmatprep.mubr.bf16.mxu0 %v5110_v55  ;;  %4145 = vmatpush1.bf16.msra.mxu1 %v4568_v23  ;;  %v3811_v1 = vpop.f32.mrf.mxu0  ;;  %v432_v20 = vld [vmem:[#allocation11 + $0x1e8] sm:$0xff]  ;;  %v4406_v23 = vcombine.low %v447_v35, %v463_v36  ;;  %v399_v50 = vld [vmem:[#allocation11 + $0xe0] sm:$0xff]  ;;  %v4374_v57 = vcombine.low %v415_v44, %v431_v45 }
 0x33a   :  { %4275 = vst [vmem:[#allocation14 + $0x40] sm:$0xff] %v3810_v61  ;;  %4176 = vmatprep.mubr.bf16.mxu1 %v5110_v55  ;;  %v3812_v4 = vadd.f32 %v3811_v1, %v930_v26  ;;  %v3852_v15 = vpop.f32.mrf.mxu1  ;;  %4105 = vmatprep.subr.bf16.mxu0 %v4535_v47  ;;  %v4408_v26 = vcombine.low %v448_v37, %v464_v39  ;;  %v864_v1 = vld [vmem:[#allocation11 + $0xf68] sm:$0xff]  ;;  %v735_v39 = vld [vmem:[#allocation11 + $0xb60] sm:$0xff] }
 0x33b   :  { %4277 = vst [vmem:[#allocation14 + $0x50] sm:$0xff] %v3851_v0  ;;  %v3853_v8 = vadd.f32 %v3852_v15, %v938_v51  ;;  %v3813_v9 = vpop.f32.mrf.mxu0  ;;  %4146 = vmatprep.subr.bf16.mxu1 %v4537_v54  ;;  %v4375_v47 = vcombine.high %v415_v44, %v431_v45  ;;  %v4377_v48 = vcombine.high %v416_v46, %v432_v20  ;;  %v384_v51 = vld [vmem:[#allocation11 + $0x68] sm:$0xff]  ;;  %v879_v0 = vld [vmem:[#allocation11 + $0xfe0] sm:$0xff] }
 0x33c   :  { %4276 = vst [vmem:[#allocation14 + $0x48] sm:$0xff] %v3812_v4  ;;  %v3854_v12 = vpop.f32.mrf.mxu1  ;;  %4106 = vmatpush1.bf16.msra.mxu0 %v4534_v63  ;;  %v400_v54 = vld [vmem:[#allocation11 + $0xe8] sm:$0xff]  ;;  %v4376_v58 = vcombine.low %v416_v46, %v432_v20  ;;  %v4343_v61 = vcombine.high %v383_v49, %v399_v50  ;;  %v863_v63 = vld [vmem:[#allocation11 + $0xf60] sm:$0xff] }
 0x33d   :  { %4278 = vst [vmem:[#allocation14 + $0x58] sm:$0xff] %v3853_v8  ;;  %4147 = vmatpush1.bf16.msra.mxu1 %v4536_v2  ;;  %v3814_v17 = vpop.f32.mrf.mxu0  ;;  %4107 = vmatprep.subr.bf16.mxu0 %v4503_v3  ;;  %v4345_v62 = vcombine.high %v384_v51, %v400_v54  ;;  %v880_v2 = vld [vmem:[#allocation11 + $0xfe8] sm:$0xff]  ;;  %v4342_v3 = vcombine.low %v383_v49, %v399_v50  ;;  %v703_v20 = vld [vmem:[#allocation11 + $0xa60] sm:$0xff] }
 0x33e   :  { %v3855_v21 = vpop.f32.mrf.mxu1  ;;  %4148 = vmatprep.subr.bf16.mxu1 %v4505_v5  ;;  %v4344_v4 = vcombine.low %v384_v51, %v400_v54  ;;  %v4823_v15 = vcombine.high %v863_v63, %v879_v0  ;;  %v4825_v5 = vcombine.high %v864_v1, %v880_v2  ;;  %v832_v8 = vld [vmem:[#allocation11 + $0xe68] sm:$0xff]  ;;  %v4822_v10 = vcombine.low %v863_v63, %v879_v0  ;;  %v799_v17 = vld [vmem:[#allocation11 + $0xd60] sm:$0xff] }
 0x33f   :  { %v848_v9 = vld [vmem:[#allocation11 + $0xee8] sm:$0xff]  ;;  %v4824_v11 = vcombine.low %v864_v1, %v880_v2  ;;  %v4791_v12 = vcombine.high %v831_v6, %v847_v7  ;;  %v671_v54 = vld [vmem:[#allocation11 + $0x960] sm:$0xff] }
 0x340   :  { %4108 = vmatpush1.bf16.msra.mxu0 %v4502_v13  ;;  %v4793_v13 = vcombine.high %v832_v8, %v848_v9  ;;  %v816_v21 = vld [vmem:[#allocation11 + $0xde8] sm:$0xff]  ;;  %v4792_v27 = vcombine.low %v832_v8, %v848_v9  ;;  %v639_v2 = vld [vmem:[#allocation11 + $0x860] sm:$0xff]  ;;  %v609_v9 = vld [vmem:[#allocation11 + $0x770] sm:$0xff] }
 0x341   :  { %4149 = vmatpush1.bf16.msra.mxu1 %v4504_v19  ;;  %4109 = vmatprep.subr.bf16.mxu0 %v4471_v22  ;;  %v815_v19 = vld [vmem:[#allocation11 + $0xde0] sm:$0xff]  ;;  %v800_v22 = vld [vmem:[#allocation11 + $0xd68] sm:$0xff] }
 0x342   :  { %4150 = vmatprep.subr.bf16.mxu1 %v4473_v25  ;;  %v4790_v25 = vcombine.low %v831_v6, %v847_v7  ;;  %v4759_v28 = vcombine.high %v799_v17, %v815_v19  ;;  %v4761_v29 = vcombine.high %v800_v22, %v816_v21  ;;  %v4760_v35 = vcombine.low %v800_v22, %v816_v21  ;;  %v577_v21 = vld [vmem:[#allocation11 + $0x670] sm:$0xff] }
 0x344   :  { %4110 = vmatpush1.bf16.msra.mxu0 %v4470_v31  ;;  %v783_v31 = vld [vmem:[#allocation11 + $0xce0] sm:$0xff] }
 0x345   :  { %4151 = vmatpush1.bf16.msra.mxu1 %v4472_v32  ;;  %4111 = vmatprep.subr.bf16.mxu0 %v4439_v33  ;;  %v768_v32 = vld [vmem:[#allocation11 + $0xc68] sm:$0xff]  ;;  %v4727_v36 = vcombine.high %v767_v30, %v783_v31 }
 0x346   :  { %4152 = vmatprep.subr.bf16.mxu1 %v4441_v34  ;;  %v784_v33 = vld [vmem:[#allocation11 + $0xce8] sm:$0xff]  ;;  %v4758_v34 = vcombine.low %v799_v17, %v815_v19 }
 0x347   :  { %v4729_v37 = vcombine.high %v768_v32, %v784_v33  ;;  %v4728_v44 = vcombine.low %v768_v32, %v784_v33  ;;  %v946_v33 = vrot.slane %v5172_v38, %v5155_v59 }
 0x348   :  { %4112 = vmatpush1.bf16.msra.mxu0 %v4438_v40  ;;  %v751_v40 = vld [vmem:[#allocation11 + $0xbe0] sm:$0xff] }
 0x349   :  { %4153 = vmatpush1.bf16.msra.mxu1 %v4440_v41  ;;  %4113 = vmatprep.subr.bf16.mxu0 %v4407_v42  ;;  %v736_v41 = vld [vmem:[#allocation11 + $0xb68] sm:$0xff]  ;;  %v4695_v45 = vcombine.high %v735_v39, %v751_v40 }
 0x34a   :  { %4154 = vmatprep.subr.bf16.mxu1 %v4409_v43  ;;  %v752_v42 = vld [vmem:[#allocation11 + $0xbe8] sm:$0xff]  ;;  %v4726_v43 = vcombine.low %v767_v30, %v783_v31  ;;  %v594_v30 = vld [vmem:[#allocation11 + $0x6f8] sm:$0xff]  ;;  %v950_v31 = vrot.slane %v5172_v38, %v5152_v53 }
 0x34b   :  { %v4697_v46 = vcombine.high %v736_v41, %v752_v42  ;;  %v4696_v49 = vcombine.low %v736_v41, %v752_v42  ;;  %v546_v41 = vld [vmem:[#allocation11 + $0x578] sm:$0xff] }
 0x34c   :  { %4114 = vmatpush1.bf16.msra.mxu0 %v4406_v23  ;;  %v719_v23 = vld [vmem:[#allocation11 + $0xae0] sm:$0xff]  ;;  %v562_v42 = vld [vmem:[#allocation11 + $0x5f8] sm:$0xff] }
 0x34d   :  { %4155 = vmatpush1.bf16.msra.mxu1 %v4408_v26  ;;  %4115 = vmatprep.subr.bf16.mxu0 %v4375_v47  ;;  %v704_v26 = vld [vmem:[#allocation11 + $0xa68] sm:$0xff]  ;;  %v4663_v50 = vcombine.high %v703_v20, %v719_v23 }
 0x34e   :  { %4156 = vmatprep.subr.bf16.mxu1 %v4377_v48  ;;  %v720_v47 = vld [vmem:[#allocation11 + $0xae8] sm:$0xff]  ;;  %v4694_v48 = vcombine.low %v735_v39, %v751_v40  ;;  %v954_v39 = vrot.slane %v5172_v38, %v5158_v60 }
 0x34f   :  { %v4665_v51 = vcombine.high %v704_v26, %v720_v47  ;;  %v4664_v63 = vcombine.low %v704_v26, %v720_v47 }
 0x350   :  { %4116 = vmatpush1.bf16.msra.mxu0 %v4374_v57  ;;  %v687_v57 = vld [vmem:[#allocation11 + $0x9e0] sm:$0xff] }
 0x351   :  { %4157 = vmatpush1.bf16.msra.mxu1 %v4376_v58  ;;  %4117 = vmatprep.subr.bf16.mxu0 %v4343_v61  ;;  %v672_v58 = vld [vmem:[#allocation11 + $0x968] sm:$0xff]  ;;  %v4631_v0 = vcombine.high %v671_v54, %v687_v57 }
 0x352   :  { %4158 = vmatprep.subr.bf16.mxu1 %v4345_v62  ;;  %v688_v61 = vld [vmem:[#allocation11 + $0x9e8] sm:$0xff]  ;;  %v4662_v62 = vcombine.low %v703_v20, %v719_v23 }
 0x353   :  { %v4633_v1 = vcombine.high %v672_v58, %v688_v61  ;;  %v4632_v6 = vcombine.low %v672_v58, %v688_v61  ;;  %v530_v58 = vld [vmem:[#allocation11 + $0x4f8] sm:$0xff] }
 0x354   :  { %4118 = vmatpush1.bf16.msra.mxu0 %v4342_v3  ;;  %v655_v3 = vld [vmem:[#allocation11 + $0x8e0] sm:$0xff] }
 0x355   :  { %4159 = vmatpush1.bf16.msra.mxu1 %v4344_v4  ;;  %4119 = vmatprep.subr.bf16.mxu0 %v4823_v15  ;;  %v640_v4 = vld [vmem:[#allocation11 + $0x868] sm:$0xff]  ;;  %v4599_v7 = vcombine.high %v639_v2, %v655_v3 }
 0x356   :  { %4160 = vmatprep.subr.bf16.mxu1 %v4825_v5  ;;  %v656_v15 = vld [vmem:[#allocation11 + $0x8e8] sm:$0xff]  ;;  %v4630_v5 = vcombine.low %v671_v54, %v687_v57  ;;  %v514_v57 = vld [vmem:[#allocation11 + $0x478] sm:$0xff] }
 0x357   :  { %v4601_v8 = vcombine.high %v640_v4, %v656_v15  ;;  %v4600_v17 = vcombine.low %v640_v4, %v656_v15  ;;  %v497_v4 = vld [vmem:[#allocation11 + $0x3f0] sm:$0xff]  ;;  %v482_v15 = vld [vmem:[#allocation11 + $0x378] sm:$0xff] }
 0x358   :  { %4120 = vmatpush2.bf16.msra.mxu0 %v4822_v10  ;;  %v625_v10 = vld [vmem:[#allocation11 + $0x7f0] sm:$0xff] }
 0x359   :  { %4161 = vmatpush2.bf16.msra.mxu1 %v4824_v11  ;;  %4121 = vmatprep.subr.bf16.mxu0 %v4791_v12  ;;  %v610_v11 = vld [vmem:[#allocation11 + $0x778] sm:$0xff]  ;;  %v4571_v19 = vcombine.high %v609_v9, %v625_v10 }
 0x35a   :  { %4162 = vmatprep.subr.bf16.mxu1 %v4793_v13  ;;  %v626_v12 = vld [vmem:[#allocation11 + $0x7f8] sm:$0xff]  ;;  %v4598_v13 = vcombine.low %v639_v2, %v655_v3  ;;  %v4477_v2 = vcombine.high %v514_v57, %v530_v58  ;;  %v481_v3 = vld [vmem:[#allocation11 + $0x370] sm:$0xff] }
 0x35b   :  { %v4573_v22 = vcombine.high %v610_v11, %v626_v12  ;;  %v4572_v32 = vcombine.low %v610_v11, %v626_v12  ;;  %v465_v11 = vld [vmem:[#allocation11 + $0x2f0] sm:$0xff]  ;;  %v450_v12 = vld [vmem:[#allocation11 + $0x278] sm:$0xff] }
 0x35c   :  { %4122 = vmatpush2.bf16.msra.mxu0 %v4790_v25  ;;  %v593_v25 = vld [vmem:[#allocation11 + $0x6f0] sm:$0xff] }
 0x35d   :  { %4163 = vmatpush2.bf16.msra.mxu1 %v4792_v27  ;;  %4123 = vmatprep.subr.bf16.mxu0 %v4759_v28  ;;  %v942_v27 = vrot.slane %v5172_v38, %v5149_v52  ;;  %v4570_v28 = vcombine.low %v609_v9, %v625_v10  ;;  %v449_v10 = vld [vmem:[#allocation11 + $0x270] sm:$0xff] }
 0x35e   :  { %4164 = vmatprep.subr.bf16.mxu1 %v4761_v29  ;;  %v578_v29 = vld [vmem:[#allocation11 + $0x678] sm:$0xff] }
 0x35f   :  { %v4541_v40 = vcombine.high %v578_v29, %v594_v30  ;;  %v4540_v23 = vcombine.low %v578_v29, %v594_v30  ;;  %v434_v29 = vld [vmem:[#allocation11 + $0x1f8] sm:$0xff]  ;;  %v4410_v30 = vcombine.low %v449_v10, %v465_v11 }
 0x360   :  { %4124 = vmatpush2.bf16.msra.mxu0 %v4758_v34  ;;  %v4539_v34 = vcombine.high %v577_v21, %v593_v25 }
 0x361   :  { %4165 = vmatpush2.bf16.msra.mxu1 %v4760_v35  ;;  %4125 = vmatprep.subr.bf16.mxu0 %v4727_v36  ;;  %v545_v35 = vld [vmem:[#allocation11 + $0x570] sm:$0xff] }
 0x362   :  { %4166 = vmatprep.subr.bf16.mxu1 %v4729_v37  ;;  %v561_v36 = vld [vmem:[#allocation11 + $0x5f0] sm:$0xff] }
 0x363   :  { %v4507_v26 = vcombine.high %v545_v35, %v561_v36 }
 0x364   :  { %4126 = vmatpush2.bf16.msra.mxu0 %v4726_v43 }
 0x365   :  { %4167 = vmatpush2.bf16.msra.mxu1 %v4728_v44  ;;  %4127 = vmatprep.subr.bf16.mxu0 %v4695_v45  ;;  %v4538_v45 = vcombine.low %v577_v21, %v593_v25  ;;  %v417_v25 = vld [vmem:[#allocation11 + $0x170] sm:$0xff] }
 0x366   :  { %4168 = vmatprep.subr.bf16.mxu1 %v4697_v46 }
 0x368   :  { %4128 = vmatpush2.bf16.msra.mxu0 %v4694_v48  ;;  %v4509_v48 = vcombine.high %v546_v41, %v562_v42 }
 0x369   :  { %4169 = vmatpush2.bf16.msra.mxu1 %v4696_v49  ;;  %4129 = vmatprep.subr.bf16.mxu0 %v4663_v50  ;;  %v513_v49 = vld [vmem:[#allocation11 + $0x470] sm:$0xff] }
 0x36a   :  { %4170 = vmatprep.subr.bf16.mxu1 %v4665_v51  ;;  %v529_v50 = vld [vmem:[#allocation11 + $0x4f0] sm:$0xff] }
 0x36c   :  { %4130 = vmatpush2.bf16.msra.mxu0 %v4662_v62  ;;  %v4506_v62 = vcombine.low %v545_v35, %v561_v36  ;;  %v401_v35 = vld [vmem:[#allocation11 + $0xf0] sm:$0xff]  ;;  %v386_v36 = vld [vmem:[#allocation11 + $0x78] sm:$0xff] }
 0x36d   :  { %4171 = vmatpush2.bf16.msra.mxu1 %v4664_v63  ;;  %4131 = vmatprep.subr.bf16.mxu0 %v4631_v0  ;;  %v4475_v0 = vcombine.high %v513_v49, %v529_v50 }
 0x36e   :  { %4172 = vmatprep.subr.bf16.mxu1 %v4633_v1 }
 0x370   :  { %4132 = vmatpush2.bf16.msra.mxu0 %v4630_v5  ;;  %v498_v5 = vld [vmem:[#allocation11 + $0x3f8] sm:$0xff] }
 0x371   :  { %4173 = vmatpush2.bf16.msra.mxu1 %v4632_v6  ;;  %4133 = vmatprep.subr.bf16.mxu0 %v4599_v7  ;;  %v4474_v6 = vcombine.low %v513_v49, %v529_v50  ;;  %v4476_v7 = vcombine.low %v514_v57, %v530_v58  ;;  %v4445_v9 = vcombine.high %v482_v15, %v498_v5  ;;  %v834_v49 = vld [vmem:[#allocation11 + $0xe78] sm:$0xff] }
 0x372   :  { %4174 = vmatprep.subr.bf16.mxu1 %v4601_v8  ;;  %v4443_v8 = vcombine.high %v481_v3, %v497_v4  ;;  %v850_v50 = vld [vmem:[#allocation11 + $0xef8] sm:$0xff] }
 0x373   :  { %v4797_v58 = vcombine.high %v834_v49, %v850_v50 }
 0x374   :  { %4134 = vmatpush2.bf16.msra.mxu0 %v4598_v13  ;;  %v466_v13 = vld [vmem:[#allocation11 + $0x2f8] sm:$0xff] }
 0x375   :  { %4175 = vmatpush2.bf16.msra.mxu1 %v4600_v17  ;;  %4185 = vmatprep.subr.bf16.mxu0 %v4571_v19  ;;  %v4442_v17 = vcombine.low %v481_v3, %v497_v4  ;;  %v4444_v19 = vcombine.low %v482_v15, %v498_v5  ;;  %v4413_v21 = vcombine.high %v450_v12, %v466_v13  ;;  %v769_v4 = vld [vmem:[#allocation11 + $0xc70] sm:$0xff]  ;;  %v770_v5 = vld [vmem:[#allocation11 + $0xc78] sm:$0xff] }
 0x376   :  { %4226 = vmatprep.subr.bf16.mxu1 %v4573_v22  ;;  %v4411_v22 = vcombine.high %v449_v10, %v465_v11  ;;  %v785_v15 = vld [vmem:[#allocation11 + $0xcf0] sm:$0xff] }
 0x377   :  { %v3891_v37 = vpop.f32.mrf.mxu0  ;;  %4136 = vmatmul.mubr.bf16.vlgmr.msra.gmra.mxu0 %v5112_v56  ;;  %v737_v11 = vld [vmem:[#allocation11 + $0xb70] sm:$0xff] }
 0x378   :  { %v3892_v43 = vadd.f32 %v3891_v37, %v942_v27  ;;  %v3932_v44 = vpop.f32.mrf.mxu1  ;;  %4177 = vmatmul.mubr.bf16.vlgmr.msra.gmra.mxu1 %v5112_v56  ;;  %4186 = vmatpush1.bf16.msra.mxu0 %v4570_v28  ;;  %v433_v27 = vld [vmem:[#allocation11 + $0x1f0] sm:$0xff]  ;;  %v418_v28 = vld [vmem:[#allocation11 + $0x178] sm:$0xff] }
 0x379   :  { %v3933_v46 = vadd.f32 %v3932_v44, %v950_v31  ;;  %4217 = vmatprep.mubr.bf16.mxu0 %v5110_v55  ;;  %4227 = vmatpush1.bf16.msra.mxu1 %v4572_v32  ;;  %v3893_v20 = vpop.f32.mrf.mxu0  ;;  %v4412_v31 = vcombine.low %v450_v12, %v466_v13  ;;  %v4379_v32 = vcombine.high %v417_v25, %v433_v27  ;;  %v402_v37 = vld [vmem:[#allocation11 + $0xf8] sm:$0xff]  ;;  %v881_v44 = vld [vmem:[#allocation11 + $0xff0] sm:$0xff] }
 0x37a   :  { %4279 = vst [vmem:[#allocation14 + $0x60] sm:$0xff] %v3892_v43  ;;  %4258 = vmatprep.mubr.bf16.mxu1 %v5110_v55  ;;  %v3894_v38 = vadd.f32 %v3893_v20, %v946_v33  ;;  %v3934_v47 = vpop.f32.mrf.mxu1  ;;  %4187 = vmatprep.subr.bf16.mxu0 %v4539_v34  ;;  %v4508_v55 = vcombine.low %v546_v41, %v562_v42  ;;  %v385_v34 = vld [vmem:[#allocation11 + $0x70] sm:$0xff]  ;;  %v738_v13 = vld [vmem:[#allocation11 + $0xb78] sm:$0xff] }
 0x37b   :  { %4281 = vst [vmem:[#allocation14 + $0x70] sm:$0xff] %v3933_v46  ;;  %v3935_v51 = vadd.f32 %v3934_v47, %v954_v39  ;;  %v3895_v54 = vpop.f32.mrf.mxu0  ;;  %4228 = vmatprep.subr.bf16.mxu1 %v4541_v40  ;;  %v4381_v33 = vcombine.high %v418_v28, %v434_v29  ;;  %v4378_v39 = vcombine.low %v417_v25, %v433_v27  ;;  %v865_v43 = vld [vmem:[#allocation11 + $0xf70] sm:$0xff]  ;;  %v882_v46 = vld [vmem:[#allocation11 + $0xff8] sm:$0xff] }
 0x37c   :  { %4280 = vst [vmem:[#allocation14 + $0x68] sm:$0xff] %v3894_v38  ;;  %v3936_v61 = vpop.f32.mrf.mxu1  ;;  %4188 = vmatpush1.bf16.msra.mxu0 %v4538_v45  ;;  %v4380_v40 = vcombine.low %v418_v28, %v434_v29  ;;  %v4347_v41 = vcombine.high %v385_v34, %v401_v35  ;;  %v4349_v42 = vcombine.high %v386_v36, %v402_v37  ;;  %v866_v45 = vld [vmem:[#allocation11 + $0xf78] sm:$0xff]  ;;  %v833_v47 = vld [vmem:[#allocation11 + $0xe70] sm:$0xff] }
 0x37d   :  { %4282 = vst [vmem:[#allocation14 + $0x78] sm:$0xff] %v3935_v51  ;;  %4229 = vmatpush1.bf16.msra.mxu1 %v4540_v23  ;;  %v3896_v63 = vpop.f32.mrf.mxu0  ;;  %4189 = vmatprep.subr.bf16.mxu0 %v4507_v26  ;;  %v4346_v20 = vcombine.low %v385_v34, %v401_v35  ;;  %v4348_v23 = vcombine.low %v386_v36, %v402_v37  ;;  %v801_v61 = vld [vmem:[#allocation11 + $0xd70] sm:$0xff]  ;;  %v706_v29 = vld [vmem:[#allocation11 + $0xa78] sm:$0xff] }
 0x37e   :  { %v3937_v1 = vpop.f32.mrf.mxu1  ;;  %4230 = vmatprep.subr.bf16.mxu1 %v4509_v48  ;;  %v4827_v26 = vcombine.high %v865_v43, %v881_v44  ;;  %v4829_v38 = vcombine.high %v866_v45, %v882_v46  ;;  %v849_v48 = vld [vmem:[#allocation11 + $0xef0] sm:$0xff]  ;;  %v4826_v51 = vcombine.low %v865_v43, %v881_v44  ;;  %v4828_v54 = vcombine.low %v866_v45, %v882_v46  ;;  %v802_v63 = vld [vmem:[#allocation11 + $0xd78] sm:$0xff] }
 0x37f   :  { %v4795_v57 = vcombine.high %v833_v47, %v849_v48  ;;  %v4796_v1 = vcombine.low %v834_v49, %v850_v50  ;;  %v753_v12 = vld [vmem:[#allocation11 + $0xbf0] sm:$0xff]  ;;  %v674_v37 = vld [vmem:[#allocation11 + $0x978] sm:$0xff] }
 0x380   :  { %4190 = vmatpush1.bf16.msra.mxu0 %v4506_v62  ;;  %v817_v62 = vld [vmem:[#allocation11 + $0xdf0] sm:$0xff]  ;;  %v642_v46 = vld [vmem:[#allocation11 + $0x878] sm:$0xff] }
 0x381   :  { %4231 = vmatpush1.bf16.msra.mxu1 %v4508_v55  ;;  %4191 = vmatprep.subr.bf16.mxu0 %v4475_v0  ;;  %v818_v55 = vld [vmem:[#allocation11 + $0xdf8] sm:$0xff]  ;;  %v4794_v0 = vcombine.low %v833_v47, %v849_v48  ;;  %v705_v27 = vld [vmem:[#allocation11 + $0xa70] sm:$0xff] }
 0x382   :  { %4232 = vmatprep.subr.bf16.mxu1 %v4477_v2  ;;  %v4763_v2 = vcombine.high %v801_v61, %v817_v62  ;;  %v4765_v3 = vcombine.high %v802_v63, %v818_v55  ;;  %v721_v28 = vld [vmem:[#allocation11 + $0xaf0] sm:$0xff] }
 0x383   :  { %v673_v35 = vld [vmem:[#allocation11 + $0x970] sm:$0xff] }
 0x384   :  { %4192 = vmatpush1.bf16.msra.mxu0 %v4474_v6  ;;  %v786_v6 = vld [vmem:[#allocation11 + $0xcf8] sm:$0xff]  ;;  %v689_v36 = vld [vmem:[#allocation11 + $0x9f0] sm:$0xff] }
 0x385   :  { %4233 = vmatpush1.bf16.msra.mxu1 %v4476_v7  ;;  %4193 = vmatprep.subr.bf16.mxu0 %v4443_v8  ;;  %v4762_v7 = vcombine.low %v801_v61, %v817_v62  ;;  %v4764_v8 = vcombine.low %v802_v63, %v818_v55  ;;  %v4733_v10 = vcombine.high %v770_v5, %v786_v6  ;;  %v641_v44 = vld [vmem:[#allocation11 + $0x870] sm:$0xff] }
 0x386   :  { %4234 = vmatprep.subr.bf16.mxu1 %v4445_v9  ;;  %v4731_v9 = vcombine.high %v769_v4, %v785_v15  ;;  %v657_v45 = vld [vmem:[#allocation11 + $0x8f0] sm:$0xff] }
 0x387   :  { %v4602_v48 = vcombine.low %v641_v44, %v657_v45  ;;  %v885_v50 = vld [vmem:[#allocation13 + $0x10] sm:$0xff] }
 0x388   :  { %4194 = vmatpush1.bf16.msra.mxu0 %v4442_v17  ;;  %v754_v17 = vld [vmem:[#allocation11 + $0xbf8] sm:$0xff]  ;;  %v970_v61 = vrot.slane %v885_v50, %v5134_v24 }
 0x389   :  { %4235 = vmatpush1.bf16.msra.mxu1 %v4444_v19  ;;  %4195 = vmatprep.subr.bf16.mxu0 %v4411_v22  ;;  %v4730_v19 = vcombine.low %v769_v4, %v785_v15  ;;  %v4732_v22 = vcombine.low %v770_v5, %v786_v6  ;;  %v4701_v25 = vcombine.high %v738_v13, %v754_v17 }
 0x38a   :  { %4236 = vmatprep.subr.bf16.mxu1 %v4413_v21  ;;  %v4699_v21 = vcombine.high %v737_v11, %v753_v12 }
 0x38c   :  { %4196 = vmatpush1.bf16.msra.mxu0 %v4410_v30  ;;  %v722_v30 = vld [vmem:[#allocation11 + $0xaf8] sm:$0xff] }
 0x38d   :  { %4237 = vmatpush1.bf16.msra.mxu1 %v4412_v31  ;;  %4197 = vmatprep.subr.bf16.mxu0 %v4379_v32  ;;  %v4698_v31 = vcombine.low %v737_v11, %v753_v12  ;;  %v4700_v32 = vcombine.low %v738_v13, %v754_v17  ;;  %v4669_v34 = vcombine.high %v706_v29, %v722_v30 }
 0x38e   :  { %4238 = vmatprep.subr.bf16.mxu1 %v4381_v33  ;;  %v4667_v33 = vcombine.high %v705_v27, %v721_v28 }
 0x390   :  { %4198 = vmatpush1.bf16.msra.mxu0 %v4378_v39  ;;  %v690_v39 = vld [vmem:[#allocation11 + $0x9f8] sm:$0xff] }
 0x391   :  { %4239 = vmatpush1.bf16.msra.mxu1 %v4380_v40  ;;  %4199 = vmatprep.subr.bf16.mxu0 %v4347_v41  ;;  %v4666_v40 = vcombine.low %v705_v27, %v721_v28  ;;  %v4668_v41 = vcombine.low %v706_v29, %v722_v30  ;;  %v4637_v43 = vcombine.high %v674_v37, %v690_v39  ;;  %v886_v30 = vld [vmem:[#allocation13 + $0x18] sm:$0xff] }
 0x392   :  { %4240 = vmatprep.subr.bf16.mxu1 %v4349_v42  ;;  %v4635_v42 = vcombine.high %v673_v35, %v689_v36 }
 0x394   :  { %4200 = vmatpush1.bf16.msra.mxu0 %v4346_v20  ;;  %v658_v20 = vld [vmem:[#allocation11 + $0x8f8] sm:$0xff] }
 0x395   :  { %4241 = vmatpush1.bf16.msra.mxu1 %v4348_v23  ;;  %4201 = vmatprep.subr.bf16.mxu0 %v4827_v26  ;;  %v4634_v23 = vcombine.low %v673_v35, %v689_v36  ;;  %v4636_v26 = vcombine.low %v674_v37, %v690_v39  ;;  %v4605_v47 = vcombine.high %v642_v46, %v658_v20 }
 0x396   :  { %4242 = vmatprep.subr.bf16.mxu1 %v4829_v38  ;;  %v4603_v38 = vcombine.high %v641_v44, %v657_v45  ;;  %v4604_v49 = vcombine.low %v642_v46, %v658_v20  ;;  %v1002_v35 = vrot.slane %v886_v30, %v5134_v24  ;;  %v1014_v46 = vrot.slane %v886_v30, %v5152_v53 }
 0x397   :  { %v1010_v24 = vrot.slane %v886_v30, %v5155_v59 }
 0x398   :  { %4202 = vmatpush2.bf16.msra.mxu0 %v4826_v51  ;;  %v958_v51 = vrot.slane %v885_v50, %v5098_v16 }
 0x399   :  { %4243 = vmatpush2.bf16.msra.mxu1 %v4828_v54  ;;  %4203 = vmatprep.subr.bf16.mxu0 %v4795_v57  ;;  %v966_v54 = vrot.slane %v885_v50, %v5129_v14  ;;  %v962_v57 = vrot.slane %v885_v50, %v5101_v18 }
 0x39a   :  { %4244 = vmatprep.subr.bf16.mxu1 %v4797_v58 }
 0x39c   :  { %4204 = vmatpush2.bf16.msra.mxu0 %v4794_v0 }
 0x39d   :  { %4245 = vmatpush2.bf16.msra.mxu1 %v4796_v1  ;;  %4205 = vmatprep.subr.bf16.mxu0 %v4763_v2 }
 0x39e   :  { %4246 = vmatprep.subr.bf16.mxu1 %v4765_v3 }
 0x3a0   :  { %4206 = vmatpush2.bf16.msra.mxu0 %v4762_v7  ;;  %v974_v7 = vrot.slane %v885_v50, %v5149_v52 }
 0x3a1   :  { %4247 = vmatpush2.bf16.msra.mxu1 %v4764_v8  ;;  %4207 = vmatprep.subr.bf16.mxu0 %v4731_v9  ;;  %v982_v8 = vrot.slane %v885_v50, %v5152_v53  ;;  %v978_v9 = vrot.slane %v885_v50, %v5155_v59 }
 0x3a2   :  { %4248 = vmatprep.subr.bf16.mxu1 %v4733_v10  ;;  %v986_v10 = vrot.slane %v885_v50, %v5158_v60 }
 0x3a4   :  { %4208 = vmatpush2.bf16.msra.mxu0 %v4730_v19 }
 0x3a5   :  { %4249 = vmatpush2.bf16.msra.mxu1 %v4732_v22  ;;  %4209 = vmatprep.subr.bf16.mxu0 %v4699_v21 }
 0x3a6   :  { %4250 = vmatprep.subr.bf16.mxu1 %v4701_v25 }
 0x3a8   :  { %4210 = vmatpush2.bf16.msra.mxu0 %v4698_v31  ;;  %v990_v31 = vrot.slane %v886_v30, %v5098_v16 }
 0x3a9   :  { %4251 = vmatpush2.bf16.msra.mxu1 %v4700_v32  ;;  %4211 = vmatprep.subr.bf16.mxu0 %v4667_v33  ;;  %v998_v32 = vrot.slane %v886_v30, %v5129_v14  ;;  %v994_v33 = vrot.slane %v886_v30, %v5101_v18  ;;  %v1006_v18 = vrot.slane %v886_v30, %v5149_v52 }
 0x3aa   :  { %4252 = vmatprep.subr.bf16.mxu1 %v4669_v34 }
 0x3ac   :  { %4212 = vmatpush2.bf16.msra.mxu0 %v4666_v40 }
 0x3ad   :  { %4253 = vmatpush2.bf16.msra.mxu1 %v4668_v41  ;;  %4213 = vmatprep.subr.bf16.mxu0 %v4635_v42 }
 0x3ae   :  { %4254 = vmatprep.subr.bf16.mxu1 %v4637_v43 }
 0x3b0   :  { %4214 = vmatpush2.bf16.msra.mxu0 %v4634_v23  ;;  %v1018_v23 = vrot.slane %v886_v30, %v5158_v60 }
 0x3b1   :  { %4255 = vmatpush2.bf16.msra.mxu1 %v4636_v26  ;;  %4215 = vmatprep.subr.bf16.mxu0 %v4603_v38 }
 0x3b2   :  { %4256 = vmatprep.subr.bf16.mxu1 %v4605_v47 }
 0x3b4   :  { %4216 = vmatpush2.bf16.msra.mxu0 %v4602_v48 }
 0x3b5   :  { %4257 = vmatpush2.bf16.msra.mxu1 %v4604_v49 }
 0x3b7   :  { %v3973_v58 = vpop.f32.mrf.mxu0  ;;  %4218 = vmatmul.mubr.bf16.vlgmr.msra.gmra.mxu0 %v5112_v56 }
 0x3b8   :  { %v3974_v62 = vadd.f32 %v3973_v58, %v958_v51  ;;  %v4014_v63 = vpop.f32.mrf.mxu1  ;;  %4259 = vmatmul.mubr.bf16.vlgmr.msra.gmra.mxu1 %v5112_v56 }
 0x3b9   :  { %v4015_v55 = vadd.f32 %v4014_v63, %v966_v54  ;;  %v3975_v0 = vpop.f32.mrf.mxu0 }
 0x3ba   :  { %4283 = vst [vmem:[#allocation14 + $0x80] sm:$0xff] %v3974_v62  ;;  %v3976_v1 = vadd.f32 %v3975_v0, %v962_v57  ;;  %v4016_v2 = vpop.f32.mrf.mxu1 }
 0x3bb   :  { %4285 = vst [vmem:[#allocation14 + $0x90] sm:$0xff] %v4015_v55  ;;  %v4017_v3 = vadd.f32 %v4016_v2, %v970_v61  ;;  %v3977_v4 = vpop.f32.mrf.mxu0 }
 0x3bc   :  { %4284 = vst [vmem:[#allocation14 + $0x88] sm:$0xff] %v3976_v1  ;;  %v4018_v15 = vpop.f32.mrf.mxu1 }
 0x3bd   :  { %4286 = vst [vmem:[#allocation14 + $0x98] sm:$0xff] %v4017_v3  ;;  %v3978_v5 = vpop.f32.mrf.mxu0 }
 0x3be   :  { %v4019_v6 = vpop.f32.mrf.mxu1 }
 0x3f7   :  { %v4055_v56 = vpop.f32.mrf.mxu0 }
 0x3f8   :  { %v4056_v11 = vadd.f32 %v4055_v56, %v974_v7  ;;  %v4096_v12 = vpop.f32.mrf.mxu1 }
 0x3f9   :  { %v4097_v13 = vadd.f32 %v4096_v12, %v982_v8  ;;  %v4057_v17 = vpop.f32.mrf.mxu0 }
 0x3fa   :  { %4287 = vst [vmem:[#allocation14 + $0xa0] sm:$0xff] %v4056_v11  ;;  %v4058_v19 = vadd.f32 %v4057_v17, %v978_v9  ;;  %v4098_v22 = vpop.f32.mrf.mxu1 }
 0x3fb   :  { %4289 = vst [vmem:[#allocation14 + $0xb0] sm:$0xff] %v4097_v13  ;;  %v4099_v21 = vadd.f32 %v4098_v22, %v986_v10  ;;  %v4059_v25 = vpop.f32.mrf.mxu0 }
 0x3fc   :  { %4288 = vst [vmem:[#allocation14 + $0xa8] sm:$0xff] %v4058_v19  ;;  %v4100_v27 = vpop.f32.mrf.mxu1 }
 0x3fd   :  { %4290 = vst [vmem:[#allocation14 + $0xb8] sm:$0xff] %v4099_v21  ;;  %v4060_v28 = vpop.f32.mrf.mxu0 }
 0x3fe   :  { %v4101_v29 = vpop.f32.mrf.mxu1 }
 0x437   :  { %v4137_v34 = vpop.f32.mrf.mxu0 }
 0x438   :  { %v4138_v36 = vadd.f32 %v4137_v34, %v990_v31  ;;  %v4178_v37 = vpop.f32.mrf.mxu1 }
 0x439   :  { %v4179_v39 = vadd.f32 %v4178_v37, %v998_v32  ;;  %v4139_v40 = vpop.f32.mrf.mxu0 }
 0x43a   :  { %4291 = vst [vmem:[#allocation14 + $0xc0] sm:$0xff] %v4138_v36  ;;  %v4140_v41 = vadd.f32 %v4139_v40, %v994_v33  ;;  %v4180_v42 = vpop.f32.mrf.mxu1 }
 0x43b   :  { %4293 = vst [vmem:[#allocation14 + $0xd0] sm:$0xff] %v4179_v39  ;;  %v4181_v43 = vadd.f32 %v4180_v42, %v1002_v35  ;;  %v4141_v44 = vpop.f32.mrf.mxu0 }
 0x43c   :  { %4292 = vst [vmem:[#allocation14 + $0xc8] sm:$0xff] %v4140_v41  ;;  %v4182_v45 = vpop.f32.mrf.mxu1 }
 0x43d   :  { %4294 = vst [vmem:[#allocation14 + $0xd8] sm:$0xff] %v4181_v43  ;;  %v4142_v16 = vpop.f32.mrf.mxu0 }
 0x43e   :  { %v4183_v14 = vpop.f32.mrf.mxu1 }
 0x477   :  { %v4219_v20 = vpop.f32.mrf.mxu0 }
 0x478   :  { %v4220_v26 = vadd.f32 %v4219_v20, %v1006_v18  ;;  %v4260_v38 = vpop.f32.mrf.mxu1 }
 0x479   :  { %v4261_v47 = vadd.f32 %v4260_v38, %v1014_v46  ;;  %v4221_v48 = vpop.f32.mrf.mxu0 }
 0x47a   :  { %4295 = vst [vmem:[#allocation14 + $0xe0] sm:$0xff] %v4220_v26  ;;  %v4222_v49 = vadd.f32 %v4221_v48, %v1010_v24  ;;  %v4262_v50 = vpop.f32.mrf.mxu1 }
 0x47b   :  { %4297 = vst [vmem:[#allocation14 + $0xf0] sm:$0xff] %v4261_v47  ;;  %v4263_v51 = vadd.f32 %v4262_v50, %v1018_v23  ;;  %v4223_v54 = vpop.f32.mrf.mxu0 }
 0x47c   :  { %4296 = vst [vmem:[#allocation14 + $0xe8] sm:$0xff] %v4222_v49  ;;  %v4264_v52 = vpop.f32.mrf.mxu1 }
 0x47d   :  { %4298 = vst [vmem:[#allocation14 + $0xf8] sm:$0xff] %v4263_v51  ;;  %v4224_v53 = vpop.f32.mrf.mxu0 }
 0x47e   :  { %v4265_v59 = vpop.f32.mrf.mxu1 }
 0x47f   :  { %4994 = shalt.err (!%p4991_p11)
}
 0x480   :  { %4308 = dma.vmem_to_hbm [thread:$0]  %s4306_s6, 4096, %s5226_s7, [#allocation4]  }
 0x481   :  { %5011 = dma.done.wait [#allocation4], 4096  }
 0x482   :  { %5012 = vsyncadd [#allocation4], 4294963200 }
 0x483   :  { %4312 = vsyncpa [#allocation3], 1 }
 0x484   :  { %4313 = vsyncpa [#allocation6], 1 }
 0x485   :  { %4314 = vsyncpa [#allocation9], 1 }
 0x486   :  { %4315 = vsyncpa [#allocation12], 1 }
 0x487   :  { %4316 = vsyncpa [#allocation4], 1 }

// kernel: tpu_custom_call.1
= control target key start
LH: loop header
LB: loop body
LE: loop exit
PB: predicated region body
PF: predicated region fallthrough
CT: control target
= control target key end

     0   :  { %s4076_s0 = inlined_call_operand.hbm [shape: f32[8,64], index: 0, kind: input, shape index: {}]   ;;  %s4077_s1 = inlined_call_operand.hbm [shape: f32[64,256], index: 1, kind: input, shape index: {}]   ;;  %s4078_s2 = inlined_call_operand.hbm [shape: f32[1,256], index: 2, kind: input, shape index: {}]   ;;  %s4079_s3 = inlined_call_operand.hbm [shape: f32[256,256], index: 3, kind: input, shape index: {}]   ;;  %s4080_s4 = inlined_call_operand.hbm [shape: f32[1,256], index: 4, kind: input, shape index: {}]   ;;  %s4081_s5 = inlined_call_operand.hbm [shape: bf16[2,256,2048], index: 5, kind: input, shape index: {}]   ;;  %s4082_s6 = inlined_call_operand.hbm [shape: f32[1,4096], index: 6, kind: input, shape index: {}]   ;;  %s4083_s7 = inlined_call_operand.hbm [shape: f32[8,4096], index: 7, kind: output, shape index: {}]  }
   0x1   :  { %4094 = sst [smem:[#allocation20_spill]] %s4076_s0 }
   0x2   :  { %4095 = sst [smem:[#allocation21_spill]] %s4077_s1 }
   0x3   :  { %4096 = sst [smem:[#allocation22_spill]] %s4079_s3 }
   0x4   :  { %4097 = sst [smem:[#allocation23_spill]] %s4081_s5 }
   0x5   :  { %12 = vsyncpa [#allocation3], 0 }
   0x6   :  { %13 = vsyncpa [#allocation6], 0 }
   0x7   :  { %14 = vsyncpa [#allocation9], 0 }
   0x8   :  { %15 = vsyncpa [#allocation12], 0 }
   0x9   :  { %17 = vsyncpa [#allocation12 + $0x1], 0 }
   0xa   :  { %18 = vsyncpa [#allocation4], 0 }
   0xb   :  { %20 = vsyncpa [#allocation4 + $0x1], 0  ;;  %s3489_s24 = smov 0   ;;  %s3491_s25 = smov 0  }
   0xc   :  { %s3493_s26 = smov 0   ;;  %s3495_s27 = smov 0  }
   0xd LB: > { %s3436_s28 = smov [#allocation5]   ;;  %s3510_s30 = sadd.s32 4294967295, %s3434_s27   ;;  %s3434_s27 = sphi %s3495_s27, %s4130_s27   ;;  %s3430_s26 = sphi %s3493_s26, %s4129_s26   ;;  %s3426_s25 = sphi %s3491_s25, %s4128_s25   ;;  %s3422_s24 = sphi %s3489_s24, %s4127_s24  }
   0xe   : > { %s237_s29 = sshll.u32 %s3436_s28, 4  ;;  %p2778_p0 = scmp.ge.s32.totalorder %s3434_s27, 1  ;;  %s238_s29 = int_to_ptr.vmem [resolvable:$true] %s237_s29 }
   0xf   : > { %p4084_p1 = scmp.eq.s32.totalorder %s3510_s30, 0  ;;  %p214_p2 = scmp.lt.s32.totalorder %s3434_s27, 3 }
  0x10   : > { %s3437_s9 = smov [#allocation8]   ;;  %s3183_s13 = scalar_lea.vmem %s238_s29, 2048 }
  0x11   : > { %p3515_p3 = pnand %p2778_p0, %p214_p2  ;;  %s261_s10 = sshll.u32 %s3437_s9, 4  ;;  %s262_s10 = int_to_ptr.vmem [resolvable:$true] %s261_s10 }
  0x12   : > { %p3184_p8 = scmp.ne.s32.totalorder %s238_s29, %s3183_s13  ;;  %p3191_p11 = scmp.lt.s32.totalorder %s238_s29, %s238_s29 }
  0x13   : > { %s4098_s8 = scalar_select %p3515_p3, 1, 0 }
  0x14   : > { %p3091_p5 = pneg %p3515_p3  ;;  %p3192_p12 = scmp.lt.s32.totalorder %s3183_s13, %s3183_s13 }
  0x16   : > { %p3524_p6 = pnand %p3091_p5, %p4084_p1  ;;  %p3193_p13 = por %p3192_p12, %p3191_p11 }
  0x18   : > { %s4099_s11 = scalar_select %p3524_p6, 1, 0 }
  0x19   : > { %p3530_p7 = pneg %p3524_p6 }
  0x1b   : > { %p3186_p9 = pnand %p3184_p8, %p3530_p7 }
  0x1d   : > { %p3187_p10 = pneg %p3186_p9 }
  0x1f   : > { %p3194_p0 = pnand %p3193_p13, %p3187_p10 }
  0x21   : > { %3197 = shalt.err (!%p3194_p0)
}
  0x22   : > { %s3438_s14 = smov 256   ;;  %s3439_s15 = smov 16  }
  0x23   : > { %s4101_s1 = sld [smem:[#allocation21_spill]]  ;;  %s3209_s18 = scalar_lea.vmem %s262_s10, 8192 }
  0x24   : > { %p3210_p2 = scmp.ne.s32.totalorder %s262_s10, %s3209_s18  ;;  %p3217_p9 = scmp.lt.s32.totalorder %s262_s10, %s262_s10 }
  0x25   : > { %p3218_p4 = scmp.lt.s32.totalorder %s3209_s18, %s3209_s18 }
  0x26   : > { %p3212_p5 = pnand %p3210_p2, %p3530_p7 }
  0x27   : > { %p3219_p1 = por %p3218_p4, %p3217_p9 }
  0x28   : > { %p3213_p8 = pneg %p3212_p5 }
  0x29   : > { %3097 = dma.hbm_to_vmem [thread:$0]  (!%p3524_p6), %s4101_s1, 2048, %s238_s29, [#allocation6], %s3438_s14, %s3438_s14, %s3439_s15  }
  0x2a   : > { %p3220_p11 = pnand %p3219_p1, %p3213_p8 }
  0x2c   : > { %3223 = shalt.err (!%p3220_p11)
}
  0x2d   : > { %s4102_s3 = sld [smem:[#allocation22_spill]]  ;;  %s2777_s21 = sadd.s32 4294967294, %s3434_s27  }
  0x2e   : > { %s3550_s22 = sadd.s32 1, %s3434_s27   ;;  %s138_s28 = sadd.s32 1, %s3430_s26 }
  0x2f   : > { %s135_s23 = ssub.s32 %s3434_s27, %s3550_s22  ;;  %p145_p4 = scmp.ne.s32.totalorder %s3430_s26, %s3426_s25 }
  0x30   : > { %p136_p1 = scmp.eq.s32.totalorder %s135_s23, 0  ;;  %p146_p10 = scmp.eq.s32.totalorder %s3434_s27, 0 }
  0x31   : > { %p151_p12 = scmp.ne.s32.totalorder %s3426_s25, %s3422_s24  ;;  %p4104_p0 = scmp.eq.s32.totalorder %s3510_s30, 0 }
  0x32   : > { %s3561_s29 = scalar_select %p136_p1, %s3430_s26, %s138_s28  }
  0x33   : > { %3103 = dma.hbm_to_vmem [thread:$0]  (!%p3524_p6), %s4102_s3, 8192, %s262_s10, [#allocation9], %s3438_s14, %s3438_s14, %s3439_s15  }
  0x34   : > { %p3563_p13 = por %p146_p10, %p145_p4  ;;  %p3569_p2 = por %p4104_p0, %p151_p12 }
  0x35   : > { %p201_p5 = scmp.eq.s32.totalorder %s3510_s30, 1  ;;  %p207_p8 = scmp.eq.s32.totalorder %s2777_s21, 1 }
  0x36   : > { %s4105_s10 = scalar_select %p3569_p2, 1, 0 }
  0x37   : > { %p3123_p9 = scmp.lt.s32.totalorder %s3434_s27, 2  ;;  %s286_s13 = sand.u32 1, %s3434_s27  }
  0x38   : > { %p3576_p11 = por %p201_p5, %p145_p4  ;;  %p3580_p1 = por %p207_p8, %p151_p12 }
  0x39   : > { %s4085_s16 = sand.u32 1, %s3430_s26   ;;  %s3062_s18 = sshll.u32 %s3434_s27, 15 }
  0x3a   : > { %s4106_s14 = scalar_select %p3576_p11, 1, 0 }
  0x3b   : > { %s4107_s15 = scalar_select %p3580_p1, 1, 0 }
  0x3c   : > { %s2785_s17 = sshll.u32 %s4085_s16, 11  ;;  %s4108_s5 = sld [smem:[#allocation23_spill]] }
  0x3d   : > { %s290_s21 = scalar_lea.vmem [#allocation11], %s2785_s17  ;;  %p3595_p4 = pnand %p3123_p9, %p3563_p13 }
  0x3e   : > { %s297_s28 = sshll.u32 %s290_s21, 4  ;;  %s3601_s16 = scalar_lea.sflag [#allocation12], %s286_s13  ;;  %s3599_s28 = int_to_ptr.vmem [resolvable:$true] %s297_s28 }
  0x3f   : > { %s4109_s1 = scalar_select %p3595_p4, 1, 0 }
  0x40   : > { %p4091_p12 = pneg %p3595_p4 }
  0x42   : > { %s3591_s23 = scalar_lea.hbm %s4108_s5, %s3062_s18  ;;  %s3229_s18 = scalar_lea.hbm %s4108_s5, 65536 }
  0x43   : > { %s3224_s3 = scalar_lea.hbm %s3591_s23, 32768  ;;  %p3230_p13 = scmp.lt.s32.totalorder %s3591_s23, %s4108_s5 }
  0x44   : > { %p3225_p10 = scmp.ne.s32.totalorder %s3591_s23, %s3224_s3  ;;  %p3231_p8 = scmp.lt.s32.totalorder %s3229_s18, %s3224_s3 }
  0x46   : > { %p3227_p0 = pnand %p4091_p12, %p3225_p10  ;;  %p3232_p9 = por %p3231_p8, %p3230_p13 }
  0x48   : > { %p3228_p5 = pneg %p3227_p0 }
  0x4a   : > { %p3233_p1 = pnand %p3232_p9, %p3228_p5 }
  0x4c   : > { %3236 = shalt.err (!%p3233_p1)
}
  0x4d   : > { %s3237_s13 = scalar_lea.vmem %s3599_s28, 32768  ;;  %s3440_s21 = smov [#allocation11]  }
  0x4e   : > { %p3238_p11 = scmp.ne.s32.totalorder %s3599_s28, %s3237_s13  ;;  %s3242_s17 = sshll.u32 %s3440_s21, 4  ;;  %s3243_s17 = int_to_ptr.vmem [resolvable:$false] %s3242_s17 }
  0x4f   : > { %s3244_s9 = scalar_lea.vmem %s3243_s17, 65536  ;;  %p3245_p2 = scmp.lt.s32.totalorder %s3599_s28, %s3243_s17 }
  0x50   : > { %p3240_p10 = pnand %p3238_p11, %p4091_p12  ;;  %p3246_p3 = scmp.lt.s32.totalorder %s3244_s9, %s3237_s13 }
  0x52   : > { %p3241_p0 = pneg %p3240_p10  ;;  %p3247_p6 = por %p3246_p3, %p3245_p2 }
  0x54   : > { %p3248_p13 = pnand %p3247_p6, %p3241_p0 }
  0x56   : > { %3251 = shalt.err (!%p3248_p13)
}
  0x57   : > { %s3441_s3 = smov 1024   ;;  %s3442_s18 = smov 64  }
  0x58   : > { %3110 = dma.hbm_to_vmem [thread:$0]  (!%p3595_p4), %s3591_s23, 32768, %s3599_s28, %s3601_s16, %s3441_s3, %s3441_s3, %s3442_s18  }
  0x59   : > { %s3443_s19 = smov [#allocation2]   ;;  %s3444_s5 = smov [#allocation7]  }
  0x5a   : > { %s227_s20 = sshll.u32 %s3443_s19, 4  ;;  %s251_s21 = sshll.u32 %s3444_s5, 4  ;;  %s228_s20 = int_to_ptr.vmem [resolvable:$true] %s227_s20  ;;  %s252_s21 = int_to_ptr.vmem [resolvable:$true] %s251_s21 }
  0x5b   : > { %s3263_s17 = scalar_lea.vmem %s228_s20, 128  ;;  %p3271_p2 = scmp.lt.s32.totalorder %s228_s20, %s228_s20 }
  0x5c   : > { %p3264_p11 = scmp.ne.s32.totalorder %s228_s20, %s3263_s17  ;;  %p3272_p1 = scmp.lt.s32.totalorder %s3263_s17, %s3263_s17 }
  0x5e   : > { %p3266_p3 = pnand %p3264_p11, %p3530_p7  ;;  %p3273_p5 = por %p3272_p1, %p3271_p2 }
  0x60   : > { %p3267_p6 = pneg %p3266_p3 }
  0x62   : > { %p3274_p8 = pnand %p3273_p5, %p3267_p6 }
  0x64   : > { %3277 = shalt.err (!%p3274_p8)
}
  0x65   : > { %p4110_p9 = scmp.ne.s32.totalorder %s4099_s11, 0  ;;  %s4111_s0 = sld [smem:[#allocation20_spill]] }
  0x66   : > { %s3289_s5 = scalar_lea.vmem %s252_s21, 32  ;;  %p3297_p12 = scmp.lt.s32.totalorder %s252_s21, %s252_s21 }
  0x67   : > { %p3290_p10 = scmp.ne.s32.totalorder %s252_s21, %s3289_s5  ;;  %p3298_p11 = scmp.lt.s32.totalorder %s3289_s5, %s3289_s5 }
  0x69   : > { %p3292_p0 = pnand %p3290_p10, %p3530_p7  ;;  %p3299_p3 = por %p3298_p11, %p3297_p12 }
  0x6b   : > { %3094 = dma.hbm_to_vmem [thread:$0]  (!%p4110_p9), %s4111_s0, 128, %s228_s20, [#allocation3]  }
  0x6c   : > { %p3293_p13 = pneg %p3292_p0 }
  0x6e   : > { %p3300_p4 = pnand %p3299_p3, %p3293_p13 }
  0x70   : > { %3303 = shalt.err (!%p3300_p4)
}
  0x71   : > { %3100 = dma.hbm_to_vmem [thread:$0]  (!%p4110_p9), %s4078_s2, 32, %s252_s21, [#allocation6]  }
  0x72   : > { %s4112_s3 = sand.u32 1, %s3430_s26   ;;  %s3445_s19 = smov [#allocation10]  }
  0x73   : > { %s2788_s18 = sshll.u32 %s4112_s3, 4  ;;  %s275_s20 = sshll.u32 %s3445_s19, 4  ;;  %s276_s20 = int_to_ptr.vmem [resolvable:$true] %s275_s20 }
  0x74   : > { %s3063_s17 = sshll.u32 %s3434_s27, 8  ;;  %s3315_s13 = scalar_lea.vmem %s276_s20, 32 }
  0x75   : > { %p3316_p6 = scmp.ne.s32.totalorder %s276_s20, %s3315_s13  ;;  %p3323_p2 = scmp.lt.s32.totalorder %s276_s20, %s276_s20 }
  0x76   : > { %p3324_p1 = scmp.lt.s32.totalorder %s3315_s13, %s3315_s13 }
  0x77   : > { %p3318_p12 = pnand %p3316_p6, %p3530_p7 }
  0x78   : > { %p3325_p5 = por %p3324_p1, %p3323_p2 }
  0x79   : > { %p3319_p4 = pneg %p3318_p12 }
  0x7b   : > { %p3326_p8 = pnand %p3325_p5, %p3319_p4 }
  0x7d   : > { %3329 = shalt.err (!%p3326_p8)
}
  0x7e   : > { %3106 = dma.hbm_to_vmem [thread:$0]  (!%p4110_p9), %s4080_s4, 32, %s276_s20, [#allocation9]  }
  0x7f   : > { %s317_s9 = scalar_lea.hbm %s4082_s6, %s3063_s17  ;;  %s311_s3 = scalar_lea.vmem [#allocation13], %s2788_s18 }
  0x80   : > { %s319_s12 = sshll.u32 %s311_s3, 4  ;;  %s3330_s19 = scalar_lea.hbm %s317_s9, 256  ;;  %s320_s12 = int_to_ptr.vmem [resolvable:$true] %s319_s12 }
  0x81   : > { %p3331_p7 = scmp.ne.s32.totalorder %s317_s9, %s3330_s19  ;;  %p4113_p10 = scmp.ne.s32.totalorder %s4109_s1, 0 }
  0x82   : > { %s3335_s0 = scalar_lea.hbm %s4082_s6, 512  ;;  %p3336_p9 = scmp.lt.s32.totalorder %s317_s9, %s4082_s6 }
  0x83   : > { %p4114_p0 = pneg %p4113_p10  ;;  %p3337_p3 = scmp.lt.s32.totalorder %s3335_s0, %s3330_s19 }
  0x85   : > { %p3333_p13 = pnand %p3331_p7, %p4114_p0  ;;  %p3338_p6 = por %p3337_p3, %p3336_p9 }
  0x87   : > { %p3334_p11 = pneg %p3333_p13 }
  0x89   : > { %p3339_p12 = pnand %p3338_p6, %p3334_p11 }
  0x8b   : > { %3342 = shalt.err (!%p3339_p12)
}
  0x8c   : > { %s3343_s18 = scalar_lea.vmem %s320_s12, 256  ;;  %p4115_p2 = pmov %p4114_p0 }
  0x8d   : > { %p3344_p4 = scmp.ne.s32.totalorder %s320_s12, %s3343_s18  ;;  %s3446_s20 = smov [#allocation13]  }
  0x8e   : > { %s3348_s17 = sshll.u32 %s3446_s20, 4  ;;  %s3349_s17 = int_to_ptr.vmem [resolvable:$false] %s3348_s17 }
  0x8f   : > { %p3346_p1 = pnand %p3344_p4, %p4115_p2  ;;  %s3350_s5 = scalar_lea.vmem %s3349_s17, 512 }
  0x90   : > { %p3351_p8 = scmp.lt.s32.totalorder %s320_s12, %s3349_s17  ;;  %p3352_p7 = scmp.lt.s32.totalorder %s3350_s5, %s3343_s18 }
  0x91   : > { %p3347_p5 = pneg %p3346_p1 }
  0x92   : > { %p3353_p0 = por %p3352_p7, %p3351_p8 }
  0x94   : > { %p3354_p13 = pnand %p3353_p0, %p3347_p5 }
  0x96   : > { %3357 = shalt.err (!%p3354_p13)
}
  0x97   : > { %3113 = dma.hbm_to_vmem [thread:$0]  (!%p4113_p10), %s317_s9, 256, %s320_s12, %s3601_s16  }
  0x98   : > { %p4116_p11 = scmp.ne.s32.totalorder %s4098_s8, 0 }
  0x99   : > { %p4117_p9 = scmp.eq.s32.totalorder (!%p4116_p11), %s3510_s30, 0 }
  0x9a   : > { %328 = sbr.rel (%p4116_p11) target bundleno = 995 (0x3e3), region = 48 }
  0x9f   : > { %3401 = dma.done.wait (%p4117_p9), [#allocation3], 128   ;;  %p4118_p3 = pmov %p4117_p9 }
  0xa1   : > { %3403 = vsyncadd (%p4118_p3), [#allocation3], 4294967168  ;;  %p4119_p6 = pmov %p4118_p3 }
  0xa2   : > { %p4120_p12 = pmov %p4118_p3 }
  0xa3   : > { %3405 = dma.done.wait (%p4119_p6), [#allocation6], 2080  }
  0xa4   : > { %3407 = vsyncadd (%p4120_p12), [#allocation6], 4294965216  ;;  %p4121_p4 = pmov %p4118_p3 }
  0xa5   : > { %p4122_p10 = pmov %p4118_p3 }
  0xa6   : > { %3409 = dma.done.wait (%p4121_p4), [#allocation9], 8224  }
  0xa7   : > { %3411 = vsyncadd (%p4122_p10), [#allocation9], 4294959072  ;;  %s350_s0 = sand.u32 1, %s3510_s30   ;;  %s3686_s1 = sand.u32 1, %s3426_s25  }
  0xa8   : > { %s2797_s8 = sshll.u32 %s3686_s1, 11  ;;  %s351_s16 = scalar_lea.sflag [#allocation12], %s350_s0 }
  0xa9   : > { %s3689_s28 = scalar_lea.vmem [#allocation11], %s2797_s8  ;;  %p4123_p2 = scmp.ne.s32.totalorder %s4105_s10, 0 }
  0xab   : > { %3413 = dma.done.wait (%p4123_p2), %s351_s16, 33024  }
  0xac   : > { %3415 = vsyncadd (%p4123_p2), %s351_s16, 4294934272  ;;  %v3447_v0 = vmov 0.0   ;;  %v417_v1 = vld [vmem:[#allocation5 + $0x78] sm:$0xff]  ;;  %v416_v2 = vld [vmem:[#allocation5 + $0x70] sm:$0xff]  ;;  %vm430_vm0 = vcmask 523264   ;;  %s2798_s10 = sshll.u32 %s3686_s1, 4 }
  0xad   : > { %498 = vmatprep.mubr.f32.mxu0 %v3447_v0  ;;  %v415_v3 = vld [vmem:[#allocation5 + $0x68] sm:$0xff]  ;;  %450 = vmatprep.subr.mxu0 %v417_v1  ;;  %v414_v4 = vld [vmem:[#allocation5 + $0x60] sm:$0xff]  ;;  %v413_v5 = vld [vmem:[#allocation5 + $0x58] sm:$0xff]  ;;  %s3994_s9 = scalar_lea.vmem [#allocation13], %s2798_s10  ;;  %s2799_s3 = sshll.u32 %s3686_s1, 7 }
  0xae   : > { %451 = vmatpush1.msra.mxu0 %v416_v2  ;;  %v412_v6 = vld [vmem:[#allocation5 + $0x50] sm:$0xff]  ;;  %v411_v7 = vld [vmem:[#allocation5 + $0x48] sm:$0xff]  ;;  %v410_v8 = vld [vmem:[#allocation5 + $0x40] sm:$0xff]  ;;  %s4003_s12 = scalar_lea.vmem [#allocation14], %s2799_s3  ;;  %s3064_s19 = sshll.u32 %s3510_s30, 11 }
  0xaf   : > { %452 = vmatprep.subr.mxu0 %v415_v3  ;;  %v409_v9 = vld [vmem:[#allocation5 + $0x38] sm:$0xff]  ;;  %v536_v12 = vld [vmem:[#allocation8 + $0xe8] sm:$0xff]  ;;  %v535_v13 = vld [vmem:[#allocation8 + $0xe0] sm:$0xff]  ;;  %s2637_s13 = sshll.u32 %s4003_s12, 4  ;;  %s4031_s21 = scalar_lea.hbm %s4083_s7, %s3064_s19  ;;  %s4033_s13 = int_to_ptr.vmem [resolvable:$true] %s2637_s13 }
  0xb0   : > { %453 = vmatpush1.msra.mxu0 %v414_v4  ;;  %v538_v10 = vld [vmem:[#allocation8 + $0xf8] sm:$0xff]  ;;  %v537_v11 = vld [vmem:[#allocation8 + $0xf0] sm:$0xff]  ;;  %v407_v16 = vld [vmem:[#allocation5 + $0x28] sm:$0xff]  ;;  %s2623_s30 = scalar_lea.sflag [#allocation4], %s3686_s1  ;;  %s3358_s18 = scalar_lea.vmem %s4033_s13, 2048 }
  0xb1   : > { %454 = vmatprep.subr.mxu0 %v413_v5  ;;  %583 = vmatprep.subr.mxu1 %v538_v10  ;;  %v408_v14 = vld [vmem:[#allocation5 + $0x30] sm:$0xff]  ;;  %v534_v15 = vld [vmem:[#allocation8 + $0xd8] sm:$0xff]  ;;  %v531_v21 = vld [vmem:[#allocation8 + $0xc0] sm:$0xff]  ;;  %p3359_p1 = scmp.ne.s32.totalorder %s4033_s13, %s3358_s18  ;;  %p4124_p5 = scmp.ne.s32.totalorder %s4106_s14, 0 }
  0xb2   : > { %455 = vmatpush1.msra.mxu0 %v412_v6  ;;  %584 = vmatpush1.msra.mxu1 %v537_v11  ;;  %v533_v17 = vld [vmem:[#allocation8 + $0xd0] sm:$0xff]  ;;  %v406_v18 = vld [vmem:[#allocation5 + $0x20] sm:$0xff]  ;;  %v532_v19 = vld [vmem:[#allocation8 + $0xc8] sm:$0xff]  ;;  %s3448_s20 = smov [#allocation14]  }
  0xb3   : > { %456 = vmatprep.subr.mxu0 %v411_v7  ;;  %585 = vmatprep.subr.mxu1 %v536_v12  ;;  %v405_v20 = vld [vmem:[#allocation5 + $0x18] sm:$0xff]  ;;  %v404_v22 = vld [vmem:[#allocation5 + $0x10] sm:$0xff]  ;;  %v403_v24 = vld [vmem:[#allocation5 + $0x8] sm:$0xff]  ;;  %p3360_p8 = pnand %p3359_p1, %p4124_p5  ;;  %s3362_s17 = sshll.u32 %s3448_s20, 4  ;;  %s3363_s17 = int_to_ptr.vmem [resolvable:$false] %s3362_s17 }
  0xb4   : > { %457 = vmatpush1.msra.mxu0 %v410_v8  ;;  %586 = vmatpush1.msra.mxu1 %v535_v13  ;;  %v530_v23 = vld [vmem:[#allocation8 + $0xb8] sm:$0xff]  ;;  %v529_v25 = vld [vmem:[#allocation8 + $0xb0] sm:$0xff]  ;;  %v528_v27 = vld [vmem:[#allocation8 + $0xa8] sm:$0xff]  ;;  %s3364_s5 = scalar_lea.vmem %s3363_s17, 4096  ;;  %p3365_p0 = scmp.lt.s32.totalorder %s4033_s13, %s3363_s17 }
  0xb5   : > { %458 = vmatprep.subr.mxu0 %v409_v9  ;;  %587 = vmatprep.subr.mxu1 %v534_v15  ;;  %v402_v26 = vld [vmem:[#allocation5] sm:$0xff]  ;;  %v401_v28 = vld [vmem:[#allocation2] sm:$0xff]  ;;  %v524_v32 = vld [vmem:[#allocation8 + $0x88] sm:$0xff]  ;;  %p3361_p7 = pneg %p3360_p8  ;;  %p3366_p13 = scmp.lt.s32.totalorder %s3364_s5, %s3358_s18 }
  0xb6   : > { %459 = vmatpush1.msra.mxu0 %v408_v14  ;;  %588 = vmatpush1.msra.mxu1 %v533_v17  ;;  %v527_v29 = vld [vmem:[#allocation8 + $0xa0] sm:$0xff]  ;;  %v526_v30 = vld [vmem:[#allocation8 + $0x98] sm:$0xff]  ;;  %v525_v31 = vld [vmem:[#allocation8 + $0x90] sm:$0xff] }
  0xb7   : > { %460 = vmatprep.subr.mxu0 %v407_v16  ;;  %589 = vmatprep.subr.mxu1 %v532_v19  ;;  %v523_v33 = vld [vmem:[#allocation8 + $0x80] sm:$0xff]  ;;  %v522_v34 = vld [vmem:[#allocation8 + $0x78] sm:$0xff]  ;;  %v521_v35 = vld [vmem:[#allocation8 + $0x70] sm:$0xff]  ;;  %p3367_p11 = por %p3366_p13, %p3365_p0 }
  0xb8   : > { %461 = vmatpush1.msra.mxu0 %v406_v18  ;;  %590 = vmatpush1.msra.mxu1 %v531_v21  ;;  %v520_v36 = vld [vmem:[#allocation8 + $0x68] sm:$0xff]  ;;  %v519_v37 = vld [vmem:[#allocation8 + $0x60] sm:$0xff]  ;;  %v518_v38 = vld [vmem:[#allocation8 + $0x58] sm:$0xff] }
  0xb9   : > { %462 = vmatprep.subr.mxu0 %v405_v20  ;;  %591 = vmatprep.subr.mxu1 %v530_v23  ;;  %v517_v39 = vld [vmem:[#allocation8 + $0x50] sm:$0xff]  ;;  %v516_v40 = vld [vmem:[#allocation8 + $0x48] sm:$0xff]  ;;  %v515_v41 = vld [vmem:[#allocation8 + $0x40] sm:$0xff]  ;;  %p3368_p9 = pnand %p3367_p11, %p3361_p7 }
  0xba   : > { %463 = vmatpush1.msra.mxu0 %v404_v22  ;;  %592 = vmatpush1.msra.mxu1 %v529_v25  ;;  %v514_v42 = vld [vmem:[#allocation8 + $0x38] sm:$0xff]  ;;  %v513_v43 = vld [vmem:[#allocation8 + $0x30] sm:$0xff]  ;;  %v512_v44 = vld [vmem:[#allocation8 + $0x28] sm:$0xff] }
  0xbb   : > { %464 = vmatprep.subr.mxu0 %v403_v24  ;;  %593 = vmatprep.subr.mxu1 %v528_v27  ;;  %v511_v45 = vld [vmem:[#allocation8 + $0x20] sm:$0xff]  ;;  %v510_v46 = vld [vmem:[#allocation8 + $0x18] sm:$0xff]  ;;  %v509_v47 = vld [vmem:[#allocation8 + $0x10] sm:$0xff] }
  0xbc   : > { %465 = vmatpush1.msra.mxu0 %v402_v26  ;;  %594 = vmatpush1.msra.mxu1 %v527_v29  ;;  %v508_v48 = vld [vmem:[#allocation8 + $0x8] sm:$0xff]  ;;  %v507_v49 = vld [vmem:[#allocation8] sm:$0xff]  ;;  %v570_v50 = vld [vmem:[#allocation8 + $0x1f8] sm:$0xff] }
  0xbd   : > { %2800 = vmatmul.mubr.msk.f32.vlgmr.msra.gmra.mxu0 %vm430_vm0, %v401_v28  ;;  %595 = vmatprep.subr.mxu1 %v526_v30  ;;  %v569_v51 = vld [vmem:[#allocation8 + $0x1f0] sm:$0xff]  ;;  %v568_v52 = vld [vmem:[#allocation8 + $0x1e8] sm:$0xff]  ;;  %v567_v53 = vld [vmem:[#allocation8 + $0x1e0] sm:$0xff] }
  0xbe   : > { %596 = vmatpush1.msra.mxu1 %v525_v31  ;;  %v566_v54 = vld [vmem:[#allocation8 + $0x1d8] sm:$0xff]  ;;  %v565_v55 = vld [vmem:[#allocation8 + $0x1d0] sm:$0xff]  ;;  %v564_v56 = vld [vmem:[#allocation8 + $0x1c8] sm:$0xff] }
  0xbf   : > { %597 = vmatprep.subr.mxu1 %v524_v32  ;;  %v563_v57 = vld [vmem:[#allocation8 + $0x1c0] sm:$0xff]  ;;  %v562_v58 = vld [vmem:[#allocation8 + $0x1b8] sm:$0xff]  ;;  %v561_v59 = vld [vmem:[#allocation8 + $0x1b0] sm:$0xff] }
  0xc0   : > { %598 = vmatpush1.msra.mxu1 %v523_v33  ;;  %v560_v60 = vld [vmem:[#allocation8 + $0x1a8] sm:$0xff]  ;;  %v559_v61 = vld [vmem:[#allocation8 + $0x1a0] sm:$0xff]  ;;  %v558_v62 = vld [vmem:[#allocation8 + $0x198] sm:$0xff] }
  0xc1   : > { %599 = vmatprep.subr.mxu1 %v522_v34  ;;  %v557_v63 = vld [vmem:[#allocation8 + $0x190] sm:$0xff]  ;;  %v556_v0 = vld [vmem:[#allocation8 + $0x188] sm:$0xff]  ;;  %v555_v1 = vld [vmem:[#allocation8 + $0x180] sm:$0xff] }
  0xc2   : > { %600 = vmatpush1.msra.mxu1 %v521_v35  ;;  %v554_v2 = vld [vmem:[#allocation8 + $0x178] sm:$0xff]  ;;  %v553_v3 = vld [vmem:[#allocation8 + $0x170] sm:$0xff]  ;;  %v552_v4 = vld [vmem:[#allocation8 + $0x168] sm:$0xff] }
  0xc3   : > { %601 = vmatprep.subr.mxu1 %v520_v36  ;;  %v551_v5 = vld [vmem:[#allocation8 + $0x160] sm:$0xff]  ;;  %v550_v6 = vld [vmem:[#allocation8 + $0x158] sm:$0xff]  ;;  %v549_v7 = vld [vmem:[#allocation8 + $0x150] sm:$0xff] }
  0xc4   : > { %602 = vmatpush1.msra.mxu1 %v519_v37  ;;  %v548_v8 = vld [vmem:[#allocation8 + $0x148] sm:$0xff]  ;;  %v547_v9 = vld [vmem:[#allocation8 + $0x140] sm:$0xff]  ;;  %v546_v10 = vld [vmem:[#allocation8 + $0x138] sm:$0xff] }
  0xc5   : > { %603 = vmatprep.subr.mxu1 %v518_v38  ;;  %v545_v11 = vld [vmem:[#allocation8 + $0x130] sm:$0xff]  ;;  %v544_v12 = vld [vmem:[#allocation8 + $0x128] sm:$0xff]  ;;  %v543_v13 = vld [vmem:[#allocation8 + $0x120] sm:$0xff] }
  0xc6   : > { %604 = vmatpush1.msra.mxu1 %v517_v39  ;;  %v542_v14 = vld [vmem:[#allocation8 + $0x118] sm:$0xff]  ;;  %v541_v15 = vld [vmem:[#allocation8 + $0x110] sm:$0xff]  ;;  %v540_v16 = vld [vmem:[#allocation8 + $0x108] sm:$0xff] }
  0xc7   : > { %605 = vmatprep.subr.mxu1 %v516_v40  ;;  %v539_v17 = vld [vmem:[#allocation8 + $0x100] sm:$0xff]  ;;  %v3698_v20 = vld [vmem:[%s3689_s28 + $0x388] sm:$0xff] }
  0xc8   : > { %606 = vmatpush1.msra.mxu1 %v515_v41  ;;  %v770_v18 = vld [vmem:[%s3689_s28 + $0x380] sm:$0xff]  ;;  %v3701_v23 = vld [vmem:[%s3689_s28 + $0x3c8] sm:$0xff] }
  0xc9   : > { %607 = vmatprep.subr.mxu1 %v514_v42  ;;  %v778_v19 = vld [vmem:[%s3689_s28 + $0x3c0] sm:$0xff]  ;;  %v2915_v26 = vcombine.low %v3698_v20, %v3701_v23  ;;  %v2916_v27 = vcombine.high %v3698_v20, %v3701_v23  ;;  %v691_v23 = vld [vmem:[%s3689_s28 + $0x108] sm:$0xff] }
  0xca   : > { %608 = vmatpush1.msra.mxu1 %v513_v43  ;;  %v2913_v21 = vcombine.low %v770_v18, %v778_v19  ;;  %v2914_v22 = vcombine.high %v770_v18, %v778_v19  ;;  %v754_v24 = vld [vmem:[%s3689_s28 + $0x300] sm:$0xff] }
  0xcb   : > { %609 = vmatprep.subr.mxu1 %v512_v44  ;;  %v762_v25 = vld [vmem:[%s3689_s28 + $0x340] sm:$0xff] }
  0xcc   : > { %610 = vmatpush1.msra.mxu1 %v511_v45  ;;  %v2898_v28 = vcombine.high %v754_v24, %v762_v25  ;;  %2278 = vmatprep.subr.bf16.mxu0 %v2914_v22  ;;  %v2897_v29 = vcombine.low %v754_v24, %v762_v25  ;;  %v738_v30 = vld [vmem:[%s3689_s28 + $0x280] sm:$0xff] }
  0xcd   : > { %611 = vmatprep.subr.mxu1 %v510_v46  ;;  %2279 = vmatpush1.bf16.msra.mxu0 %v2913_v21  ;;  %v746_v31 = vld [vmem:[%s3689_s28 + $0x2c0] sm:$0xff] }
  0xce   : > { %612 = vmatpush1.msra.mxu1 %v509_v47  ;;  %2280 = vmatprep.subr.bf16.mxu0 %v2898_v28  ;;  %v2882_v32 = vcombine.high %v738_v30, %v746_v31  ;;  %v2881_v33 = vcombine.low %v738_v30, %v746_v31  ;;  %v722_v34 = vld [vmem:[%s3689_s28 + $0x200] sm:$0xff]  ;;  %v755_v28 = vld [vmem:[%s3689_s28 + $0x308] sm:$0xff] }
  0xcf   : > { %613 = vmatprep.subr.mxu1 %v508_v48  ;;  %v730_v35 = vld [vmem:[%s3689_s28 + $0x240] sm:$0xff] }
  0xd0   : > { %614 = vmatpush1.msra.mxu1 %v507_v49  ;;  %v2866_v36 = vcombine.high %v722_v34, %v730_v35  ;;  %v2865_v37 = vcombine.low %v722_v34, %v730_v35  ;;  %v706_v38 = vld [vmem:[%s3689_s28 + $0x180] sm:$0xff]  ;;  %v747_v34 = vld [vmem:[%s3689_s28 + $0x2c8] sm:$0xff] }
  0xd1   : > { %615 = vmatprep.subr.mxu1 %v570_v50  ;;  %2281 = vmatpush1.bf16.msra.mxu0 %v2897_v29  ;;  %v714_v39 = vld [vmem:[%s3689_s28 + $0x1c0] sm:$0xff]  ;;  %v763_v29 = vld [vmem:[%s3689_s28 + $0x348] sm:$0xff] }
  0xd2   : > { %616 = vmatpush2.msra.mxu1 %v569_v51  ;;  %2282 = vmatprep.subr.bf16.mxu0 %v2882_v32  ;;  %v2850_v40 = vcombine.high %v706_v38, %v714_v39  ;;  %v2849_v41 = vcombine.low %v706_v38, %v714_v39  ;;  %v690_v42 = vld [vmem:[%s3689_s28 + $0x100] sm:$0xff]  ;;  %v2900_v32 = vcombine.high %v755_v28, %v763_v29  ;;  %v731_v38 = vld [vmem:[%s3689_s28 + $0x248] sm:$0xff] }
  0xd3   : > { %617 = vmatprep.subr.mxu1 %v568_v52  ;;  %v698_v43 = vld [vmem:[%s3689_s28 + $0x140] sm:$0xff]  ;;  %v2899_v35 = vcombine.low %v755_v28, %v763_v29 }
  0xd4   : > { %618 = vmatpush2.msra.mxu1 %v567_v53  ;;  %v2834_v44 = vcombine.high %v690_v42, %v698_v43  ;;  %v2833_v45 = vcombine.low %v690_v42, %v698_v43  ;;  %v674_v46 = vld [vmem:[%s3689_s28 + $0x80] sm:$0xff]  ;;  %v715_v42 = vld [vmem:[%s3689_s28 + $0x1c8] sm:$0xff] }
  0xd5   : > { %619 = vmatprep.subr.mxu1 %v566_v54  ;;  %2283 = vmatpush1.bf16.msra.mxu0 %v2881_v33  ;;  %v682_v47 = vld [vmem:[%s3689_s28 + $0xc0] sm:$0xff]  ;;  %v739_v33 = vld [vmem:[%s3689_s28 + $0x288] sm:$0xff] }
  0xd6   : > { %620 = vmatpush2.msra.mxu1 %v565_v55  ;;  %2284 = vmatprep.subr.bf16.mxu0 %v2866_v36  ;;  %v2818_v48 = vcombine.high %v674_v46, %v682_v47  ;;  %v2817_v49 = vcombine.low %v674_v46, %v682_v47  ;;  %v658_v50 = vld [vmem:[%s3689_s28] sm:$0xff]  ;;  %v2884_v36 = vcombine.high %v739_v33, %v747_v34  ;;  %v675_v46 = vld [vmem:[%s3689_s28 + $0x88] sm:$0xff] }
  0xd7   : > { %621 = vmatprep.subr.mxu1 %v564_v56  ;;  %v666_v51 = vld [vmem:[%s3689_s28 + $0x40] sm:$0xff]  ;;  %v2883_v39 = vcombine.low %v739_v33, %v747_v34  ;;  %v683_v47 = vld [vmem:[%s3689_s28 + $0xc8] sm:$0xff] }
  0xd8   : > { %622 = vmatpush2.msra.mxu1 %v563_v57  ;;  %v2802_v52 = vcombine.high %v658_v50, %v666_v51  ;;  %v2801_v53 = vcombine.low %v658_v50, %v666_v51  ;;  %v898_v54 = vld [vmem:[%s3689_s28 + $0x780] sm:$0xff]  ;;  %v659_v50 = vld [vmem:[%s3689_s28 + $0x8] sm:$0xff] }
  0xd9   : > { %623 = vmatprep.subr.mxu1 %v562_v58  ;;  %2285 = vmatpush1.bf16.msra.mxu0 %v2865_v37  ;;  %v906_v55 = vld [vmem:[%s3689_s28 + $0x7c0] sm:$0xff]  ;;  %v723_v37 = vld [vmem:[%s3689_s28 + $0x208] sm:$0xff] }
  0xda   : > { %624 = vmatpush2.msra.mxu1 %v561_v59  ;;  %2286 = vmatprep.subr.bf16.mxu0 %v2850_v40  ;;  %v3042_v56 = vcombine.high %v898_v54, %v906_v55  ;;  %v3041_v57 = vcombine.low %v898_v54, %v906_v55  ;;  %v882_v58 = vld [vmem:[%s3689_s28 + $0x700] sm:$0xff]  ;;  %v2868_v40 = vcombine.high %v723_v37, %v731_v38  ;;  %v667_v51 = vld [vmem:[%s3689_s28 + $0x48] sm:$0xff] }
  0xdb   : > { %625 = vmatprep.subr.mxu1 %v560_v60  ;;  %v890_v59 = vld [vmem:[%s3689_s28 + $0x740] sm:$0xff]  ;;  %v2867_v43 = vcombine.low %v723_v37, %v731_v38  ;;  %v899_v54 = vld [vmem:[%s3689_s28 + $0x788] sm:$0xff]  ;;  %v772_v37 = vld [vmem:[%s3689_s28 + $0x390] sm:$0xff] }
  0xdc   : > { %626 = vmatpush2.msra.mxu1 %v559_v61  ;;  %v3026_v60 = vcombine.high %v882_v58, %v890_v59  ;;  %v3025_v61 = vcombine.low %v882_v58, %v890_v59  ;;  %v907_v55 = vld [vmem:[%s3689_s28 + $0x7c8] sm:$0xff]  ;;  %v786_v29 = vld [vmem:[%s3689_s28 + $0x400] sm:$0xff]  ;;  %v780_v38 = vld [vmem:[%s3689_s28 + $0x3d0] sm:$0xff] }
  0xdd   : > { %627 = vmatprep.subr.mxu1 %v558_v62  ;;  %2287 = vmatpush1.bf16.msra.mxu0 %v2849_v41  ;;  %v866_v62 = vld [vmem:[%s3689_s28 + $0x680] sm:$0xff]  ;;  %v707_v41 = vld [vmem:[%s3689_s28 + $0x188] sm:$0xff] }
  0xde   : > { %628 = vmatpush2.msra.mxu1 %v557_v63  ;;  %2288 = vmatprep.subr.bf16.mxu0 %v2834_v44  ;;  %v874_v63 = vld [vmem:[%s3689_s28 + $0x6c0] sm:$0xff]  ;;  %v2852_v20 = vcombine.high %v707_v41, %v715_v42  ;;  %v2851_v44 = vcombine.low %v707_v41, %v715_v42  ;;  %v883_v58 = vld [vmem:[%s3689_s28 + $0x708] sm:$0xff]  ;;  %v781_v41 = vld [vmem:[%s3689_s28 + $0x3d8] sm:$0xff]  ;;  %v2917_v42 = vcombine.low %v772_v37, %v780_v38 }
  0xdf   : > { %629 = vmatprep.subr.mxu1 %v556_v0  ;;  %v3010_v0 = vcombine.high %v866_v62, %v874_v63  ;;  %v891_v59 = vld [vmem:[%s3689_s28 + $0x748] sm:$0xff] }
  0xe0   : > { %630 = vmatpush2.msra.mxu1 %v555_v1  ;;  %v3009_v1 = vcombine.low %v866_v62, %v874_v63  ;;  %v867_v62 = vld [vmem:[%s3689_s28 + $0x688] sm:$0xff] }
  0xe1   : > { %631 = vmatprep.subr.mxu1 %v554_v2  ;;  %2289 = vmatpush1.bf16.msra.mxu0 %v2833_v45  ;;  %v850_v2 = vld [vmem:[%s3689_s28 + $0x600] sm:$0xff]  ;;  %v875_v63 = vld [vmem:[%s3689_s28 + $0x6c8] sm:$0xff] }
  0xe2   : > { %632 = vmatpush2.msra.mxu1 %v553_v3  ;;  %2290 = vmatprep.subr.bf16.mxu0 %v2818_v48  ;;  %v858_v3 = vld [vmem:[%s3689_s28 + $0x640] sm:$0xff]  ;;  %v795_v33 = vld [vmem:[%s3689_s28 + $0x448] sm:$0xff] }
  0xe3   : > { %633 = vmatprep.subr.mxu1 %v552_v4  ;;  %v2994_v4 = vcombine.high %v850_v2, %v858_v3 }
  0xe4   : > { %634 = vmatpush2.msra.mxu1 %v551_v5  ;;  %v2993_v5 = vcombine.low %v850_v2, %v858_v3  ;;  %v851_v2 = vld [vmem:[%s3689_s28 + $0x608] sm:$0xff] }
  0xe5   : > { %635 = vmatprep.subr.mxu1 %v550_v6  ;;  %2291 = vmatpush1.bf16.msra.mxu0 %v2817_v49  ;;  %v834_v6 = vld [vmem:[%s3689_s28 + $0x580] sm:$0xff]  ;;  %v2820_v49 = vcombine.high %v675_v46, %v683_v47  ;;  %v859_v3 = vld [vmem:[%s3689_s28 + $0x648] sm:$0xff] }
  0xe6   : > { %636 = vmatpush2.msra.mxu1 %v549_v7  ;;  %2292 = vmatprep.subr.bf16.mxu0 %v2802_v52  ;;  %v842_v7 = vld [vmem:[%s3689_s28 + $0x5c0] sm:$0xff]  ;;  %v2819_v52 = vcombine.low %v675_v46, %v683_v47 }
  0xe7   : > { %637 = vmatprep.subr.mxu1 %v548_v8  ;;  %v2978_v8 = vcombine.high %v834_v6, %v842_v7 }
  0xe8   : > { %638 = vmatpush2.msra.mxu1 %v547_v9  ;;  %v2977_v9 = vcombine.low %v834_v6, %v842_v7  ;;  %v835_v6 = vld [vmem:[%s3689_s28 + $0x588] sm:$0xff] }
  0xe9   : > { %639 = vmatprep.subr.mxu1 %v546_v10  ;;  %2293 = vmatpush1.bf16.msra.mxu0 %v2801_v53  ;;  %v818_v10 = vld [vmem:[%s3689_s28 + $0x500] sm:$0xff]  ;;  %v2804_v53 = vcombine.high %v659_v50, %v667_v51  ;;  %v843_v7 = vld [vmem:[%s3689_s28 + $0x5c8] sm:$0xff] }
  0xea   : > { %640 = vmatpush2.msra.mxu1 %v545_v11  ;;  %2294 = vmatprep.subr.bf16.mxu0 %v3042_v56  ;;  %v826_v11 = vld [vmem:[%s3689_s28 + $0x540] sm:$0xff]  ;;  %v2803_v56 = vcombine.low %v659_v50, %v667_v51  ;;  %v756_v51 = vld [vmem:[%s3689_s28 + $0x310] sm:$0xff] }
  0xeb   : > { %641 = vmatprep.subr.mxu1 %v544_v12  ;;  %v2962_v12 = vcombine.high %v818_v10, %v826_v11 }
  0xec   : > { %642 = vmatpush2.msra.mxu1 %v543_v13  ;;  %v2961_v13 = vcombine.low %v818_v10, %v826_v11  ;;  %v819_v10 = vld [vmem:[%s3689_s28 + $0x508] sm:$0xff] }
  0xed   : > { %643 = vmatprep.subr.mxu1 %v542_v14  ;;  %2295 = vmatpush2.bf16.msra.mxu0 %v3041_v57  ;;  %v420_v14 = vlaneseq  ;;  %v3044_v57 = vcombine.high %v899_v54, %v907_v55  ;;  %v827_v11 = vld [vmem:[%s3689_s28 + $0x548] sm:$0xff] }
  0xee   : > { %644 = vmatpush2.msra.mxu1 %v541_v15  ;;  %2296 = vmatprep.subr.bf16.mxu0 %v3026_v60  ;;  %v3043_v60 = vcombine.low %v899_v54, %v907_v55  ;;  %v765_v54 = vld [vmem:[%s3689_s28 + $0x358] sm:$0xff] }
  0xef   : > { %645 = vmatprep.subr.mxu1 %v540_v16  ;;  %v3733_v15 = vshrl.u32 %v420_v14, 7  ;;  %v2963_v14 = vcombine.low %v819_v10, %v827_v11 }
  0xf0   : > { %646 = vmatpush2.msra.mxu1 %v539_v17  ;;  %v418_v17 = vld [vmem:[#allocation7] sm:$0x3] }
  0xf1   : > { %2319 = vmatprep.subr.bf16.mxu1 %v2916_v27  ;;  %2297 = vmatpush2.bf16.msra.mxu0 %v3025_v61  ;;  %v3736_v16 = vsub.s32 0, %v3733_v15  ;;  %v3739_v18 = vsub.s32 1, %v3733_v15  ;;  %v3028_v61 = vcombine.high %v883_v58, %v891_v59 }
  0xf2   : > { %2298 = vmatprep.subr.bf16.mxu0 %v3010_v0  ;;  %v3027_v0 = vcombine.low %v883_v58, %v891_v59 }
  0xf3   : > { %v423_v19 = vrot.slane %v418_v17, %v3736_v16  ;;  %v427_v21 = vrot.slane %v418_v17, %v3739_v18  ;;  %v802_v17 = vld [vmem:[%s3689_s28 + $0x480] sm:$0xff] }
  0xf5   : > { %2299 = vmatpush2.bf16.msra.mxu0 %v3009_v1  ;;  %v3012_v1 = vcombine.high %v867_v62, %v875_v63 }
  0xf6   : > { %2300 = vmatprep.subr.bf16.mxu0 %v2994_v4  ;;  %v3011_v4 = vcombine.low %v867_v62, %v875_v63  ;;  %v749_v62 = vld [vmem:[%s3689_s28 + $0x2d8] sm:$0xff] }
  0xf9   : > { %2301 = vmatpush2.bf16.msra.mxu0 %v2993_v5  ;;  %v2996_v5 = vcombine.high %v851_v2, %v859_v3 }
  0xfa   : > { %2302 = vmatprep.subr.bf16.mxu0 %v2978_v8  ;;  %v2995_v8 = vcombine.low %v851_v2, %v859_v3  ;;  %v724_v3 = vld [vmem:[%s3689_s28 + $0x210] sm:$0xff] }
  0xfd   : > { %2303 = vmatpush2.bf16.msra.mxu0 %v2977_v9  ;;  %v2980_v9 = vcombine.high %v835_v6, %v843_v7 }
  0xfe   : > { %2304 = vmatprep.subr.bf16.mxu0 %v2962_v12  ;;  %v2979_v12 = vcombine.low %v835_v6, %v843_v7  ;;  %v733_v6 = vld [vmem:[%s3689_s28 + $0x258] sm:$0xff] }
 0x101   : > { %2305 = vmatpush2.bf16.msra.mxu0 %v2961_v13  ;;  %v2964_v13 = vcombine.high %v819_v10, %v827_v11  ;;  %v708_v11 = vld [vmem:[%s3689_s28 + $0x190] sm:$0xff] }
 0x17d   : > { %v500_v22 = vpop.f32.mrf.mxu0 }
 0x17e   : > { %v501_v24 = vadd.f32 %v500_v22, %v423_v19  ;;  %v810_v19 = vld [vmem:[%s3689_s28 + $0x4c0] sm:$0xff] }
 0x17f   : > { %v502_v25 = vpop.f32.mrf.mxu0  ;;  %v2946_v22 = vcombine.high %v802_v17, %v810_v19 }
 0x180   : > { %v503_v27 = vadd.f32 %v502_v25, %v427_v21  ;;  %v505_v31 = vmax.f32 %v501_v24, 0.0  ;;  %v803_v21 = vld [vmem:[%s3689_s28 + $0x488] sm:$0xff]  ;;  %v2945_v25 = vcombine.low %v802_v17, %v810_v19 }
 0x181   : > { %v811_v24 = vld [vmem:[%s3689_s28 + $0x4c8] sm:$0xff]  ;;  %2306 = vmatprep.subr.bf16.mxu0 %v2946_v22 }
 0x182   : > { %v506_v30 = vmax.f32 %v503_v27, 0.0  ;;  %v2947_v27 = vcombine.low %v803_v21, %v811_v24  ;;  %v2948_v28 = vcombine.high %v803_v21, %v811_v24  ;;  %2307 = vmatpush2.bf16.msra.mxu0 %v2945_v25  ;;  %v692_v24 = vld [vmem:[%s3689_s28 + $0x110] sm:$0xff] }
 0x183   : > { %v700_v25 = vld [vmem:[%s3689_s28 + $0x150] sm:$0xff] }
 0x184   : > { %647 = vmatprep.mubr.f32.mxu1 %v506_v30  ;;  %v794_v30 = vld [vmem:[%s3689_s28 + $0x440] sm:$0xff] }
 0x185   : > { %648 = vmatmul.mubr.f32.vlgmr.msra.gmra.mxu1 %v505_v31  ;;  %v787_v31 = vld [vmem:[%s3689_s28 + $0x408] sm:$0xff]  ;;  %v2929_v34 = vcombine.low %v786_v29, %v794_v30 }
 0x186   : > { %2320 = vmatpush1.bf16.msra.mxu1 %v2915_v26  ;;  %v699_v26 = vld [vmem:[%s3689_s28 + $0x148] sm:$0xff] }
 0x187   : > { %2321 = vmatprep.subr.bf16.mxu1 %v2900_v32  ;;  %v2836_v45 = vcombine.high %v691_v23, %v699_v26  ;;  %v2835_v48 = vcombine.low %v691_v23, %v699_v26  ;;  %v2930_v32 = vcombine.high %v786_v29, %v794_v30  ;;  %v571_v23 = vld [vmem:[#allocation10] sm:$0x3] }
 0x188   : > { %v576_v26 = vrot.slane %v571_v23, %v3736_v16 }
 0x189   : > { %2308 = vmatprep.subr.bf16.mxu0 %v2930_v32 }
 0x18a   : > { %2322 = vmatpush1.bf16.msra.mxu1 %v2899_v35  ;;  %v2931_v35 = vcombine.low %v787_v31, %v795_v33  ;;  %2309 = vmatpush2.bf16.msra.mxu0 %v2929_v34  ;;  %v684_v34 = vld [vmem:[%s3689_s28 + $0xd0] sm:$0xff] }
 0x18b   : > { %2323 = vmatprep.subr.bf16.mxu1 %v2884_v36  ;;  %v2932_v36 = vcombine.high %v787_v31, %v795_v33  ;;  %v2838_v31 = vcombine.high %v692_v24, %v700_v25  ;;  %v676_v33 = vld [vmem:[%s3689_s28 + $0x90] sm:$0xff] }
 0x18e   : > { %2324 = vmatpush1.bf16.msra.mxu1 %v2883_v39  ;;  %v773_v39 = vld [vmem:[%s3689_s28 + $0x398] sm:$0xff] }
 0x18f   : > { %2325 = vmatprep.subr.bf16.mxu1 %v2868_v40  ;;  %v2918_v40 = vcombine.high %v772_v37, %v780_v38  ;;  %v2837_v37 = vcombine.low %v692_v24, %v700_v25  ;;  %v845_v24 = vld [vmem:[%s3689_s28 + $0x5d8] sm:$0xff] }
 0x191   : > { %2360 = vmatprep.subr.bf16.mxu0 %v2918_v40 }
 0x192   : > { %2326 = vmatpush1.bf16.msra.mxu1 %v2867_v43  ;;  %v2919_v43 = vcombine.low %v773_v39, %v781_v41 }
 0x193   : > { %2327 = vmatprep.subr.bf16.mxu1 %v2852_v20  ;;  %v2920_v20 = vcombine.high %v773_v39, %v781_v41  ;;  %v2822_v39 = vcombine.high %v676_v33, %v684_v34  ;;  %v660_v41 = vld [vmem:[%s3689_s28 + $0x10] sm:$0xff] }
 0x196   : > { %2328 = vmatpush1.bf16.msra.mxu1 %v2851_v44  ;;  %v580_v44 = vrot.slane %v571_v23, %v3739_v18  ;;  %v2821_v23 = vcombine.low %v676_v33, %v684_v34  ;;  %v829_v33 = vld [vmem:[%s3689_s28 + $0x558] sm:$0xff] }
 0x197   : > { %2329 = vmatprep.subr.bf16.mxu1 %v2836_v45 }
 0x19a   : > { %2330 = vmatpush1.bf16.msra.mxu1 %v2835_v48 }
 0x19b   : > { %2331 = vmatprep.subr.bf16.mxu1 %v2820_v49 }
 0x19e   : > { %2332 = vmatpush1.bf16.msra.mxu1 %v2819_v52  ;;  %v764_v52 = vld [vmem:[%s3689_s28 + $0x350] sm:$0xff] }
 0x19f   : > { %2333 = vmatprep.subr.bf16.mxu1 %v2804_v53  ;;  %v757_v53 = vld [vmem:[%s3689_s28 + $0x318] sm:$0xff]  ;;  %v2902_v58 = vcombine.high %v756_v51, %v764_v52  ;;  %v2901_v63 = vcombine.low %v756_v51, %v764_v52 }
 0x1a0   : > { %v2904_v59 = vcombine.high %v757_v53, %v765_v54 }
 0x1a2   : > { %2334 = vmatpush1.bf16.msra.mxu1 %v2803_v56 }
 0x1a3   : > { %2335 = vmatprep.subr.bf16.mxu1 %v3044_v57  ;;  %v740_v57 = vld [vmem:[%s3689_s28 + $0x290] sm:$0xff] }
 0x1a6   : > { %2336 = vmatpush2.bf16.msra.mxu1 %v3043_v60  ;;  %v748_v60 = vld [vmem:[%s3689_s28 + $0x2d0] sm:$0xff] }
 0x1a7   : > { %2337 = vmatprep.subr.bf16.mxu1 %v3028_v61  ;;  %v741_v61 = vld [vmem:[%s3689_s28 + $0x298] sm:$0xff]  ;;  %v2885_v7 = vcombine.low %v740_v57, %v748_v60 }
 0x1a8   : > { %v2888_v2 = vcombine.high %v741_v61, %v749_v62 }
 0x1aa   : > { %2338 = vmatpush2.bf16.msra.mxu1 %v3027_v0  ;;  %v2903_v0 = vcombine.low %v757_v53, %v765_v54  ;;  %v884_v54 = vld [vmem:[%s3689_s28 + $0x710] sm:$0xff] }
 0x1ab   : > { %2339 = vmatprep.subr.bf16.mxu1 %v3012_v1  ;;  %v2886_v1 = vcombine.high %v740_v57, %v748_v60  ;;  %v892_v57 = vld [vmem:[%s3689_s28 + $0x750] sm:$0xff] }
 0x1ae   : > { %2340 = vmatpush2.bf16.msra.mxu1 %v3011_v4  ;;  %v732_v4 = vld [vmem:[%s3689_s28 + $0x250] sm:$0xff] }
 0x1af   : > { %2341 = vmatprep.subr.bf16.mxu1 %v2996_v5  ;;  %v725_v5 = vld [vmem:[%s3689_s28 + $0x218] sm:$0xff]  ;;  %v2869_v17 = vcombine.low %v724_v3, %v732_v4 }
 0x1b0   : > { %v2872_v10 = vcombine.high %v725_v5, %v733_v6  ;;  %v2871_v19 = vcombine.low %v725_v5, %v733_v6 }
 0x1b2   : > { %2342 = vmatpush2.bf16.msra.mxu1 %v2995_v8  ;;  %v2887_v8 = vcombine.low %v741_v61, %v749_v62  ;;  %v3030_v62 = vcombine.high %v884_v54, %v892_v57 }
 0x1b3   : > { %2343 = vmatprep.subr.bf16.mxu1 %v2980_v9  ;;  %v2870_v9 = vcombine.high %v724_v3, %v732_v4  ;;  %v877_v3 = vld [vmem:[%s3689_s28 + $0x6d8] sm:$0xff]  ;;  %v3029_v4 = vcombine.low %v884_v54, %v892_v57  ;;  %v783_v54 = vld [vmem:[%s3689_s28 + $0x3e8] sm:$0xff] }
 0x1b6   : > { %2344 = vmatpush2.bf16.msra.mxu1 %v2979_v12  ;;  %v716_v12 = vld [vmem:[%s3689_s28 + $0x1d0] sm:$0xff] }
 0x1b7   : > { %2345 = vmatprep.subr.bf16.mxu1 %v2964_v13  ;;  %v709_v13 = vld [vmem:[%s3689_s28 + $0x198] sm:$0xff]  ;;  %v2854_v21 = vcombine.high %v708_v11, %v716_v12  ;;  %v2853_v29 = vcombine.low %v708_v11, %v716_v12 }
 0x1b8   : > { %v861_v11 = vld [vmem:[%s3689_s28 + $0x658] sm:$0xff] }
 0x1ba   : > { %2346 = vmatpush2.bf16.msra.mxu1 %v2963_v14  ;;  %v717_v14 = vld [vmem:[%s3689_s28 + $0x1d8] sm:$0xff] }
 0x1bb   : > { %2347 = vmatprep.subr.bf16.mxu1 %v2948_v28  ;;  %v2856_v22 = vcombine.high %v709_v13, %v717_v14  ;;  %v701_v28 = vld [vmem:[%s3689_s28 + $0x158] sm:$0xff]  ;;  %v2855_v30 = vcombine.low %v709_v13, %v717_v14 }
 0x1be   : > { %2348 = vmatpush2.bf16.msra.mxu1 %v2947_v27  ;;  %v693_v27 = vld [vmem:[%s3689_s28 + $0x118] sm:$0xff] }
 0x1bf   : > { %2349 = vmatprep.subr.bf16.mxu1 %v2932_v36  ;;  %v2840_v32 = vcombine.high %v693_v27, %v701_v28  ;;  %v685_v36 = vld [vmem:[%s3689_s28 + $0xd8] sm:$0xff]  ;;  %v2839_v38 = vcombine.low %v693_v27, %v701_v28 }
 0x1c2   : > { %2350 = vmatpush2.bf16.msra.mxu1 %v2931_v35  ;;  %v677_v35 = vld [vmem:[%s3689_s28 + $0x98] sm:$0xff] }
 0x1c3   : > { %2401 = vmatprep.subr.bf16.mxu1 %v2920_v20  ;;  %v2824_v40 = vcombine.high %v677_v35, %v685_v36  ;;  %v669_v20 = vld [vmem:[%s3689_s28 + $0x58] sm:$0xff] }
 0x245   : > { %v649_v45 = vpop.f32.mrf.mxu1 }
 0x246   : > { %v650_v46 = vadd.f32 %v649_v45, %v576_v26  ;;  %v2823_v26 = vcombine.low %v677_v35, %v685_v36 }
 0x247   : > { %v651_v47 = vpop.f32.mrf.mxu1 }
 0x248   : > { %v652_v48 = vadd.f32 %v651_v47, %v580_v44  ;;  %v654_v49 = vmax.f32 %v650_v46, 0.0  ;;  %v900_v46 = vld [vmem:[%s3689_s28 + $0x790] sm:$0xff] }
 0x249   : > { %v908_v47 = vld [vmem:[%s3689_s28 + $0x7d0] sm:$0xff] }
 0x24a   : > { %v655_v50 = vmax.f32 %v652_v48, 0.0  ;;  %v3792_v56 = vpack.c.bf16 %v654_v49, %v654_v49  ;;  %v901_v48 = vld [vmem:[%s3689_s28 + $0x798] sm:$0xff]  ;;  %v3046_v52 = vcombine.high %v900_v46, %v908_v47  ;;  %v3045_v60 = vcombine.low %v900_v46, %v908_v47 }
 0x24b   : > { %v909_v49 = vld [vmem:[%s3689_s28 + $0x7d8] sm:$0xff] }
 0x24c   : > { %v3790_v55 = vpack.c.bf16 %v655_v50, %v655_v50  ;;  %v3048_v53 = vcombine.high %v901_v48, %v909_v49  ;;  %v3047_v61 = vcombine.low %v901_v48, %v909_v49  ;;  %v797_v46 = vld [vmem:[%s3689_s28 + $0x458] sm:$0xff] }
 0x24e   : > { %2310 = vmatprep.mubr.bf16.mxu0 %v3790_v55  ;;  %2351 = vmatprep.mubr.bf16.mxu1 %v3790_v55 }
 0x24f   : > { %2311 = vmatmul.mubr.bf16.vlgmr.msra.gmra.mxu0 %v3792_v56  ;;  %2352 = vmatmul.mubr.bf16.vlgmr.msra.gmra.mxu1 %v3792_v56 }
 0x250   : > { %2361 = vmatpush1.bf16.msra.mxu0 %v2917_v42  ;;  %2402 = vmatpush1.bf16.msra.mxu1 %v2919_v43  ;;  %v668_v42 = vld [vmem:[%s3689_s28 + $0x50] sm:$0xff]  ;;  %v661_v43 = vld [vmem:[%s3689_s28 + $0x18] sm:$0xff] }
 0x251   : > { %2392 = vmatprep.mubr.bf16.mxu0 %v3790_v55  ;;  %2433 = vmatprep.mubr.bf16.mxu1 %v3790_v55  ;;  %v2806_v44 = vcombine.high %v660_v41, %v668_v42  ;;  %v2808_v45 = vcombine.high %v661_v43, %v669_v20  ;;  %v2805_v50 = vcombine.low %v660_v41, %v668_v42  ;;  %v813_v41 = vld [vmem:[%s3689_s28 + $0x4d8] sm:$0xff] }
 0x252   : > { %2362 = vmatprep.subr.bf16.mxu0 %v2902_v58  ;;  %2403 = vmatprep.subr.bf16.mxu1 %v2904_v59  ;;  %v2807_v51 = vcombine.low %v661_v43, %v669_v20  ;;  %v885_v58 = vld [vmem:[%s3689_s28 + $0x718] sm:$0xff] }
 0x253   : > { %v893_v59 = vld [vmem:[%s3689_s28 + $0x758] sm:$0xff] }
 0x254   : > { %2363 = vmatpush1.bf16.msra.mxu0 %v2901_v63  ;;  %2404 = vmatpush1.bf16.msra.mxu1 %v2903_v0  ;;  %v3032_v63 = vcombine.high %v885_v58, %v893_v59  ;;  %v868_v0 = vld [vmem:[%s3689_s28 + $0x690] sm:$0xff]  ;;  %v3031_v5 = vcombine.low %v885_v58, %v893_v59 }
 0x255   : > { %2364 = vmatprep.subr.bf16.mxu0 %v2886_v1  ;;  %2405 = vmatprep.subr.bf16.mxu1 %v2888_v2  ;;  %v876_v1 = vld [vmem:[%s3689_s28 + $0x6d0] sm:$0xff]  ;;  %v869_v2 = vld [vmem:[%s3689_s28 + $0x698] sm:$0xff] }
 0x256   : > { %v3014_v6 = vcombine.high %v868_v0, %v876_v1  ;;  %v3013_v12 = vcombine.low %v868_v0, %v876_v1  ;;  %v3015_v13 = vcombine.low %v869_v2, %v877_v3  ;;  %v767_v0 = vld [vmem:[%s3689_s28 + $0x368] sm:$0xff] }
 0x258   : > { %2365 = vmatpush1.bf16.msra.mxu0 %v2885_v7  ;;  %2406 = vmatpush1.bf16.msra.mxu1 %v2887_v8  ;;  %v3016_v7 = vcombine.high %v869_v2, %v877_v3  ;;  %v852_v8 = vld [vmem:[%s3689_s28 + $0x610] sm:$0xff] }
 0x259   : > { %2366 = vmatprep.subr.bf16.mxu0 %v2870_v9  ;;  %2407 = vmatprep.subr.bf16.mxu1 %v2872_v10  ;;  %v860_v9 = vld [vmem:[%s3689_s28 + $0x650] sm:$0xff]  ;;  %v853_v10 = vld [vmem:[%s3689_s28 + $0x618] sm:$0xff] }
 0x25a   : > { %v2998_v14 = vcombine.high %v852_v8, %v860_v9  ;;  %v2997_v25 = vcombine.low %v852_v8, %v860_v9  ;;  %v2999_v27 = vcombine.low %v853_v10, %v861_v11  ;;  %v751_v8 = vld [vmem:[%s3689_s28 + $0x2e8] sm:$0xff] }
 0x25c   : > { %2367 = vmatpush1.bf16.msra.mxu0 %v2869_v17  ;;  %2408 = vmatpush1.bf16.msra.mxu1 %v2871_v19  ;;  %v3000_v17 = vcombine.high %v853_v10, %v861_v11  ;;  %v836_v19 = vld [vmem:[%s3689_s28 + $0x590] sm:$0xff] }
 0x25d   : > { %2368 = vmatprep.subr.bf16.mxu0 %v2854_v21  ;;  %2409 = vmatprep.subr.bf16.mxu1 %v2856_v22  ;;  %v844_v21 = vld [vmem:[%s3689_s28 + $0x5d0] sm:$0xff]  ;;  %v837_v22 = vld [vmem:[%s3689_s28 + $0x598] sm:$0xff] }
 0x25e   : > { %v2982_v28 = vcombine.high %v836_v19, %v844_v21  ;;  %v2981_v34 = vcombine.low %v836_v19, %v844_v21  ;;  %v2983_v35 = vcombine.low %v837_v22, %v845_v24  ;;  %v735_v19 = vld [vmem:[%s3689_s28 + $0x268] sm:$0xff] }
 0x260   : > { %2369 = vmatpush1.bf16.msra.mxu0 %v2853_v29  ;;  %2410 = vmatpush1.bf16.msra.mxu1 %v2855_v30  ;;  %v2984_v29 = vcombine.high %v837_v22, %v845_v24  ;;  %v820_v30 = vld [vmem:[%s3689_s28 + $0x510] sm:$0xff] }
 0x261   : > { %2370 = vmatprep.subr.bf16.mxu0 %v2838_v31  ;;  %2411 = vmatprep.subr.bf16.mxu1 %v2840_v32  ;;  %v828_v31 = vld [vmem:[%s3689_s28 + $0x550] sm:$0xff]  ;;  %v821_v32 = vld [vmem:[%s3689_s28 + $0x518] sm:$0xff] }
 0x262   : > { %v2966_v36 = vcombine.high %v820_v30, %v828_v31  ;;  %v2965_v42 = vcombine.low %v820_v30, %v828_v31  ;;  %v2967_v43 = vcombine.low %v821_v32, %v829_v33  ;;  %v719_v30 = vld [vmem:[%s3689_s28 + $0x1e8] sm:$0xff] }
 0x264   : > { %2371 = vmatpush1.bf16.msra.mxu0 %v2837_v37  ;;  %2412 = vmatpush1.bf16.msra.mxu1 %v2839_v38  ;;  %v2968_v37 = vcombine.high %v821_v32, %v829_v33  ;;  %v804_v38 = vld [vmem:[%s3689_s28 + $0x490] sm:$0xff] }
 0x265   : > { %2372 = vmatprep.subr.bf16.mxu0 %v2822_v39  ;;  %2413 = vmatprep.subr.bf16.mxu1 %v2824_v40  ;;  %v812_v39 = vld [vmem:[%s3689_s28 + $0x4d0] sm:$0xff]  ;;  %v805_v40 = vld [vmem:[%s3689_s28 + $0x498] sm:$0xff] }
 0x266   : > { %v2950_v20 = vcombine.high %v804_v38, %v812_v39  ;;  %v2949_v47 = vcombine.low %v804_v38, %v812_v39  ;;  %v2951_v48 = vcombine.low %v805_v40, %v813_v41  ;;  %v703_v38 = vld [vmem:[%s3689_s28 + $0x168] sm:$0xff] }
 0x268   : > { %2373 = vmatpush1.bf16.msra.mxu0 %v2821_v23  ;;  %2414 = vmatpush1.bf16.msra.mxu1 %v2823_v26  ;;  %v2952_v23 = vcombine.high %v805_v40, %v813_v41  ;;  %v788_v26 = vld [vmem:[%s3689_s28 + $0x410] sm:$0xff] }
 0x269   : > { %2374 = vmatprep.subr.bf16.mxu0 %v2806_v44  ;;  %2415 = vmatprep.subr.bf16.mxu1 %v2808_v45  ;;  %v796_v44 = vld [vmem:[%s3689_s28 + $0x450] sm:$0xff]  ;;  %v789_v45 = vld [vmem:[%s3689_s28 + $0x418] sm:$0xff] }
 0x26a   : > { %v2934_v49 = vcombine.high %v788_v26, %v796_v44  ;;  %v2933_v57 = vcombine.low %v788_v26, %v796_v44  ;;  %v2935_v58 = vcombine.low %v789_v45, %v797_v46  ;;  %v687_v26 = vld [vmem:[%s3689_s28 + $0xe8] sm:$0xff] }
 0x26c   : > { %2375 = vmatpush1.bf16.msra.mxu0 %v2805_v50  ;;  %2416 = vmatpush1.bf16.msra.mxu1 %v2807_v51  ;;  %v2936_v50 = vcombine.high %v789_v45, %v797_v46  ;;  %v774_v51 = vld [vmem:[%s3689_s28 + $0x3a0] sm:$0xff] }
 0x26d   : > { %2376 = vmatprep.subr.bf16.mxu0 %v3046_v52  ;;  %2417 = vmatprep.subr.bf16.mxu1 %v3048_v53  ;;  %v782_v52 = vld [vmem:[%s3689_s28 + $0x3e0] sm:$0xff]  ;;  %v775_v53 = vld [vmem:[%s3689_s28 + $0x3a8] sm:$0xff] }
 0x26e   : > { %v2922_v59 = vcombine.high %v774_v51, %v782_v52  ;;  %v2921_v1 = vcombine.low %v774_v51, %v782_v52  ;;  %v2923_v2 = vcombine.low %v775_v53, %v783_v54  ;;  %v671_v51 = vld [vmem:[%s3689_s28 + $0x68] sm:$0xff] }
 0x270   : > { %2377 = vmatpush2.bf16.msra.mxu0 %v3045_v60  ;;  %2418 = vmatpush2.bf16.msra.mxu1 %v3047_v61  ;;  %v2924_v60 = vcombine.high %v775_v53, %v783_v54  ;;  %v758_v61 = vld [vmem:[%s3689_s28 + $0x320] sm:$0xff] }
 0x271   : > { %2378 = vmatprep.subr.bf16.mxu0 %v3030_v62  ;;  %2419 = vmatprep.subr.bf16.mxu1 %v3032_v63  ;;  %v766_v62 = vld [vmem:[%s3689_s28 + $0x360] sm:$0xff]  ;;  %v759_v63 = vld [vmem:[%s3689_s28 + $0x328] sm:$0xff] }
 0x272   : > { %v2906_v3 = vcombine.high %v758_v61, %v766_v62  ;;  %v2905_v9 = vcombine.low %v758_v61, %v766_v62  ;;  %v2907_v10 = vcombine.low %v759_v63, %v767_v0  ;;  %v911_v61 = vld [vmem:[%s3689_s28 + $0x7e8] sm:$0xff] }
 0x274   : > { %2379 = vmatpush2.bf16.msra.mxu0 %v3029_v4  ;;  %2420 = vmatpush2.bf16.msra.mxu1 %v3031_v5  ;;  %v2908_v4 = vcombine.high %v759_v63, %v767_v0  ;;  %v742_v5 = vld [vmem:[%s3689_s28 + $0x2a0] sm:$0xff] }
 0x275   : > { %2380 = vmatprep.subr.bf16.mxu0 %v3014_v6  ;;  %2421 = vmatprep.subr.bf16.mxu1 %v3016_v7  ;;  %v750_v6 = vld [vmem:[%s3689_s28 + $0x2e0] sm:$0xff]  ;;  %v743_v7 = vld [vmem:[%s3689_s28 + $0x2a8] sm:$0xff] }
 0x276   : > { %v2890_v11 = vcombine.high %v742_v5, %v750_v6  ;;  %v2889_v21 = vcombine.low %v742_v5, %v750_v6  ;;  %v2891_v22 = vcombine.low %v743_v7, %v751_v8  ;;  %v895_v5 = vld [vmem:[%s3689_s28 + $0x768] sm:$0xff] }
 0x278   : > { %2381 = vmatpush2.bf16.msra.mxu0 %v3013_v12  ;;  %2422 = vmatpush2.bf16.msra.mxu1 %v3015_v13  ;;  %v2892_v12 = vcombine.high %v743_v7, %v751_v8  ;;  %v726_v13 = vld [vmem:[%s3689_s28 + $0x220] sm:$0xff] }
 0x279   : > { %2382 = vmatprep.subr.bf16.mxu0 %v2998_v14  ;;  %2423 = vmatprep.subr.bf16.mxu1 %v3000_v17  ;;  %v734_v14 = vld [vmem:[%s3689_s28 + $0x260] sm:$0xff]  ;;  %v727_v17 = vld [vmem:[%s3689_s28 + $0x228] sm:$0xff] }
 0x27a   : > { %v2874_v24 = vcombine.high %v726_v13, %v734_v14  ;;  %v2873_v31 = vcombine.low %v726_v13, %v734_v14  ;;  %v2875_v32 = vcombine.low %v727_v17, %v735_v19  ;;  %v879_v13 = vld [vmem:[%s3689_s28 + $0x6e8] sm:$0xff] }
 0x27c   : > { %2383 = vmatpush2.bf16.msra.mxu0 %v2997_v25  ;;  %2424 = vmatpush2.bf16.msra.mxu1 %v2999_v27  ;;  %v2876_v25 = vcombine.high %v727_v17, %v735_v19  ;;  %v710_v27 = vld [vmem:[%s3689_s28 + $0x1a0] sm:$0xff] }
 0x27d   : > { %2384 = vmatprep.subr.bf16.mxu0 %v2982_v28  ;;  %2425 = vmatprep.subr.bf16.mxu1 %v2984_v29  ;;  %v718_v28 = vld [vmem:[%s3689_s28 + $0x1e0] sm:$0xff]  ;;  %v711_v29 = vld [vmem:[%s3689_s28 + $0x1a8] sm:$0xff] }
 0x27e   : > { %v2858_v33 = vcombine.high %v710_v27, %v718_v28  ;;  %v2857_v39 = vcombine.low %v710_v27, %v718_v28  ;;  %v2859_v40 = vcombine.low %v711_v29, %v719_v30  ;;  %v863_v27 = vld [vmem:[%s3689_s28 + $0x668] sm:$0xff] }
 0x280   : > { %2385 = vmatpush2.bf16.msra.mxu0 %v2981_v34  ;;  %2426 = vmatpush2.bf16.msra.mxu1 %v2983_v35  ;;  %v2860_v34 = vcombine.high %v711_v29, %v719_v30  ;;  %v694_v35 = vld [vmem:[%s3689_s28 + $0x120] sm:$0xff] }
 0x281   : > { %2386 = vmatprep.subr.bf16.mxu0 %v2966_v36  ;;  %2427 = vmatprep.subr.bf16.mxu1 %v2968_v37  ;;  %v702_v36 = vld [vmem:[%s3689_s28 + $0x160] sm:$0xff]  ;;  %v695_v37 = vld [vmem:[%s3689_s28 + $0x128] sm:$0xff] }
 0x282   : > { %v2842_v41 = vcombine.high %v694_v35, %v702_v36  ;;  %v2841_v44 = vcombine.low %v694_v35, %v702_v36  ;;  %v2843_v45 = vcombine.low %v695_v37, %v703_v38  ;;  %v847_v35 = vld [vmem:[%s3689_s28 + $0x5e8] sm:$0xff] }
 0x284   : > { %2387 = vmatpush2.bf16.msra.mxu0 %v2965_v42  ;;  %2428 = vmatpush2.bf16.msra.mxu1 %v2967_v43  ;;  %v2844_v42 = vcombine.high %v695_v37, %v703_v38  ;;  %v678_v43 = vld [vmem:[%s3689_s28 + $0xa0] sm:$0xff] }
 0x285   : > { %2388 = vmatprep.subr.bf16.mxu0 %v2950_v20  ;;  %2429 = vmatprep.subr.bf16.mxu1 %v2952_v23  ;;  %v686_v20 = vld [vmem:[%s3689_s28 + $0xe0] sm:$0xff]  ;;  %v679_v23 = vld [vmem:[%s3689_s28 + $0xa8] sm:$0xff] }
 0x286   : > { %v2826_v46 = vcombine.high %v678_v43, %v686_v20  ;;  %v2825_v52 = vcombine.low %v678_v43, %v686_v20  ;;  %v2827_v53 = vcombine.low %v679_v23, %v687_v26  ;;  %v831_v43 = vld [vmem:[%s3689_s28 + $0x568] sm:$0xff] }
 0x288   : > { %2389 = vmatpush2.bf16.msra.mxu0 %v2949_v47  ;;  %2430 = vmatpush2.bf16.msra.mxu1 %v2951_v48  ;;  %v2828_v47 = vcombine.high %v679_v23, %v687_v26  ;;  %v662_v48 = vld [vmem:[%s3689_s28 + $0x20] sm:$0xff] }
 0x289   : > { %2390 = vmatprep.subr.bf16.mxu0 %v2934_v49  ;;  %2431 = vmatprep.subr.bf16.mxu1 %v2936_v50  ;;  %v670_v49 = vld [vmem:[%s3689_s28 + $0x60] sm:$0xff]  ;;  %v663_v50 = vld [vmem:[%s3689_s28 + $0x28] sm:$0xff] }
 0x28a   : > { %v2810_v54 = vcombine.high %v662_v48, %v670_v49  ;;  %v2809_v62 = vcombine.low %v662_v48, %v670_v49  ;;  %v2811_v63 = vcombine.low %v663_v50, %v671_v51  ;;  %v815_v48 = vld [vmem:[%s3689_s28 + $0x4e8] sm:$0xff] }
 0x28c   : > { %2391 = vmatpush2.bf16.msra.mxu0 %v2933_v57  ;;  %2432 = vmatpush2.bf16.msra.mxu1 %v2935_v58  ;;  %v2812_v57 = vcombine.high %v663_v50, %v671_v51  ;;  %v902_v58 = vld [vmem:[%s3689_s28 + $0x7a0] sm:$0xff] }
 0x28d   : > { %2442 = vmatprep.subr.bf16.mxu0 %v2922_v59  ;;  %2483 = vmatprep.subr.bf16.mxu1 %v2924_v60  ;;  %v910_v59 = vld [vmem:[%s3689_s28 + $0x7e0] sm:$0xff]  ;;  %v903_v60 = vld [vmem:[%s3689_s28 + $0x7a8] sm:$0xff] }
 0x28e   : > { %v3050_v0 = vcombine.high %v902_v58, %v910_v59  ;;  %v3049_v6 = vcombine.low %v902_v58, %v910_v59  ;;  %v3051_v7 = vcombine.low %v903_v60, %v911_v61  ;;  %v799_v58 = vld [vmem:[%s3689_s28 + $0x468] sm:$0xff] }
 0x28f   : > { %2393 = vmatmul.mubr.bf16.vlgmr.msra.gmra.mxu0 %v3792_v56  ;;  %2434 = vmatmul.mubr.bf16.vlgmr.msra.gmra.mxu1 %v3792_v56 }
 0x290   : > { %2443 = vmatpush1.bf16.msra.mxu0 %v2921_v1  ;;  %2474 = vmatprep.mubr.bf16.mxu0 %v3790_v55  ;;  %v3052_v1 = vcombine.high %v903_v60, %v911_v61 }
 0x291   : > { %2484 = vmatpush1.bf16.msra.mxu1 %v2923_v2  ;;  %2515 = vmatprep.mubr.bf16.mxu1 %v3790_v55  ;;  %v886_v2 = vld [vmem:[%s3689_s28 + $0x720] sm:$0xff] }
 0x292   : > { %2444 = vmatprep.subr.bf16.mxu0 %v2906_v3  ;;  %2485 = vmatprep.subr.bf16.mxu1 %v2908_v4  ;;  %v894_v3 = vld [vmem:[%s3689_s28 + $0x760] sm:$0xff]  ;;  %v887_v4 = vld [vmem:[%s3689_s28 + $0x728] sm:$0xff] }
 0x293   : > { %v3034_v8 = vcombine.high %v886_v2, %v894_v3  ;;  %v3033_v14 = vcombine.low %v886_v2, %v894_v3  ;;  %v3035_v17 = vcombine.low %v887_v4, %v895_v5  ;;  %v785_v2 = vld [vmem:[%s3689_s28 + $0x3f8] sm:$0xff] }
 0x294   : > { %2445 = vmatpush1.bf16.msra.mxu0 %v2905_v9  ;;  %v3036_v9 = vcombine.high %v887_v4, %v895_v5 }
 0x295   : > { %2486 = vmatpush1.bf16.msra.mxu1 %v2907_v10  ;;  %2446 = vmatprep.subr.bf16.mxu0 %v2890_v11  ;;  %v870_v10 = vld [vmem:[%s3689_s28 + $0x6a0] sm:$0xff] }
 0x296   : > { %2487 = vmatprep.subr.bf16.mxu1 %v2892_v12  ;;  %v878_v11 = vld [vmem:[%s3689_s28 + $0x6e0] sm:$0xff]  ;;  %v871_v12 = vld [vmem:[%s3689_s28 + $0x6a8] sm:$0xff] }
 0x297   : > { %v3018_v19 = vcombine.high %v870_v10, %v878_v11  ;;  %v3017_v28 = vcombine.low %v870_v10, %v878_v11  ;;  %v3019_v29 = vcombine.low %v871_v12, %v879_v13  ;;  %v761_v10 = vld [vmem:[%s3689_s28 + $0x338] sm:$0xff] }
 0x298   : > { %2447 = vmatpush1.bf16.msra.mxu0 %v2889_v21  ;;  %v3020_v21 = vcombine.high %v871_v12, %v879_v13  ;;  %v769_v11 = vld [vmem:[%s3689_s28 + $0x378] sm:$0xff] }
 0x299   : > { %2488 = vmatpush1.bf16.msra.mxu1 %v2891_v22  ;;  %2448 = vmatprep.subr.bf16.mxu0 %v2874_v24  ;;  %v854_v22 = vld [vmem:[%s3689_s28 + $0x620] sm:$0xff] }
 0x29a   : > { %2489 = vmatprep.subr.bf16.mxu1 %v2876_v25  ;;  %v862_v24 = vld [vmem:[%s3689_s28 + $0x660] sm:$0xff]  ;;  %v855_v25 = vld [vmem:[%s3689_s28 + $0x628] sm:$0xff] }
 0x29b   : > { %v3002_v30 = vcombine.high %v854_v22, %v862_v24  ;;  %v3001_v36 = vcombine.low %v854_v22, %v862_v24  ;;  %v3003_v37 = vcombine.low %v855_v25, %v863_v27  ;;  %v753_v22 = vld [vmem:[%s3689_s28 + $0x2f8] sm:$0xff] }
 0x29c   : > { %2449 = vmatpush1.bf16.msra.mxu0 %v2873_v31  ;;  %v3004_v31 = vcombine.high %v855_v25, %v863_v27  ;;  %v2911_v25 = vcombine.low %v761_v10, %v769_v11 }
 0x29d   : > { %2490 = vmatpush1.bf16.msra.mxu1 %v2875_v32  ;;  %2450 = vmatprep.subr.bf16.mxu0 %v2858_v33  ;;  %v838_v32 = vld [vmem:[%s3689_s28 + $0x5a0] sm:$0xff] }
 0x29e   : > { %2491 = vmatprep.subr.bf16.mxu1 %v2860_v34  ;;  %v846_v33 = vld [vmem:[%s3689_s28 + $0x5e0] sm:$0xff]  ;;  %v839_v34 = vld [vmem:[%s3689_s28 + $0x5a8] sm:$0xff] }
 0x29f   : > { %v2986_v38 = vcombine.high %v838_v32, %v846_v33  ;;  %v2985_v20 = vcombine.low %v838_v32, %v846_v33  ;;  %v2987_v23 = vcombine.low %v839_v34, %v847_v35  ;;  %v737_v32 = vld [vmem:[%s3689_s28 + $0x278] sm:$0xff] }
 0x2a0   : > { %2451 = vmatpush1.bf16.msra.mxu0 %v2857_v39  ;;  %v2988_v39 = vcombine.high %v839_v34, %v847_v35 }
 0x2a1   : > { %2492 = vmatpush1.bf16.msra.mxu1 %v2859_v40  ;;  %2452 = vmatprep.subr.bf16.mxu0 %v2842_v41  ;;  %v822_v40 = vld [vmem:[%s3689_s28 + $0x520] sm:$0xff] }
 0x2a2   : > { %2493 = vmatprep.subr.bf16.mxu1 %v2844_v42  ;;  %v830_v41 = vld [vmem:[%s3689_s28 + $0x560] sm:$0xff]  ;;  %v823_v42 = vld [vmem:[%s3689_s28 + $0x528] sm:$0xff] }
 0x2a3   : > { %v2970_v26 = vcombine.high %v822_v40, %v830_v41  ;;  %v2969_v49 = vcombine.low %v822_v40, %v830_v41  ;;  %v2971_v50 = vcombine.low %v823_v42, %v831_v43 }
 0x2a4   : > { %2453 = vmatpush1.bf16.msra.mxu0 %v2841_v44  ;;  %v2972_v44 = vcombine.high %v823_v42, %v831_v43 }
 0x2a5   : > { %2494 = vmatpush1.bf16.msra.mxu1 %v2843_v45  ;;  %2454 = vmatprep.subr.bf16.mxu0 %v2826_v46  ;;  %v806_v45 = vld [vmem:[%s3689_s28 + $0x4a0] sm:$0xff] }
 0x2a6   : > { %2495 = vmatprep.subr.bf16.mxu1 %v2828_v47  ;;  %v814_v46 = vld [vmem:[%s3689_s28 + $0x4e0] sm:$0xff]  ;;  %v807_v47 = vld [vmem:[%s3689_s28 + $0x4a8] sm:$0xff] }
 0x2a7   : > { %v2954_v51 = vcombine.high %v806_v45, %v814_v46  ;;  %v2953_v59 = vcombine.low %v806_v45, %v814_v46  ;;  %v2955_v60 = vcombine.low %v807_v47, %v815_v48 }
 0x2a8   : > { %2455 = vmatpush1.bf16.msra.mxu0 %v2825_v52  ;;  %v2956_v52 = vcombine.high %v807_v47, %v815_v48 }
 0x2a9   : > { %2496 = vmatpush1.bf16.msra.mxu1 %v2827_v53  ;;  %2456 = vmatprep.subr.bf16.mxu0 %v2810_v54  ;;  %v790_v53 = vld [vmem:[%s3689_s28 + $0x420] sm:$0xff] }
 0x2aa   : > { %2497 = vmatprep.subr.bf16.mxu1 %v2812_v57  ;;  %v798_v54 = vld [vmem:[%s3689_s28 + $0x460] sm:$0xff]  ;;  %v791_v57 = vld [vmem:[%s3689_s28 + $0x428] sm:$0xff] }
 0x2ab   : > { %v2938_v61 = vcombine.high %v790_v53, %v798_v54  ;;  %v2937_v3 = vcombine.low %v790_v53, %v798_v54  ;;  %v2939_v4 = vcombine.low %v791_v57, %v799_v58 }
 0x2ac   : > { %2457 = vmatpush1.bf16.msra.mxu0 %v2809_v62  ;;  %v2940_v62 = vcombine.high %v791_v57, %v799_v58 }
 0x2ad   : > { %2498 = vmatpush1.bf16.msra.mxu1 %v2811_v63  ;;  %2458 = vmatprep.subr.bf16.mxu0 %v3050_v0  ;;  %v776_v63 = vld [vmem:[%s3689_s28 + $0x3b0] sm:$0xff] }
 0x2ae   : > { %2499 = vmatprep.subr.bf16.mxu1 %v3052_v1  ;;  %v784_v0 = vld [vmem:[%s3689_s28 + $0x3f0] sm:$0xff]  ;;  %v777_v1 = vld [vmem:[%s3689_s28 + $0x3b8] sm:$0xff] }
 0x2af   : > { %v2926_v5 = vcombine.high %v776_v63, %v784_v0  ;;  %v2927_v12 = vcombine.low %v777_v1, %v785_v2 }
 0x2b0   : > { %2459 = vmatpush2.bf16.msra.mxu0 %v3049_v6  ;;  %v2928_v6 = vcombine.high %v777_v1, %v785_v2 }
 0x2b1   : > { %2500 = vmatpush2.bf16.msra.mxu1 %v3051_v7  ;;  %2460 = vmatprep.subr.bf16.mxu0 %v3034_v8  ;;  %v760_v7 = vld [vmem:[%s3689_s28 + $0x330] sm:$0xff] }
 0x2b2   : > { %2501 = vmatprep.subr.bf16.mxu1 %v3036_v9  ;;  %v768_v8 = vld [vmem:[%s3689_s28 + $0x370] sm:$0xff]  ;;  %v2925_v9 = vcombine.low %v776_v63, %v784_v0 }
 0x2b3   : > { %v2910_v13 = vcombine.high %v760_v7, %v768_v8  ;;  %v2909_v24 = vcombine.low %v760_v7, %v768_v8 }
 0x2b4   : > { %2461 = vmatpush2.bf16.msra.mxu0 %v3033_v14  ;;  %v744_v14 = vld [vmem:[%s3689_s28 + $0x2b0] sm:$0xff] }
 0x2b5   : > { %2502 = vmatpush2.bf16.msra.mxu1 %v3035_v17  ;;  %2462 = vmatprep.subr.bf16.mxu0 %v3018_v19  ;;  %v752_v17 = vld [vmem:[%s3689_s28 + $0x2f0] sm:$0xff]  ;;  %v2912_v19 = vcombine.high %v761_v10, %v769_v11 }
 0x2b6   : > { %2503 = vmatprep.subr.bf16.mxu1 %v3020_v21  ;;  %v745_v21 = vld [vmem:[%s3689_s28 + $0x2b8] sm:$0xff]  ;;  %v2894_v27 = vcombine.high %v744_v14, %v752_v17  ;;  %v2893_v33 = vcombine.low %v744_v14, %v752_v17  ;;  %v888_v11 = vld [vmem:[%s3689_s28 + $0x730] sm:$0xff] }
 0x2b7   : > { %v2895_v34 = vcombine.low %v745_v21, %v753_v22  ;;  %v897_v14 = vld [vmem:[%s3689_s28 + $0x778] sm:$0xff] }
 0x2b8   : > { %2463 = vmatpush2.bf16.msra.mxu0 %v3017_v28  ;;  %v2896_v28 = vcombine.high %v745_v21, %v753_v22 }
 0x2b9   : > { %2504 = vmatpush2.bf16.msra.mxu1 %v3019_v29  ;;  %2464 = vmatprep.subr.bf16.mxu0 %v3002_v30  ;;  %v728_v29 = vld [vmem:[%s3689_s28 + $0x230] sm:$0xff] }
 0x2ba   : > { %2505 = vmatprep.subr.bf16.mxu1 %v3004_v31  ;;  %v736_v30 = vld [vmem:[%s3689_s28 + $0x270] sm:$0xff]  ;;  %v729_v31 = vld [vmem:[%s3689_s28 + $0x238] sm:$0xff] }
 0x2bb   : > { %v2878_v35 = vcombine.high %v728_v29, %v736_v30  ;;  %v2877_v40 = vcombine.low %v728_v29, %v736_v30  ;;  %v2879_v41 = vcombine.low %v729_v31, %v737_v32 }
 0x2bc   : > { %2465 = vmatpush2.bf16.msra.mxu0 %v3001_v36  ;;  %v712_v36 = vld [vmem:[%s3689_s28 + $0x1b0] sm:$0xff] }
 0x2bd   : > { %2506 = vmatpush2.bf16.msra.mxu1 %v3003_v37  ;;  %2466 = vmatprep.subr.bf16.mxu0 %v2986_v38  ;;  %v720_v37 = vld [vmem:[%s3689_s28 + $0x1f0] sm:$0xff]  ;;  %v713_v38 = vld [vmem:[%s3689_s28 + $0x1b8] sm:$0xff] }
 0x2be   : > { %2507 = vmatprep.subr.bf16.mxu1 %v2988_v39  ;;  %v721_v39 = vld [vmem:[%s3689_s28 + $0x1f8] sm:$0xff]  ;;  %v2862_v42 = vcombine.high %v712_v36, %v720_v37  ;;  %v2861_v45 = vcombine.low %v712_v36, %v720_v37 }
 0x2bf   : > { %v2864_v43 = vcombine.high %v713_v38, %v721_v39  ;;  %v2863_v46 = vcombine.low %v713_v38, %v721_v39 }
 0x2c0   : > { %2467 = vmatpush2.bf16.msra.mxu0 %v2985_v20  ;;  %v696_v20 = vld [vmem:[%s3689_s28 + $0x130] sm:$0xff] }
 0x2c1   : > { %2508 = vmatpush2.bf16.msra.mxu1 %v2987_v23  ;;  %2468 = vmatprep.subr.bf16.mxu0 %v2970_v26  ;;  %v704_v23 = vld [vmem:[%s3689_s28 + $0x170] sm:$0xff]  ;;  %v697_v26 = vld [vmem:[%s3689_s28 + $0x138] sm:$0xff] }
 0x2c2   : > { %2509 = vmatprep.subr.bf16.mxu1 %v2972_v44  ;;  %v705_v44 = vld [vmem:[%s3689_s28 + $0x178] sm:$0xff]  ;;  %v2846_v47 = vcombine.high %v696_v20, %v704_v23  ;;  %v2845_v53 = vcombine.low %v696_v20, %v704_v23 }
 0x2c3   : > { %v2848_v48 = vcombine.high %v697_v26, %v705_v44  ;;  %v2847_v54 = vcombine.low %v697_v26, %v705_v44 }
 0x2c4   : > { %2469 = vmatpush2.bf16.msra.mxu0 %v2969_v49  ;;  %v680_v49 = vld [vmem:[%s3689_s28 + $0xb0] sm:$0xff] }
 0x2c5   : > { %2510 = vmatpush2.bf16.msra.mxu1 %v2971_v50  ;;  %2470 = vmatprep.subr.bf16.mxu0 %v2954_v51  ;;  %v688_v50 = vld [vmem:[%s3689_s28 + $0xf0] sm:$0xff]  ;;  %v681_v51 = vld [vmem:[%s3689_s28 + $0xb8] sm:$0xff] }
 0x2c6   : > { %2511 = vmatprep.subr.bf16.mxu1 %v2956_v52  ;;  %v689_v52 = vld [vmem:[%s3689_s28 + $0xf8] sm:$0xff]  ;;  %v2830_v57 = vcombine.high %v680_v49, %v688_v50  ;;  %v2829_v63 = vcombine.low %v680_v49, %v688_v50 }
 0x2c7   : > { %v2832_v58 = vcombine.high %v681_v51, %v689_v52  ;;  %v2831_v0 = vcombine.low %v681_v51, %v689_v52 }
 0x2c8   : > { %2471 = vmatpush2.bf16.msra.mxu0 %v2953_v59  ;;  %v664_v59 = vld [vmem:[%s3689_s28 + $0x30] sm:$0xff] }
 0x2c9   : > { %2512 = vmatpush2.bf16.msra.mxu1 %v2955_v60  ;;  %2472 = vmatprep.subr.bf16.mxu0 %v2938_v61  ;;  %v672_v60 = vld [vmem:[%s3689_s28 + $0x70] sm:$0xff]  ;;  %v665_v61 = vld [vmem:[%s3689_s28 + $0x38] sm:$0xff] }
 0x2ca   : > { %2513 = vmatprep.subr.bf16.mxu1 %v2940_v62  ;;  %v673_v62 = vld [vmem:[%s3689_s28 + $0x78] sm:$0xff]  ;;  %v2814_v1 = vcombine.high %v664_v59, %v672_v60  ;;  %v2813_v7 = vcombine.low %v664_v59, %v672_v60 }
 0x2cb   : > { %v2816_v2 = vcombine.high %v665_v61, %v673_v62  ;;  %v2815_v8 = vcombine.low %v665_v61, %v673_v62 }
 0x2cc   : > { %2473 = vmatpush2.bf16.msra.mxu0 %v2937_v3  ;;  %v904_v3 = vld [vmem:[%s3689_s28 + $0x7b0] sm:$0xff] }
 0x2cd   : > { %2514 = vmatpush2.bf16.msra.mxu1 %v2939_v4  ;;  %2524 = vmatprep.subr.bf16.mxu0 %v2926_v5  ;;  %v912_v4 = vld [vmem:[%s3689_s28 + $0x7f0] sm:$0xff]  ;;  %v905_v5 = vld [vmem:[%s3689_s28 + $0x7b8] sm:$0xff] }
 0x2ce   : > { %2565 = vmatprep.subr.bf16.mxu1 %v2928_v6  ;;  %v913_v6 = vld [vmem:[%s3689_s28 + $0x7f8] sm:$0xff]  ;;  %v3053_v17 = vcombine.low %v904_v3, %v912_v4 }
 0x2cf   : > { %2475 = vmatmul.mubr.bf16.vlgmr.msra.gmra.mxu0 %v3792_v56  ;;  %v3056_v10 = vcombine.high %v905_v5, %v913_v6 }
 0x2d0   : > { %2516 = vmatmul.mubr.bf16.vlgmr.msra.gmra.mxu1 %v3792_v56  ;;  %2525 = vmatpush1.bf16.msra.mxu0 %v2925_v9  ;;  %v3054_v9 = vcombine.high %v904_v3, %v912_v4 }
 0x2d1   : > { %2556 = vmatprep.mubr.bf16.mxu0 %v3790_v55  ;;  %2566 = vmatpush1.bf16.msra.mxu1 %v2927_v12  ;;  %v896_v12 = vld [vmem:[%s3689_s28 + $0x770] sm:$0xff] }
 0x2d2   : > { %2597 = vmatprep.mubr.bf16.mxu1 %v3790_v55  ;;  %2526 = vmatprep.subr.bf16.mxu0 %v2910_v13  ;;  %v2880_v55 = vcombine.high %v729_v31, %v737_v32  ;;  %v889_v13 = vld [vmem:[%s3689_s28 + $0x738] sm:$0xff]  ;;  %v3038_v21 = vcombine.high %v888_v11, %v896_v12  ;;  %v3037_v29 = vcombine.low %v888_v11, %v896_v12  ;;  %v932_v11 = vsub.s32 3, %v3733_v15 }
 0x2d3   : > { %2567 = vmatprep.subr.bf16.mxu1 %v2912_v19  ;;  %v3055_v19 = vcombine.low %v905_v5, %v913_v6  ;;  %v3040_v22 = vcombine.high %v889_v13, %v897_v14  ;;  %v3039_v30 = vcombine.low %v889_v13, %v897_v14 }
 0x2d4   : > { %2527 = vmatpush1.bf16.msra.mxu0 %v2909_v24  ;;  %v872_v24 = vld [vmem:[%s3689_s28 + $0x6b0] sm:$0xff] }
 0x2d5   : > { %2568 = vmatpush1.bf16.msra.mxu1 %v2911_v25  ;;  %2528 = vmatprep.subr.bf16.mxu0 %v2894_v27  ;;  %v880_v25 = vld [vmem:[%s3689_s28 + $0x6f0] sm:$0xff]  ;;  %v873_v27 = vld [vmem:[%s3689_s28 + $0x6b8] sm:$0xff] }
 0x2d6   : > { %2569 = vmatprep.subr.bf16.mxu1 %v2896_v28  ;;  %v881_v28 = vld [vmem:[%s3689_s28 + $0x6f8] sm:$0xff]  ;;  %v3022_v31 = vcombine.high %v872_v24, %v880_v25  ;;  %v3021_v36 = vcombine.low %v872_v24, %v880_v25 }
 0x2d7   : > { %v3024_v32 = vcombine.high %v873_v27, %v881_v28  ;;  %v3023_v37 = vcombine.low %v873_v27, %v881_v28 }
 0x2d8   : > { %2529 = vmatpush1.bf16.msra.mxu0 %v2893_v33  ;;  %v856_v33 = vld [vmem:[%s3689_s28 + $0x630] sm:$0xff] }
 0x2d9   : > { %2570 = vmatpush1.bf16.msra.mxu1 %v2895_v34  ;;  %2530 = vmatprep.subr.bf16.mxu0 %v2878_v35  ;;  %v864_v34 = vld [vmem:[%s3689_s28 + $0x670] sm:$0xff]  ;;  %v857_v35 = vld [vmem:[%s3689_s28 + $0x638] sm:$0xff] }
 0x2da   : > { %2571 = vmatprep.subr.bf16.mxu1 %v2880_v55  ;;  %v865_v55 = vld [vmem:[%s3689_s28 + $0x678] sm:$0xff]  ;;  %v3006_v38 = vcombine.high %v856_v33, %v864_v34  ;;  %v3005_v20 = vcombine.low %v856_v33, %v864_v34  ;;  %v936_v33 = vsub.s32 4, %v3733_v15  ;;  %v944_v34 = vsub.s32 6, %v3733_v15 }
 0x2db   : > { %v3008_v39 = vcombine.high %v857_v35, %v865_v55  ;;  %v3007_v23 = vcombine.low %v857_v35, %v865_v55  ;;  %v940_v35 = vsub.s32 5, %v3733_v15  ;;  %v948_v55 = vsub.s32 7, %v3733_v15 }
 0x2dc   : > { %2531 = vmatpush1.bf16.msra.mxu0 %v2877_v40  ;;  %v840_v40 = vld [vmem:[%s3689_s28 + $0x5b0] sm:$0xff] }
 0x2dd   : > { %2572 = vmatpush1.bf16.msra.mxu1 %v2879_v41  ;;  %2532 = vmatprep.subr.bf16.mxu0 %v2862_v42  ;;  %v848_v41 = vld [vmem:[%s3689_s28 + $0x5f0] sm:$0xff]  ;;  %v841_v42 = vld [vmem:[%s3689_s28 + $0x5b8] sm:$0xff] }
 0x2de   : > { %2573 = vmatprep.subr.bf16.mxu1 %v2864_v43  ;;  %v849_v43 = vld [vmem:[%s3689_s28 + $0x5f8] sm:$0xff]  ;;  %v2990_v26 = vcombine.high %v840_v40, %v848_v41  ;;  %v2989_v49 = vcombine.low %v840_v40, %v848_v41 }
 0x2df   : > { %v2992_v44 = vcombine.high %v841_v42, %v849_v43  ;;  %v2991_v50 = vcombine.low %v841_v42, %v849_v43 }
 0x2e0   : > { %2533 = vmatpush1.bf16.msra.mxu0 %v2861_v45  ;;  %v824_v45 = vld [vmem:[%s3689_s28 + $0x530] sm:$0xff] }
 0x2e1   : > { %2574 = vmatpush1.bf16.msra.mxu1 %v2863_v46  ;;  %2534 = vmatprep.subr.bf16.mxu0 %v2846_v47  ;;  %v832_v46 = vld [vmem:[%s3689_s28 + $0x570] sm:$0xff]  ;;  %v825_v47 = vld [vmem:[%s3689_s28 + $0x538] sm:$0xff] }
 0x2e2   : > { %2575 = vmatprep.subr.bf16.mxu1 %v2848_v48  ;;  %v833_v48 = vld [vmem:[%s3689_s28 + $0x578] sm:$0xff]  ;;  %v2974_v51 = vcombine.high %v824_v45, %v832_v46  ;;  %v2973_v59 = vcombine.low %v824_v45, %v832_v46 }
 0x2e3   : > { %v2976_v52 = vcombine.high %v825_v47, %v833_v48  ;;  %v2975_v60 = vcombine.low %v825_v47, %v833_v48  ;;  %v915_v48 = vld [vmem:[%s3994_s9 + $0x8] sm:$0xff] }
 0x2e4   : > { %2535 = vmatpush1.bf16.msra.mxu0 %v2845_v53  ;;  %v808_v53 = vld [vmem:[%s3689_s28 + $0x4b0] sm:$0xff] }
 0x2e5   : > { %2576 = vmatpush1.bf16.msra.mxu1 %v2847_v54  ;;  %2536 = vmatprep.subr.bf16.mxu0 %v2830_v57  ;;  %v816_v54 = vld [vmem:[%s3689_s28 + $0x4f0] sm:$0xff]  ;;  %v809_v57 = vld [vmem:[%s3689_s28 + $0x4b8] sm:$0xff] }
 0x2e6   : > { %2577 = vmatprep.subr.bf16.mxu1 %v2832_v58  ;;  %v817_v58 = vld [vmem:[%s3689_s28 + $0x4f8] sm:$0xff]  ;;  %v2958_v61 = vcombine.high %v808_v53, %v816_v54  ;;  %v2957_v3 = vcombine.low %v808_v53, %v816_v54  ;;  %v965_v53 = vrot.slane %v915_v48, %v932_v11 }
 0x2e7   : > { %v2960_v62 = vcombine.high %v809_v57, %v817_v58  ;;  %v2959_v4 = vcombine.low %v809_v57, %v817_v58 }
 0x2e8   : > { %2537 = vmatpush1.bf16.msra.mxu0 %v2829_v63  ;;  %v792_v63 = vld [vmem:[%s3689_s28 + $0x430] sm:$0xff] }
 0x2e9   : > { %2578 = vmatpush1.bf16.msra.mxu1 %v2831_v0  ;;  %2538 = vmatprep.subr.bf16.mxu0 %v2814_v1  ;;  %v800_v0 = vld [vmem:[%s3689_s28 + $0x470] sm:$0xff]  ;;  %v793_v1 = vld [vmem:[%s3689_s28 + $0x438] sm:$0xff] }
 0x2ea   : > { %2579 = vmatprep.subr.bf16.mxu1 %v2816_v2  ;;  %v801_v2 = vld [vmem:[%s3689_s28 + $0x478] sm:$0xff]  ;;  %v2942_v5 = vcombine.high %v792_v63, %v800_v0 }
 0x2eb   : > { %v2944_v6 = vcombine.high %v793_v1, %v801_v2 }
 0x2ec   : > { %2539 = vmatpush1.bf16.msra.mxu0 %v2813_v7  ;;  %v2941_v7 = vcombine.low %v792_v63, %v800_v0 }
 0x2ed   : > { %2580 = vmatpush1.bf16.msra.mxu1 %v2815_v8  ;;  %2540 = vmatprep.subr.bf16.mxu0 %v3054_v9  ;;  %v928_v8 = vsub.s32 2, %v3733_v15  ;;  %v2943_v9 = vcombine.low %v793_v1, %v801_v2  ;;  %v969_v1 = vrot.slane %v915_v48, %v936_v33  ;;  %v977_v2 = vrot.slane %v915_v48, %v944_v34 }
 0x2ee   : > { %2581 = vmatprep.subr.bf16.mxu1 %v3056_v10  ;;  %v914_v10 = vld [vmem:[%s3994_s9] sm:$0xff] }
 0x2ef   : > { %v921_v12 = vrot.slane %v914_v10, %v3736_v16  ;;  %v929_v13 = vrot.slane %v914_v10, %v928_v8  ;;  %v925_v14 = vrot.slane %v914_v10, %v3739_v18 }
 0x2f0   : > { %2541 = vmatpush2.bf16.msra.mxu0 %v3053_v17  ;;  %v933_v17 = vrot.slane %v914_v10, %v932_v11 }
 0x2f1   : > { %2582 = vmatpush2.bf16.msra.mxu1 %v3055_v19  ;;  %2542 = vmatprep.subr.bf16.mxu0 %v3038_v21 }
 0x2f2   : > { %2583 = vmatprep.subr.bf16.mxu1 %v3040_v22 }
 0x2f4   : > { %2543 = vmatpush2.bf16.msra.mxu0 %v3037_v29 }
 0x2f5   : > { %2584 = vmatpush2.bf16.msra.mxu1 %v3039_v30  ;;  %2544 = vmatprep.subr.bf16.mxu0 %v3022_v31 }
 0x2f6   : > { %2585 = vmatprep.subr.bf16.mxu1 %v3024_v32 }
 0x2f8   : > { %2545 = vmatpush2.bf16.msra.mxu0 %v3021_v36  ;;  %v937_v36 = vrot.slane %v914_v10, %v936_v33 }
 0x2f9   : > { %2586 = vmatpush2.bf16.msra.mxu1 %v3023_v37  ;;  %2546 = vmatprep.subr.bf16.mxu0 %v3006_v38  ;;  %v945_v37 = vrot.slane %v914_v10, %v944_v34  ;;  %v941_v38 = vrot.slane %v914_v10, %v940_v35 }
 0x2fa   : > { %2587 = vmatprep.subr.bf16.mxu1 %v3008_v39  ;;  %v949_v39 = vrot.slane %v914_v10, %v948_v55 }
 0x2fc   : > { %2547 = vmatpush2.bf16.msra.mxu0 %v3005_v20 }
 0x2fd   : > { %2588 = vmatpush2.bf16.msra.mxu1 %v3007_v23  ;;  %2548 = vmatprep.subr.bf16.mxu0 %v2990_v26 }
 0x2fe   : > { %2589 = vmatprep.subr.bf16.mxu1 %v2992_v44 }
 0x300   : > { %2549 = vmatpush2.bf16.msra.mxu0 %v2989_v49  ;;  %v953_v49 = vrot.slane %v915_v48, %v3736_v16 }
 0x301   : > { %2590 = vmatpush2.bf16.msra.mxu1 %v2991_v50  ;;  %2550 = vmatprep.subr.bf16.mxu0 %v2974_v51  ;;  %v961_v50 = vrot.slane %v915_v48, %v928_v8  ;;  %v957_v51 = vrot.slane %v915_v48, %v3739_v18 }
 0x302   : > { %2591 = vmatprep.subr.bf16.mxu1 %v2976_v52 }
 0x304   : > { %2551 = vmatpush2.bf16.msra.mxu0 %v2973_v59 }
 0x305   : > { %2592 = vmatpush2.bf16.msra.mxu1 %v2975_v60  ;;  %2552 = vmatprep.subr.bf16.mxu0 %v2958_v61 }
 0x306   : > { %2593 = vmatprep.subr.bf16.mxu1 %v2960_v62 }
 0x308   : > { %2553 = vmatpush2.bf16.msra.mxu0 %v2957_v3  ;;  %v973_v3 = vrot.slane %v915_v48, %v940_v35 }
 0x309   : > { %2594 = vmatpush2.bf16.msra.mxu1 %v2959_v4  ;;  %2554 = vmatprep.subr.bf16.mxu0 %v2942_v5  ;;  %v981_v5 = vrot.slane %v915_v48, %v948_v55 }
 0x30a   : > { %2595 = vmatprep.subr.bf16.mxu1 %v2944_v6 }
 0x30c   : > { %2555 = vmatpush2.bf16.msra.mxu0 %v2941_v7 }
 0x30d   : > { %2596 = vmatpush2.bf16.msra.mxu1 %v2943_v9 }
 0x30f   : > { %2557 = vmatmul.mubr.bf16.vlgmr.msra.gmra.mxu0 %v3792_v56  ;;  %v2312_v19 = vpop.f32.mrf.mxu0  ;;  %v2353_v21 = vpop.f32.mrf.mxu1 }
 0x310   : > { %2598 = vmatmul.mubr.bf16.vlgmr.msra.gmra.mxu1 %v3792_v56  ;;  %v2313_v22 = vadd.f32 %v2312_v19, %v921_v12  ;;  %v2354_v24 = vadd.f32 %v2353_v21, %v929_v13 }
 0x311   : > { %v2314_v25 = vpop.f32.mrf.mxu0  ;;  %v2355_v27 = vpop.f32.mrf.mxu1 }
 0x312   : > { %2606 = vst [vmem:[%s4003_s12] sm:$0xff] %v2313_v22  ;;  %2608 = vst [vmem:[%s4003_s12 + $0x10] sm:$0xff] %v2354_v24  ;;  %v2315_v28 = vadd.f32 %v2314_v25, %v925_v14  ;;  %v2356_v29 = vadd.f32 %v2355_v27, %v933_v17 }
 0x313   : > { %v2316_v30 = vpop.f32.mrf.mxu0  ;;  %v2357_v31 = vpop.f32.mrf.mxu1 }
 0x314   : > { %2607 = vst [vmem:[%s4003_s12 + $0x8] sm:$0xff] %v2315_v28  ;;  %2609 = vst [vmem:[%s4003_s12 + $0x18] sm:$0xff] %v2356_v29 }
 0x315   : > { %v2317_v32 = vpop.f32.mrf.mxu0  ;;  %v2358_v56 = vpop.f32.mrf.mxu1 }
 0x34f   : > { %v2394_v40 = vpop.f32.mrf.mxu0  ;;  %v2435_v41 = vpop.f32.mrf.mxu1 }
 0x350   : > { %v2395_v42 = vadd.f32 %v2394_v40, %v937_v36  ;;  %v2436_v43 = vadd.f32 %v2435_v41, %v945_v37 }
 0x351   : > { %v2396_v20 = vpop.f32.mrf.mxu0  ;;  %v2437_v23 = vpop.f32.mrf.mxu1 }
 0x352   : > { %2610 = vst [vmem:[%s4003_s12 + $0x20] sm:$0xff] %v2395_v42  ;;  %2612 = vst [vmem:[%s4003_s12 + $0x30] sm:$0xff] %v2436_v43  ;;  %v2397_v26 = vadd.f32 %v2396_v20, %v941_v38  ;;  %v2438_v44 = vadd.f32 %v2437_v23, %v949_v39 }
 0x353   : > { %v2398_v45 = vpop.f32.mrf.mxu0  ;;  %v2439_v15 = vpop.f32.mrf.mxu1 }
 0x354   : > { %2611 = vst [vmem:[%s4003_s12 + $0x28] sm:$0xff] %v2397_v26  ;;  %2613 = vst [vmem:[%s4003_s12 + $0x38] sm:$0xff] %v2438_v44 }
 0x355   : > { %v2399_v46 = vpop.f32.mrf.mxu0  ;;  %v2440_v47 = vpop.f32.mrf.mxu1 }
 0x38f   : > { %v2476_v52 = vpop.f32.mrf.mxu0 }
 0x390   : > { %v2477_v54 = vadd.f32 %v2476_v52, %v953_v49  ;;  %v2517_v57 = vpop.f32.mrf.mxu1 }
 0x391   : > { %v2518_v58 = vadd.f32 %v2517_v57, %v961_v50  ;;  %v2478_v59 = vpop.f32.mrf.mxu0 }
 0x392   : > { %2614 = vst [vmem:[%s4003_s12 + $0x40] sm:$0xff] %v2477_v54  ;;  %v2479_v60 = vadd.f32 %v2478_v59, %v957_v51  ;;  %v2519_v61 = vpop.f32.mrf.mxu1 }
 0x393   : > { %2616 = vst [vmem:[%s4003_s12 + $0x50] sm:$0xff] %v2518_v58  ;;  %v2520_v62 = vadd.f32 %v2519_v61, %v965_v53  ;;  %v2480_v63 = vpop.f32.mrf.mxu0 }
 0x394   : > { %2615 = vst [vmem:[%s4003_s12 + $0x48] sm:$0xff] %v2479_v60  ;;  %v2521_v16 = vpop.f32.mrf.mxu1 }
 0x395   : > { %2617 = vst [vmem:[%s4003_s12 + $0x58] sm:$0xff] %v2520_v62  ;;  %v2481_v0 = vpop.f32.mrf.mxu0 }
 0x396   : > { %v2522_v18 = vpop.f32.mrf.mxu1 }
 0x3cf   : > { %v2558_v4 = vpop.f32.mrf.mxu0 }
 0x3d0   : > { %v2559_v6 = vadd.f32 %v2558_v4, %v969_v1  ;;  %v2599_v7 = vpop.f32.mrf.mxu1 }
 0x3d1   : > { %v2600_v8 = vadd.f32 %v2599_v7, %v977_v2  ;;  %v2560_v9 = vpop.f32.mrf.mxu0 }
 0x3d2   : > { %2618 = vst [vmem:[%s4003_s12 + $0x60] sm:$0xff] %v2559_v6  ;;  %v2561_v10 = vadd.f32 %v2560_v9, %v973_v3  ;;  %v2601_v11 = vpop.f32.mrf.mxu1 }
 0x3d3   : > { %2620 = vst [vmem:[%s4003_s12 + $0x70] sm:$0xff] %v2600_v8  ;;  %v2602_v12 = vadd.f32 %v2601_v11, %v981_v5  ;;  %v2562_v13 = vpop.f32.mrf.mxu0 }
 0x3d4   : > { %2619 = vst [vmem:[%s4003_s12 + $0x68] sm:$0xff] %v2561_v10  ;;  %v2603_v14 = vpop.f32.mrf.mxu1 }
 0x3d5   : > { %2621 = vst [vmem:[%s4003_s12 + $0x78] sm:$0xff] %v2602_v12  ;;  %v2563_v17 = vpop.f32.mrf.mxu0 }
 0x3d6   : > { %v2604_v19 = vpop.f32.mrf.mxu1 }
 0x3d7   : > { %3371 = shalt.err (!%p3368_p9)
}
 0x3d8   : > { %s3372_s0 = scalar_lea.hbm %s4031_s21, 2048  ;;  %s3376_s16 = scalar_lea.hbm %s4083_s7, 4096 }
 0x3d9   : > { %p3373_p3 = scmp.ne.s32.totalorder %s4031_s21, %s3372_s0  ;;  %p3377_p4 = scmp.lt.s32.totalorder %s4031_s21, %s4083_s7 }
 0x3da   : > { %p3378_p10 = scmp.lt.s32.totalorder %s3376_s16, %s3372_s0 }
 0x3db   : > { %p3374_p6 = pnand %p3373_p3, %p4124_p5 }
 0x3dc   : > { %p3379_p2 = por %p3378_p10, %p3377_p4 }
 0x3dd   : > { %p3375_p12 = pneg %p3374_p6 }
 0x3df   : > { %p3380_p1 = pnand %p3379_p2, %p3375_p12 }
 0x3e1   : > { %3383 = shalt.err (!%p3380_p1)
}
 0x3e2   : > { %3089 = dma.vmem_to_hbm [thread:$0]  (%p4124_p5), %s4033_s13, 2048, %s4031_s21, %s2623_s30  }
 0x3e3 PF: > { %s2649_s9 = sand.u32 1, %s3422_s24   ;;  %p4125_p8 = scmp.ne.s32.totalorder %s4107_s15, 0 }
 0x3e4   : > { %p4126_p7 = scmp.ge.s32.totalorder %s3434_s27, 2  ;;  %s2650_s3 = scalar_lea.sflag [#allocation4], %s2649_s9 }
 0x3e6   : > { %p3115_p0 = pnand %p4126_p7, %p4125_p8 }
 0x3e8   : > { %p3116_p13 = pneg %p3115_p0 }
 0x3ea   : > { %3417 = dma.done.wait (%p3116_p13), %s2650_s3, 2048  }
 0x3eb   : > { %3419 = vsyncadd (%p3116_p13), %s2650_s3, 4294965248  ;;  %p23_p11 = scmp.ge.s32.totalorder %s3550_s22, 4   ;;  %s4127_s24 = smov %s3426_s25 }
 0x3ec   : > { %s4128_s25 = smov %s3430_s26  ;;  %s4129_s26 = smov %s3561_s29 }
 0x3ed   : > { %s4130_s27 = smov %s3550_s22  ;;  %25 = sbr.rel (!%p23_p11) target bundleno = 13 (0xd), region = 125 }
 0x3f2   :  { %2655 = vsyncpa [#allocation3], 1 }
 0x3f3   :  { %2657 = vsyncpa [#allocation3 + $0x1], 1 }
 0x3f4   :  { %2658 = vsyncpa [#allocation6], 1 }
 0x3f5   :  { %2659 = vsyncpa [#allocation9], 1 }
 0x3f6   :  { %2660 = vsyncpa [#allocation12], 1 }
 0x3f7   :  { %2662 = vsyncpa [#allocation12 + $0x1], 1 }
 0x3f8   :  { %2663 = vsyncpa [#allocation4], 1 }
 0x3f9   :  { %2665 = vsyncpa [#allocation4 + $0x1], 1 }

</bundles_post_ra>
